<compile_context>
chip_gen: v7x
topology: tpu7x:2x2x1
jax: 0.10.0
libtpu: 0.0.40
codegen_flags: <defaults>
</compile_context>

<pallas_src>
import jax
import jax.numpy as jnp
from jax import lax
from jax.experimental import pallas as pl
from jax.experimental.pallas import tpu as pltpu

# ---- small shapes (scaled down from MNIST 28x28, Conv2d(1,20,28), MNN(1,10,28),
#      fc 24000->10000->1000->100->2) ---------------------------------------------
B = 8                       # batch (>=8 so fc1 LHS fills a full sublane tile)
C_IN = 1                    # input channels
H = W = 16                  # spatial
K = 9                       # kernel size for both conv and morph branch (module uses 28)
OH = OW = H - K + 1         # 8
L = OH * OW                 # 64
F = C_IN * K * K            # 81
F_PAD = 128                 # F padded to a full lane tile
OC_CONV = 8                 # scaled from 20
OC_MORPH = 4                # scaled from 10
OC_TOT = OC_MORPH + OC_CONV             # 12
D_FLAT = OC_TOT * L                     # 768  (module: 24000)
H1, H2, H3, OUT = 128, 64, 32, 2        # module: 10000, 1000, 100, 2
NEG_BIG = -1e30             # sentinel so padded lanes never win min/max


def _vmem():
    return pl.BlockSpec(memory_space=pltpu.MemorySpace.VMEM)


# ------------------------------ fused Pallas kernel -------------------------------
def mcnn_kernel(pt_ref, wct_ref, khit_ref, kmiss_ref, w1_ref, b1_ref,
                w234_ref, b234_ref, out_ref):
    """Fused forward: conv + hit-or-miss morph + fc1(relu) + folded fc2..fc4 + log_softmax.

    pt_ref   : (F_PAD, B*L)  f32   im2col patches, feature-major, zero-padded features
    wct_ref  : (OC_CONV, F_PAD) bf16  conv weight, transposed, zero-padded (bias folded in b1)
    khit_ref : (F_PAD, OC_MORPH) f32  hit structuring elements, -1e30-padded
    kmiss_ref: (F_PAD, OC_MORPH) f32  miss structuring elements, -1e30-padded
    w1_ref   : (D_FLAT, H1) bf16   fc1 weight (row = ch_global*L + l, cat((morph,conv)) order)
    b1_ref   : (1, H1) f32         fc1 bias + folded conv bias contribution
    w234_ref : (H1, OUT) f32, b234_ref: (1, OUT) f32   folded fc2*fc3*fc4
    """
    p = pt_ref[...]                                               # (F_PAD, B*L) f32
    p_bf = p.astype(jnp.bfloat16)                                 # bf16 copy only for MXU

    # ---- ConvNet.conv1 as ONE bf16 im2col matmul on the MXU ----------------------
    convT = jnp.dot(wct_ref[...], p_bf,
                    preferred_element_type=jnp.float32)           # (OC_CONV, B*L) f32

    khit = khit_ref[...]                                          # (F_PAD, OC_MORPH) f32
    kmiss = kmiss_ref[...]

    def de_interleave(row):
        # (1, B*L) lane-packed row -> (B, L): batch chunks of the lane axis to sublanes.
        return jnp.concatenate([row[:, b * L:(b + 1) * L] for b in range(B)], axis=0)

    blocks = []
    # ---- MorphNet.MNN1 hit-or-miss (cat() puts morph channels first) -------------
    # Kept per-channel on purpose: a fully vectorized (F_PAD, OC_MORPH, B*L) intermediate
    # would blow the register file.  Morph min/max stays f32 (sentinel / ordering safety).
    # TODO(synk): MNN is not defined in the provided source; standard
    # erosion(x, K_hit) - dilation(x, K_miss) hit-or-miss formulation is used.
    for k in range(OC_MORPH):
        hit = jnp.min(p - khit[:, k:k + 1], axis=0, keepdims=True)    # (1, B*L)
        miss = jnp.max(p + kmiss[:, k:k + 1], axis=0, keepdims=True)  # (1, B*L)
        blocks.append(de_interleave(hit - miss))                      # (B, L)
    # ---- conv channels fill the remaining fc1 lane blocks -------------------------
    for c in range(OC_CONV):
        blocks.append(de_interleave(convT[c:c + 1, :]))               # (B, L)

    # ---- fc1 as ONE bf16 MXU dot over the full D_FLAT contraction -----------------
    lhs = jnp.concatenate(blocks, axis=1)                         # (B, D_FLAT) f32
    h = jnp.dot(lhs.astype(jnp.bfloat16), w1_ref[...],
                preferred_element_type=jnp.float32) + b1_ref[...]  # bias in epilogue
    h = jnp.maximum(h, 0.0)                                       # F.relu(fc1(x))

    # ---- folded fc2*fc3*fc4 (tiny, kept f32) + log_softmax -------------------------
    logits = jnp.dot(h, w234_ref[...], preferred_element_type=jnp.float32) + b234_ref[...]
    m = jnp.max(logits, axis=1, keepdims=True)                    # F.log_softmax(., 1)
    lse = m + jnp.log(jnp.sum(jnp.exp(logits - m), axis=1, keepdims=True))
    out_ref[...] = logits - lse


# ------------------------------------ glue ----------------------------------------
def make_patches_t(x):
    """(B, C, H, W) -> (F_PAD, B*L): feature-major, lane-packed (b, l), zero-padded.

    Single transpose (no (B, L, F) detour); fused into the same jit as the pallas_call.
    """
    pat = lax.conv_general_dilated_patches(x, (K, K), (1, 1), 'VALID')   # (B, F, OH, OW)
    pt = jnp.transpose(pat.reshape(B, F, L), (1, 0, 2)).reshape(F, B * L)
    return jnp.pad(pt, ((0, F_PAD - F), (0, 0)))                  # zeros: neutral for matmul


def extract_patches(x):
    """(B, C, H, W) -> (B, L, F): reference-only helper."""
    pat = lax.conv_general_dilated_patches(x, (K, K), (1, 1), 'VALID')   # (B, F, OH, OW)
    return jnp.transpose(pat.reshape(B, F, L), (0, 2, 1))


def prepare_params(raw):
    """Trace-time weight prep: pad, transpose, cast matmul weights to bf16, fold biases
    and fc2*fc3*fc4."""
    wct = jnp.pad(raw['wc'].T, ((0, 0), (0, F_PAD - F))).astype(jnp.bfloat16)   # (OC_CONV, F_PAD)
    khit_t = jnp.pad(raw['khit'].T, ((0, F_PAD - F), (0, 0)), constant_values=NEG_BIG)
    kmiss_t = jnp.pad(raw['kmiss'].T, ((0, F_PAD - F), (0, 0)), constant_values=NEG_BIG)
    # cat((morph, conv), dim=1).view(B,-1) => fc1 row index = ch_global*L + l, which is
    # exactly the lane order the kernel builds -> w1 needs no permutation, only a bf16 cast.
    w1r = raw['w1'].reshape(OC_TOT, L, H1)
    # fold conv bias into fc1 bias:  b1 += sum_{c,l} bc[c] * w1[conv ch c, l, :]
    b1_eff = raw['b1'] + jnp.einsum('c,clj->j', raw['bc'][0], w1r[OC_MORPH:])[None, :]
    # fold fc2*fc3*fc4 (no nonlinearity after fc1 -> exact linear composition), kept f32
    w234 = raw['w2'] @ raw['w3'] @ raw['w4']                                  # (H1, OUT)
    b234 = (raw['b2'] @ raw['w3'] + raw['b3']) @ raw['w4'] + raw['b4']        # (1, OUT)
    return dict(wct=wct, khit_t=khit_t, kmiss_t=kmiss_t,
                w1=raw['w1'].astype(jnp.bfloat16),
                b1_eff=b1_eff.astype(jnp.float32),
                w234=w234.astype(jnp.float32), b234=b234.astype(jnp.float32))


@jax.jit
def mcnn_forward(x, prep):
    # `epoch` arg of the torch forward only controls logging -> irrelevant here.
    pt = make_patches_t(x)
    return pl.pallas_call(
        mcnn_kernel,
        out_shape=jax.ShapeDtypeStruct((B, OUT), jnp.float32),
        in_specs=[_vmem()] * 8,
        out_specs=_vmem(),
    )(pt, prep['wct'], prep['khit_t'], prep['kmiss_t'], prep['w1'],
      prep['b1_eff'], prep['w234'], prep['b234'])


# --------------------------- deterministic raw params ------------------------------
def init_params(key):
    ks = jax.random.split(key, 12)

    def lin(kw, kb, fan_in, fan_out):
        bound = 1.0 / float(fan_in) ** 0.5
        w = jax.random.uniform(kw, (fan_in, fan_out), jnp.float32, -bound, bound)
        b = jax.random.uniform(kb, (1, fan_out), jnp.float32, -bound, bound)
        return w, b

    wc, bc = lin(ks[0], ks[1], F, OC_CONV)     # Conv2d(1,OC,K) weight flattened (F, OC)
    khit = jax.random.uniform(ks[2], (OC_MORPH, F), jnp.float32, 0.0, 0.5)
    kmiss = jax.random.uniform(ks[3], (OC_MORPH, F), jnp.float32, 0.0, 0.5)
    w1, b1 = lin(ks[4], ks[5], D_FLAT, H1)
    w2, b2 = lin(ks[6], ks[7], H1, H2)
    w3, b3 = lin(ks[8], ks[9], H2, H3)
    w4, b4 = lin(ks[10], ks[11], H3, OUT)
    return dict(wc=wc, bc=bc, khit=khit, kmiss=kmiss,
                w1=w1, b1=b1, w2=w2, b2=b2, w3=w3, b3=b3, w4=w4, b4=b4)


# ------------------------------ pure-JAX reference ---------------------------------
def reference(x, raw):
    p = extract_patches(x)                                                   # (B, L, F)
    conv = jnp.einsum('blf,fo->blo', p, raw['wc']) + raw['bc']               # (B, L, OC_CONV)
    hit = jnp.min(p[:, :, None, :] - raw['khit'][None, None], axis=-1)       # (B, L, OC_MORPH)
    miss = jnp.max(p[:, :, None, :] + raw['kmiss'][None, None], axis=-1)
    morph = hit - miss
    m_out = jnp.transpose(morph, (0, 2, 1)).reshape(B, OC_MORPH, OH, OW)     # MorphNet output
    c_out = jnp.transpose(conv, (0, 2, 1)).reshape(B, OC_CONV, OH, OW)       # ConvNet output
    flat = jnp.concatenate((m_out, c_out), axis=1).reshape(B, -1)            # cat(dim=1).view(B,-1)
    h = jnp.maximum(flat @ raw['w1'] + raw['b1'], 0.0)
    h = h @ raw['w2'] + raw['b2']
    h = h @ raw['w3'] + raw['b3']
    logits = h @ raw['w4'] + raw['b4']
    return jax.nn.log_softmax(logits, axis=1)


if __name__ == "__main__":
    key = jax.random.PRNGKey(0)
    kx, kp = jax.random.split(key)
    x = jax.random.normal(kx, (B, C_IN, H, W), jnp.float32)
    raw = init_params(kp)
    prep = prepare_params(raw)

    out = mcnn_forward(x, prep)
    jax.block_until_ready(out)
    assert out.shape == (B, OUT), out.shape

    ref = reference(x, raw)
    assert jnp.allclose(out, ref, atol=1e-2, rtol=1e-2), (out, ref)
    print("KERNEL_OK")
</pallas_src>

<mosaic_0001>
module attributes {stable_mosaic.version = 11 : i64} {
  func.func @mcnn_kernel(%arg0: memref<128x512xf32, #tpu.memory_space<vmem>>, %arg1: memref<8x128xbf16, #tpu.memory_space<vmem>>, %arg2: memref<128x4xf32, #tpu.memory_space<vmem>>, %arg3: memref<128x4xf32, #tpu.memory_space<vmem>>, %arg4: memref<768x128xbf16, #tpu.memory_space<vmem>>, %arg5: memref<1x128xf32, #tpu.memory_space<vmem>>, %arg6: memref<128x2xf32, #tpu.memory_space<vmem>>, %arg7: memref<1x2xf32, #tpu.memory_space<vmem>>, %arg8: memref<8x2xf32, #tpu.memory_space<vmem>>) attributes {dimension_semantics = [], scalar_prefetch = 0 : i64, scratch_operands = 0 : i64, tpu.core_type = #tpu.core_type<tc>} {
    %c0 = arith.constant 0 : index
    %c0_0 = arith.constant 0 : index
    %0 = vector.load %arg0[%c0, %c0_0] : memref<128x512xf32, #tpu.memory_space<vmem>>, vector<128x512xf32>
    %1 = arith.truncf %0 : vector<128x512xf32> to vector<128x512xbf16>
    %c0_1 = arith.constant 0 : index
    %c0_2 = arith.constant 0 : index
    %2 = vector.load %arg1[%c0_1, %c0_2] : memref<8x128xbf16, #tpu.memory_space<vmem>>, vector<8x128xbf16>
    %cst = arith.constant dense<0.000000e+00> : vector<8x512xf32>
    %3 = tpu.matmul %2, %1, %cst {dimension_numbers = #tpu.dot_dimension_numbers<[1], [0], [0], [1], [0, 0, 1, 1], [], []>} : vector<8x128xbf16>, vector<128x512xbf16>, vector<8x512xf32> -> vector<8x512xf32>
    %c0_3 = arith.constant 0 : index
    %c0_4 = arith.constant 0 : index
    %4 = vector.load %arg2[%c0_3, %c0_4] : memref<128x4xf32, #tpu.memory_space<vmem>>, vector<128x4xf32>
    %c0_5 = arith.constant 0 : index
    %c0_6 = arith.constant 0 : index
    %5 = vector.load %arg3[%c0_5, %c0_6] : memref<128x4xf32, #tpu.memory_space<vmem>>, vector<128x4xf32>
    %6 = vector.extract_strided_slice %4 {offsets = [0, 0], sizes = [128, 1], strides = [1, 1]} : vector<128x4xf32> to vector<128x1xf32>
    %7 = vector.broadcast %6 : vector<128x1xf32> to vector<128x512xf32>
    %8 = arith.subf %0, %7 : vector<128x512xf32>
    %cst_7 = arith.constant dense<0x7F800000> : vector<512xf32>
    %9 = vector.multi_reduction <minimumf>, %8, %cst_7 [0] : vector<128x512xf32> to vector<512xf32>
    %10 = vector.shape_cast %9 : vector<512xf32> to vector<1x512xf32>
    %11 = vector.extract_strided_slice %5 {offsets = [0, 0], sizes = [128, 1], strides = [1, 1]} : vector<128x4xf32> to vector<128x1xf32>
    %12 = vector.broadcast %11 : vector<128x1xf32> to vector<128x512xf32>
    %13 = arith.addf %0, %12 : vector<128x512xf32>
    %cst_8 = arith.constant dense<0xFF800000> : vector<512xf32>
    %14 = vector.multi_reduction <maximumf>, %13, %cst_8 [0] : vector<128x512xf32> to vector<512xf32>
    %15 = vector.shape_cast %14 : vector<512xf32> to vector<1x512xf32>
    %16 = arith.subf %10, %15 : vector<1x512xf32>
    %17 = vector.extract_strided_slice %16 {offsets = [0, 0], sizes = [1, 64], strides = [1, 1]} : vector<1x512xf32> to vector<1x64xf32>
    %18 = vector.extract_strided_slice %16 {offsets = [0, 64], sizes = [1, 64], strides = [1, 1]} : vector<1x512xf32> to vector<1x64xf32>
    %19 = vector.extract_strided_slice %16 {offsets = [0, 128], sizes = [1, 64], strides = [1, 1]} : vector<1x512xf32> to vector<1x64xf32>
    %20 = vector.extract_strided_slice %16 {offsets = [0, 192], sizes = [1, 64], strides = [1, 1]} : vector<1x512xf32> to vector<1x64xf32>
    %21 = vector.extract_strided_slice %16 {offsets = [0, 256], sizes = [1, 64], strides = [1, 1]} : vector<1x512xf32> to vector<1x64xf32>
    %22 = vector.extract_strided_slice %16 {offsets = [0, 320], sizes = [1, 64], strides = [1, 1]} : vector<1x512xf32> to vector<1x64xf32>
    %23 = vector.extract_strided_slice %16 {offsets = [0, 384], sizes = [1, 64], strides = [1, 1]} : vector<1x512xf32> to vector<1x64xf32>
    %24 = vector.extract_strided_slice %16 {offsets = [0, 448], sizes = [1, 64], strides = [1, 1]} : vector<1x512xf32> to vector<1x64xf32>
    %25 = tpu.concatenate %17, %18, %19, %20, %21, %22, %23, %24 in 0 : vector<1x64xf32>, vector<1x64xf32>, vector<1x64xf32>, vector<1x64xf32>, vector<1x64xf32>, vector<1x64xf32>, vector<1x64xf32>, vector<1x64xf32> -> vector<8x64xf32>
    %26 = vector.extract_strided_slice %4 {offsets = [0, 1], sizes = [128, 1], strides = [1, 1]} : vector<128x4xf32> to vector<128x1xf32>
    %27 = vector.broadcast %26 : vector<128x1xf32> to vector<128x512xf32>
    %28 = arith.subf %0, %27 : vector<128x512xf32>
    %cst_9 = arith.constant dense<0x7F800000> : vector<512xf32>
    %29 = vector.multi_reduction <minimumf>, %28, %cst_9 [0] : vector<128x512xf32> to vector<512xf32>
    %30 = vector.shape_cast %29 : vector<512xf32> to vector<1x512xf32>
    %31 = vector.extract_strided_slice %5 {offsets = [0, 1], sizes = [128, 1], strides = [1, 1]} : vector<128x4xf32> to vector<128x1xf32>
    %32 = vector.broadcast %31 : vector<128x1xf32> to vector<128x512xf32>
    %33 = arith.addf %0, %32 : vector<128x512xf32>
    %cst_10 = arith.constant dense<0xFF800000> : vector<512xf32>
    %34 = vector.multi_reduction <maximumf>, %33, %cst_10 [0] : vector<128x512xf32> to vector<512xf32>
    %35 = vector.shape_cast %34 : vector<512xf32> to vector<1x512xf32>
    %36 = arith.subf %30, %35 : vector<1x512xf32>
    %37 = vector.extract_strided_slice %36 {offsets = [0, 0], sizes = [1, 64], strides = [1, 1]} : vector<1x512xf32> to vector<1x64xf32>
    %38 = vector.extract_strided_slice %36 {offsets = [0, 64], sizes = [1, 64], strides = [1, 1]} : vector<1x512xf32> to vector<1x64xf32>
    %39 = vector.extract_strided_slice %36 {offsets = [0, 128], sizes = [1, 64], strides = [1, 1]} : vector<1x512xf32> to vector<1x64xf32>
    %40 = vector.extract_strided_slice %36 {offsets = [0, 192], sizes = [1, 64], strides = [1, 1]} : vector<1x512xf32> to vector<1x64xf32>
    %41 = vector.extract_strided_slice %36 {offsets = [0, 256], sizes = [1, 64], strides = [1, 1]} : vector<1x512xf32> to vector<1x64xf32>
    %42 = vector.extract_strided_slice %36 {offsets = [0, 320], sizes = [1, 64], strides = [1, 1]} : vector<1x512xf32> to vector<1x64xf32>
    %43 = vector.extract_strided_slice %36 {offsets = [0, 384], sizes = [1, 64], strides = [1, 1]} : vector<1x512xf32> to vector<1x64xf32>
    %44 = vector.extract_strided_slice %36 {offsets = [0, 448], sizes = [1, 64], strides = [1, 1]} : vector<1x512xf32> to vector<1x64xf32>
    %45 = tpu.concatenate %37, %38, %39, %40, %41, %42, %43, %44 in 0 : vector<1x64xf32>, vector<1x64xf32>, vector<1x64xf32>, vector<1x64xf32>, vector<1x64xf32>, vector<1x64xf32>, vector<1x64xf32>, vector<1x64xf32> -> vector<8x64xf32>
    %46 = vector.extract_strided_slice %4 {offsets = [0, 2], sizes = [128, 1], strides = [1, 1]} : vector<128x4xf32> to vector<128x1xf32>
    %47 = vector.broadcast %46 : vector<128x1xf32> to vector<128x512xf32>
    %48 = arith.subf %0, %47 : vector<128x512xf32>
    %cst_11 = arith.constant dense<0x7F800000> : vector<512xf32>
    %49 = vector.multi_reduction <minimumf>, %48, %cst_11 [0] : vector<128x512xf32> to vector<512xf32>
    %50 = vector.shape_cast %49 : vector<512xf32> to vector<1x512xf32>
    %51 = vector.extract_strided_slice %5 {offsets = [0, 2], sizes = [128, 1], strides = [1, 1]} : vector<128x4xf32> to vector<128x1xf32>
    %52 = vector.broadcast %51 : vector<128x1xf32> to vector<128x512xf32>
    %53 = arith.addf %0, %52 : vector<128x512xf32>
    %cst_12 = arith.constant dense<0xFF800000> : vector<512xf32>
    %54 = vector.multi_reduction <maximumf>, %53, %cst_12 [0] : vector<128x512xf32> to vector<512xf32>
    %55 = vector.shape_cast %54 : vector<512xf32> to vector<1x512xf32>
    %56 = arith.subf %50, %55 : vector<1x512xf32>
    %57 = vector.extract_strided_slice %56 {offsets = [0, 0], sizes = [1, 64], strides = [1, 1]} : vector<1x512xf32> to vector<1x64xf32>
    %58 = vector.extract_strided_slice %56 {offsets = [0, 64], sizes = [1, 64], strides = [1, 1]} : vector<1x512xf32> to vector<1x64xf32>
    %59 = vector.extract_strided_slice %56 {offsets = [0, 128], sizes = [1, 64], strides = [1, 1]} : vector<1x512xf32> to vector<1x64xf32>
    %60 = vector.extract_strided_slice %56 {offsets = [0, 192], sizes = [1, 64], strides = [1, 1]} : vector<1x512xf32> to vector<1x64xf32>
    %61 = vector.extract_strided_slice %56 {offsets = [0, 256], sizes = [1, 64], strides = [1, 1]} : vector<1x512xf32> to vector<1x64xf32>
    %62 = vector.extract_strided_slice %56 {offsets = [0, 320], sizes = [1, 64], strides = [1, 1]} : vector<1x512xf32> to vector<1x64xf32>
    %63 = vector.extract_strided_slice %56 {offsets = [0, 384], sizes = [1, 64], strides = [1, 1]} : vector<1x512xf32> to vector<1x64xf32>
    %64 = vector.extract_strided_slice %56 {offsets = [0, 448], sizes = [1, 64], strides = [1, 1]} : vector<1x512xf32> to vector<1x64xf32>
    %65 = tpu.concatenate %57, %58, %59, %60, %61, %62, %63, %64 in 0 : vector<1x64xf32>, vector<1x64xf32>, vector<1x64xf32>, vector<1x64xf32>, vector<1x64xf32>, vector<1x64xf32>, vector<1x64xf32>, vector<1x64xf32> -> vector<8x64xf32>
    %66 = vector.extract_strided_slice %4 {offsets = [0, 3], sizes = [128, 1], strides = [1, 1]} : vector<128x4xf32> to vector<128x1xf32>
    %67 = vector.broadcast %66 : vector<128x1xf32> to vector<128x512xf32>
    %68 = arith.subf %0, %67 : vector<128x512xf32>
    %cst_13 = arith.constant dense<0x7F800000> : vector<512xf32>
    %69 = vector.multi_reduction <minimumf>, %68, %cst_13 [0] : vector<128x512xf32> to vector<512xf32>
    %70 = vector.shape_cast %69 : vector<512xf32> to vector<1x512xf32>
    %71 = vector.extract_strided_slice %5 {offsets = [0, 3], sizes = [128, 1], strides = [1, 1]} : vector<128x4xf32> to vector<128x1xf32>
    %72 = vector.broadcast %71 : vector<128x1xf32> to vector<128x512xf32>
    %73 = arith.addf %0, %72 : vector<128x512xf32>
    %cst_14 = arith.constant dense<0xFF800000> : vector<512xf32>
    %74 = vector.multi_reduction <maximumf>, %73, %cst_14 [0] : vector<128x512xf32> to vector<512xf32>
    %75 = vector.shape_cast %74 : vector<512xf32> to vector<1x512xf32>
    %76 = arith.subf %70, %75 : vector<1x512xf32>
    %77 = vector.extract_strided_slice %76 {offsets = [0, 0], sizes = [1, 64], strides = [1, 1]} : vector<1x512xf32> to vector<1x64xf32>
    %78 = vector.extract_strided_slice %76 {offsets = [0, 64], sizes = [1, 64], strides = [1, 1]} : vector<1x512xf32> to vector<1x64xf32>
    %79 = vector.extract_strided_slice %76 {offsets = [0, 128], sizes = [1, 64], strides = [1, 1]} : vector<1x512xf32> to vector<1x64xf32>
    %80 = vector.extract_strided_slice %76 {offsets = [0, 192], sizes = [1, 64], strides = [1, 1]} : vector<1x512xf32> to vector<1x64xf32>
    %81 = vector.extract_strided_slice %76 {offsets = [0, 256], sizes = [1, 64], strides = [1, 1]} : vector<1x512xf32> to vector<1x64xf32>
    %82 = vector.extract_strided_slice %76 {offsets = [0, 320], sizes = [1, 64], strides = [1, 1]} : vector<1x512xf32> to vector<1x64xf32>
    %83 = vector.extract_strided_slice %76 {offsets = [0, 384], sizes = [1, 64], strides = [1, 1]} : vector<1x512xf32> to vector<1x64xf32>
    %84 = vector.extract_strided_slice %76 {offsets = [0, 448], sizes = [1, 64], strides = [1, 1]} : vector<1x512xf32> to vector<1x64xf32>
    %85 = tpu.concatenate %77, %78, %79, %80, %81, %82, %83, %84 in 0 : vector<1x64xf32>, vector<1x64xf32>, vector<1x64xf32>, vector<1x64xf32>, vector<1x64xf32>, vector<1x64xf32>, vector<1x64xf32>, vector<1x64xf32> -> vector<8x64xf32>
    %86 = vector.extract_strided_slice %3 {offsets = [0, 0], sizes = [1, 512], strides = [1, 1]} : vector<8x512xf32> to vector<1x512xf32>
    %87 = vector.extract_strided_slice %86 {offsets = [0, 0], sizes = [1, 64], strides = [1, 1]} : vector<1x512xf32> to vector<1x64xf32>
    %88 = vector.extract_strided_slice %86 {offsets = [0, 64], sizes = [1, 64], strides = [1, 1]} : vector<1x512xf32> to vector<1x64xf32>
    %89 = vector.extract_strided_slice %86 {offsets = [0, 128], sizes = [1, 64], strides = [1, 1]} : vector<1x512xf32> to vector<1x64xf32>
    %90 = vector.extract_strided_slice %86 {offsets = [0, 192], sizes = [1, 64], strides = [1, 1]} : vector<1x512xf32> to vector<1x64xf32>
    %91 = vector.extract_strided_slice %86 {offsets = [0, 256], sizes = [1, 64], strides = [1, 1]} : vector<1x512xf32> to vector<1x64xf32>
    %92 = vector.extract_strided_slice %86 {offsets = [0, 320], sizes = [1, 64], strides = [1, 1]} : vector<1x512xf32> to vector<1x64xf32>
    %93 = vector.extract_strided_slice %86 {offsets = [0, 384], sizes = [1, 64], strides = [1, 1]} : vector<1x512xf32> to vector<1x64xf32>
    %94 = vector.extract_strided_slice %86 {offsets = [0, 448], sizes = [1, 64], strides = [1, 1]} : vector<1x512xf32> to vector<1x64xf32>
    %95 = tpu.concatenate %87, %88, %89, %90, %91, %92, %93, %94 in 0 : vector<1x64xf32>, vector<1x64xf32>, vector<1x64xf32>, vector<1x64xf32>, vector<1x64xf32>, vector<1x64xf32>, vector<1x64xf32>, vector<1x64xf32> -> vector<8x64xf32>
    %96 = vector.extract_strided_slice %3 {offsets = [1, 0], sizes = [1, 512], strides = [1, 1]} : vector<8x512xf32> to vector<1x512xf32>
    %97 = vector.extract_strided_slice %96 {offsets = [0, 0], sizes = [1, 64], strides = [1, 1]} : vector<1x512xf32> to vector<1x64xf32>
    %98 = vector.extract_strided_slice %96 {offsets = [0, 64], sizes = [1, 64], strides = [1, 1]} : vector<1x512xf32> to vector<1x64xf32>
    %99 = vector.extract_strided_slice %96 {offsets = [0, 128], sizes = [1, 64], strides = [1, 1]} : vector<1x512xf32> to vector<1x64xf32>
    %100 = vector.extract_strided_slice %96 {offsets = [0, 192], sizes = [1, 64], strides = [1, 1]} : vector<1x512xf32> to vector<1x64xf32>
    %101 = vector.extract_strided_slice %96 {offsets = [0, 256], sizes = [1, 64], strides = [1, 1]} : vector<1x512xf32> to vector<1x64xf32>
    %102 = vector.extract_strided_slice %96 {offsets = [0, 320], sizes = [1, 64], strides = [1, 1]} : vector<1x512xf32> to vector<1x64xf32>
    %103 = vector.extract_strided_slice %96 {offsets = [0, 384], sizes = [1, 64], strides = [1, 1]} : vector<1x512xf32> to vector<1x64xf32>
    %104 = vector.extract_strided_slice %96 {offsets = [0, 448], sizes = [1, 64], strides = [1, 1]} : vector<1x512xf32> to vector<1x64xf32>
    %105 = tpu.concatenate %97, %98, %99, %100, %101, %102, %103, %104 in 0 : vector<1x64xf32>, vector<1x64xf32>, vector<1x64xf32>, vector<1x64xf32>, vector<1x64xf32>, vector<1x64xf32>, vector<1x64xf32>, vector<1x64xf32> -> vector<8x64xf32>
    %106 = vector.extract_strided_slice %3 {offsets = [2, 0], sizes = [1, 512], strides = [1, 1]} : vector<8x512xf32> to vector<1x512xf32>
    %107 = vector.extract_strided_slice %106 {offsets = [0, 0], sizes = [1, 64], strides = [1, 1]} : vector<1x512xf32> to vector<1x64xf32>
    %108 = vector.extract_strided_slice %106 {offsets = [0, 64], sizes = [1, 64], strides = [1, 1]} : vector<1x512xf32> to vector<1x64xf32>
    %109 = vector.extract_strided_slice %106 {offsets = [0, 128], sizes = [1, 64], strides = [1, 1]} : vector<1x512xf32> to vector<1x64xf32>
    %110 = vector.extract_strided_slice %106 {offsets = [0, 192], sizes = [1, 64], strides = [1, 1]} : vector<1x512xf32> to vector<1x64xf32>
    %111 = vector.extract_strided_slice %106 {offsets = [0, 256], sizes = [1, 64], strides = [1, 1]} : vector<1x512xf32> to vector<1x64xf32>
    %112 = vector.extract_strided_slice %106 {offsets = [0, 320], sizes = [1, 64], strides = [1, 1]} : vector<1x512xf32> to vector<1x64xf32>
    %113 = vector.extract_strided_slice %106 {offsets = [0, 384], sizes = [1, 64], strides = [1, 1]} : vector<1x512xf32> to vector<1x64xf32>
    %114 = vector.extract_strided_slice %106 {offsets = [0, 448], sizes = [1, 64], strides = [1, 1]} : vector<1x512xf32> to vector<1x64xf32>
    %115 = tpu.concatenate %107, %108, %109, %110, %111, %112, %113, %114 in 0 : vector<1x64xf32>, vector<1x64xf32>, vector<1x64xf32>, vector<1x64xf32>, vector<1x64xf32>, vector<1x64xf32>, vector<1x64xf32>, vector<1x64xf32> -> vector<8x64xf32>
    %116 = vector.extract_strided_slice %3 {offsets = [3, 0], sizes = [1, 512], strides = [1, 1]} : vector<8x512xf32> to vector<1x512xf32>
    %117 = vector.extract_strided_slice %116 {offsets = [0, 0], sizes = [1, 64], strides = [1, 1]} : vector<1x512xf32> to vector<1x64xf32>
    %118 = vector.extract_strided_slice %116 {offsets = [0, 64], sizes = [1, 64], strides = [1, 1]} : vector<1x512xf32> to vector<1x64xf32>
    %119 = vector.extract_strided_slice %116 {offsets = [0, 128], sizes = [1, 64], strides = [1, 1]} : vector<1x512xf32> to vector<1x64xf32>
    %120 = vector.extract_strided_slice %116 {offsets = [0, 192], sizes = [1, 64], strides = [1, 1]} : vector<1x512xf32> to vector<1x64xf32>
    %121 = vector.extract_strided_slice %116 {offsets = [0, 256], sizes = [1, 64], strides = [1, 1]} : vector<1x512xf32> to vector<1x64xf32>
    %122 = vector.extract_strided_slice %116 {offsets = [0, 320], sizes = [1, 64], strides = [1, 1]} : vector<1x512xf32> to vector<1x64xf32>
    %123 = vector.extract_strided_slice %116 {offsets = [0, 384], sizes = [1, 64], strides = [1, 1]} : vector<1x512xf32> to vector<1x64xf32>
    %124 = vector.extract_strided_slice %116 {offsets = [0, 448], sizes = [1, 64], strides = [1, 1]} : vector<1x512xf32> to vector<1x64xf32>
    %125 = tpu.concatenate %117, %118, %119, %120, %121, %122, %123, %124 in 0 : vector<1x64xf32>, vector<1x64xf32>, vector<1x64xf32>, vector<1x64xf32>, vector<1x64xf32>, vector<1x64xf32>, vector<1x64xf32>, vector<1x64xf32> -> vector<8x64xf32>
    %126 = vector.extract_strided_slice %3 {offsets = [4, 0], sizes = [1, 512], strides = [1, 1]} : vector<8x512xf32> to vector<1x512xf32>
    %127 = vector.extract_strided_slice %126 {offsets = [0, 0], sizes = [1, 64], strides = [1, 1]} : vector<1x512xf32> to vector<1x64xf32>
    %128 = vector.extract_strided_slice %126 {offsets = [0, 64], sizes = [1, 64], strides = [1, 1]} : vector<1x512xf32> to vector<1x64xf32>
    %129 = vector.extract_strided_slice %126 {offsets = [0, 128], sizes = [1, 64], strides = [1, 1]} : vector<1x512xf32> to vector<1x64xf32>
    %130 = vector.extract_strided_slice %126 {offsets = [0, 192], sizes = [1, 64], strides = [1, 1]} : vector<1x512xf32> to vector<1x64xf32>
    %131 = vector.extract_strided_slice %126 {offsets = [0, 256], sizes = [1, 64], strides = [1, 1]} : vector<1x512xf32> to vector<1x64xf32>
    %132 = vector.extract_strided_slice %126 {offsets = [0, 320], sizes = [1, 64], strides = [1, 1]} : vector<1x512xf32> to vector<1x64xf32>
    %133 = vector.extract_strided_slice %126 {offsets = [0, 384], sizes = [1, 64], strides = [1, 1]} : vector<1x512xf32> to vector<1x64xf32>
    %134 = vector.extract_strided_slice %126 {offsets = [0, 448], sizes = [1, 64], strides = [1, 1]} : vector<1x512xf32> to vector<1x64xf32>
    %135 = tpu.concatenate %127, %128, %129, %130, %131, %132, %133, %134 in 0 : vector<1x64xf32>, vector<1x64xf32>, vector<1x64xf32>, vector<1x64xf32>, vector<1x64xf32>, vector<1x64xf32>, vector<1x64xf32>, vector<1x64xf32> -> vector<8x64xf32>
    %136 = vector.extract_strided_slice %3 {offsets = [5, 0], sizes = [1, 512], strides = [1, 1]} : vector<8x512xf32> to vector<1x512xf32>
    %137 = vector.extract_strided_slice %136 {offsets = [0, 0], sizes = [1, 64], strides = [1, 1]} : vector<1x512xf32> to vector<1x64xf32>
    %138 = vector.extract_strided_slice %136 {offsets = [0, 64], sizes = [1, 64], strides = [1, 1]} : vector<1x512xf32> to vector<1x64xf32>
    %139 = vector.extract_strided_slice %136 {offsets = [0, 128], sizes = [1, 64], strides = [1, 1]} : vector<1x512xf32> to vector<1x64xf32>
    %140 = vector.extract_strided_slice %136 {offsets = [0, 192], sizes = [1, 64], strides = [1, 1]} : vector<1x512xf32> to vector<1x64xf32>
    %141 = vector.extract_strided_slice %136 {offsets = [0, 256], sizes = [1, 64], strides = [1, 1]} : vector<1x512xf32> to vector<1x64xf32>
    %142 = vector.extract_strided_slice %136 {offsets = [0, 320], sizes = [1, 64], strides = [1, 1]} : vector<1x512xf32> to vector<1x64xf32>
    %143 = vector.extract_strided_slice %136 {offsets = [0, 384], sizes = [1, 64], strides = [1, 1]} : vector<1x512xf32> to vector<1x64xf32>
    %144 = vector.extract_strided_slice %136 {offsets = [0, 448], sizes = [1, 64], strides = [1, 1]} : vector<1x512xf32> to vector<1x64xf32>
    %145 = tpu.concatenate %137, %138, %139, %140, %141, %142, %143, %144 in 0 : vector<1x64xf32>, vector<1x64xf32>, vector<1x64xf32>, vector<1x64xf32>, vector<1x64xf32>, vector<1x64xf32>, vector<1x64xf32>, vector<1x64xf32> -> vector<8x64xf32>
    %146 = vector.extract_strided_slice %3 {offsets = [6, 0], sizes = [1, 512], strides = [1, 1]} : vector<8x512xf32> to vector<1x512xf32>
    %147 = vector.extract_strided_slice %146 {offsets = [0, 0], sizes = [1, 64], strides = [1, 1]} : vector<1x512xf32> to vector<1x64xf32>
    %148 = vector.extract_strided_slice %146 {offsets = [0, 64], sizes = [1, 64], strides = [1, 1]} : vector<1x512xf32> to vector<1x64xf32>
    %149 = vector.extract_strided_slice %146 {offsets = [0, 128], sizes = [1, 64], strides = [1, 1]} : vector<1x512xf32> to vector<1x64xf32>
    %150 = vector.extract_strided_slice %146 {offsets = [0, 192], sizes = [1, 64], strides = [1, 1]} : vector<1x512xf32> to vector<1x64xf32>
    %151 = vector.extract_strided_slice %146 {offsets = [0, 256], sizes = [1, 64], strides = [1, 1]} : vector<1x512xf32> to vector<1x64xf32>
    %152 = vector.extract_strided_slice %146 {offsets = [0, 320], sizes = [1, 64], strides = [1, 1]} : vector<1x512xf32> to vector<1x64xf32>
    %153 = vector.extract_strided_slice %146 {offsets = [0, 384], sizes = [1, 64], strides = [1, 1]} : vector<1x512xf32> to vector<1x64xf32>
    %154 = vector.extract_strided_slice %146 {offsets = [0, 448], sizes = [1, 64], strides = [1, 1]} : vector<1x512xf32> to vector<1x64xf32>
    %155 = tpu.concatenate %147, %148, %149, %150, %151, %152, %153, %154 in 0 : vector<1x64xf32>, vector<1x64xf32>, vector<1x64xf32>, vector<1x64xf32>, vector<1x64xf32>, vector<1x64xf32>, vector<1x64xf32>, vector<1x64xf32> -> vector<8x64xf32>
    %156 = vector.extract_strided_slice %3 {offsets = [7, 0], sizes = [1, 512], strides = [1, 1]} : vector<8x512xf32> to vector<1x512xf32>
    %157 = vector.extract_strided_slice %156 {offsets = [0, 0], sizes = [1, 64], strides = [1, 1]} : vector<1x512xf32> to vector<1x64xf32>
    %158 = vector.extract_strided_slice %156 {offsets = [0, 64], sizes = [1, 64], strides = [1, 1]} : vector<1x512xf32> to vector<1x64xf32>
    %159 = vector.extract_strided_slice %156 {offsets = [0, 128], sizes = [1, 64], strides = [1, 1]} : vector<1x512xf32> to vector<1x64xf32>
    %160 = vector.extract_strided_slice %156 {offsets = [0, 192], sizes = [1, 64], strides = [1, 1]} : vector<1x512xf32> to vector<1x64xf32>
    %161 = vector.extract_strided_slice %156 {offsets = [0, 256], sizes = [1, 64], strides = [1, 1]} : vector<1x512xf32> to vector<1x64xf32>
    %162 = vector.extract_strided_slice %156 {offsets = [0, 320], sizes = [1, 64], strides = [1, 1]} : vector<1x512xf32> to vector<1x64xf32>
    %163 = vector.extract_strided_slice %156 {offsets = [0, 384], sizes = [1, 64], strides = [1, 1]} : vector<1x512xf32> to vector<1x64xf32>
    %164 = vector.extract_strided_slice %156 {offsets = [0, 448], sizes = [1, 64], strides = [1, 1]} : vector<1x512xf32> to vector<1x64xf32>
    %165 = tpu.concatenate %157, %158, %159, %160, %161, %162, %163, %164 in 0 : vector<1x64xf32>, vector<1x64xf32>, vector<1x64xf32>, vector<1x64xf32>, vector<1x64xf32>, vector<1x64xf32>, vector<1x64xf32>, vector<1x64xf32> -> vector<8x64xf32>
    %166 = tpu.concatenate %25, %45, %65, %85, %95, %105, %115, %125, %135, %145, %155, %165 in 1 : vector<8x64xf32>, vector<8x64xf32>, vector<8x64xf32>, vector<8x64xf32>, vector<8x64xf32>, vector<8x64xf32>, vector<8x64xf32>, vector<8x64xf32>, vector<8x64xf32>, vector<8x64xf32>, vector<8x64xf32>, vector<8x64xf32> -> vector<8x768xf32>
    %167 = arith.truncf %166 : vector<8x768xf32> to vector<8x768xbf16>
    %c0_15 = arith.constant 0 : index
    %c0_16 = arith.constant 0 : index
    %168 = vector.load %arg4[%c0_15, %c0_16] : memref<768x128xbf16, #tpu.memory_space<vmem>>, vector<768x128xbf16>
    %cst_17 = arith.constant dense<0.000000e+00> : vector<8x128xf32>
    %169 = tpu.matmul %167, %168, %cst_17 {dimension_numbers = #tpu.dot_dimension_numbers<[1], [0], [0], [1], [0, 0, 1, 1], [], []>} : vector<8x768xbf16>, vector<768x128xbf16>, vector<8x128xf32> -> vector<8x128xf32>
    %c0_18 = arith.constant 0 : index
    %c0_19 = arith.constant 0 : index
    %170 = vector.load %arg5[%c0_18, %c0_19] : memref<1x128xf32, #tpu.memory_space<vmem>>, vector<1x128xf32>
    %171 = vector.broadcast %170 : vector<1x128xf32> to vector<8x128xf32>
    %172 = arith.addf %169, %171 : vector<8x128xf32>
    %cst_20 = arith.constant 0.000000e+00 : f32
    %173 = vector.broadcast %cst_20 : f32 to vector<8x128xf32>
    %174 = arith.maximumf %172, %173 : vector<8x128xf32>
    %c0_21 = arith.constant 0 : index
    %c0_22 = arith.constant 0 : index
    %175 = vector.load %arg6[%c0_21, %c0_22] : memref<128x2xf32, #tpu.memory_space<vmem>>, vector<128x2xf32>
    %cst_23 = arith.constant dense<0.000000e+00> : vector<8x2xf32>
    %176 = tpu.matmul %174, %175, %cst_23 {dimension_numbers = #tpu.dot_dimension_numbers<[1], [0], [0], [1], [0, 0, 1, 1], [], []>} : vector<8x128xf32>, vector<128x2xf32>, vector<8x2xf32> -> vector<8x2xf32>
    %c0_24 = arith.constant 0 : index
    %c0_25 = arith.constant 0 : index
    %177 = vector.load %arg7[%c0_24, %c0_25] : memref<1x2xf32, #tpu.memory_space<vmem>>, vector<1x2xf32>
    %178 = vector.broadcast %177 : vector<1x2xf32> to vector<8x2xf32>
    %179 = arith.addf %176, %178 : vector<8x2xf32>
    %cst_26 = arith.constant dense<0xFF800000> : vector<8xf32>
    %180 = vector.multi_reduction <maximumf>, %179, %cst_26 [1] : vector<8x2xf32> to vector<8xf32>
    %181 = vector.shape_cast %180 : vector<8xf32> to vector<8x1xf32>
    %182 = vector.broadcast %181 : vector<8x1xf32> to vector<8x2xf32>
    %183 = arith.subf %179, %182 : vector<8x2xf32>
    %184 = math.exp %183 : vector<8x2xf32>
    %cst_27 = arith.constant dense<0.000000e+00> : vector<8xf32>
    %185 = vector.multi_reduction <add>, %184, %cst_27 [1] : vector<8x2xf32> to vector<8xf32>
    %186 = vector.shape_cast %185 : vector<8xf32> to vector<8x1xf32>
    %187 = math.log %186 : vector<8x1xf32>
    %188 = arith.addf %181, %187 : vector<8x1xf32>
    %189 = vector.broadcast %188 : vector<8x1xf32> to vector<8x2xf32>
    %190 = arith.subf %179, %189 : vector<8x2xf32>
    %c0_28 = arith.constant 0 : index
    %c0_29 = arith.constant 0 : index
    %191 = vector.load %arg8[%c0_28, %c0_29] : memref<8x2xf32, #tpu.memory_space<vmem>>, vector<8x2xf32>
    tpu.vector_store %arg8[%c0_28, %c0_29], %190 {strides = array<i32>} : memref<8x2xf32, #tpu.memory_space<vmem>>, vector<8x2xf32>,
    return
  }
}

</mosaic_0001>

<bundles_post_ra>
// kernel: mcnn_forward.1
= control target key start
LH: loop header
LB: loop body
LE: loop exit
PB: predicated region body
PF: predicated region fallthrough
CT: control target
= control target key end

     0   :  { %v7685_v0 = vmov 3   ;;  %v7681_v5 = vmov 0   ;;  %v7683_v10 = vmov 1   ;;  %s3538_s29 = smov 64   ;;  %vm717_vm0 = vcmask 1040384   ;;  %s7672_s3 = inlined_call_operand.vmem [shape: f32[128,4], index: 3, kind: input, shape index: {}]   ;;  %s7673_s2 = inlined_call_operand.vmem [shape: f32[128,4], index: 2, kind: input, shape index: {}]   ;;  %s7674_s0 = inlined_call_operand.vmem [shape: f32[128,512], index: 0, kind: input, shape index: {}]   ;;  %s7675_s1 = inlined_call_operand.vmem [shape: bf16[8,128], index: 1, kind: input, shape index: {}]   ;;  %s7676_s4 = inlined_call_operand.vmem [shape: bf16[768,128], index: 4, kind: input, shape index: {}]   ;;  %s7677_s6 = inlined_call_operand.vmem [shape: f32[128,2], index: 6, kind: input, shape index: {}]   ;;  %s7678_s5 = inlined_call_operand.vmem [shape: f32[1,128], index: 5, kind: input, shape index: {}]   ;;  %s7679_s7 = inlined_call_operand.vmem [shape: f32[1,2], index: 7, kind: input, shape index: {}]   ;;  %s7680_s8 = inlined_call_operand.vmem [shape: f32[8,2], index: 8, kind: output, shape index: {}]  }
   0x1   :  { %3158 = vset.pattern.permute.xlu1 %v7685_v0  ;;  %3157 = vset.pattern.permute.xlu0 %v7685_v0  ;;  %v3592_v1 = vld [vmem:[%s7672_s3] sm:$0xff]  ;;  %v3604_v3 = vld [vmem:[%s7672_s3 + $0x8] sm:$0xff]  ;;  %v3618_v6 = vld [vmem:[%s7672_s3 + $0x10] sm:$0xff]  ;;  %vm719_vm1 = vcmask 1041408   ;;  %vm721_vm2 = vcmask 1042432   ;;  %vm723_vm3 = vcmask 1043456  }
   0x2   :  { %7936 = vst [vmem:[#allocation2_spill] sm:$0xff] %v3592_v1  ;;  %v3597_v2 = vld [vmem:[%s7673_s2] sm:$0xff]  ;;  %1846 = vperm.xlu1 %3158, %v3592_v1   ;;  %7937 = vst [vmem:[#allocation3_spill] sm:$0xff] %v3604_v3  ;;  %v3609_v4 = vld [vmem:[%s7673_s2 + $0x8] sm:$0xff]  ;;  %159 = vmatprep.mubr.bf16.mxu0 %v7681_v5  ;;  %vm725_vm4 = vcmask 1044480   ;;  %vm727_vm5 = vcmask 1045504  }
   0x3   :  { %1634 = vperm.xlu0 %3157, %v3597_v2   ;;  %7938 = vst [vmem:[#allocation4_spill] sm:$0xff] %v3609_v4  ;;  %200 = vmatprep.mubr.bf16.mxu1 %v7681_v5  ;;  %v3623_v7 = vld [vmem:[%s7673_s2 + $0x18] sm:$0xff]  ;;  %v3628_v8 = vld [vmem:[%s7674_s0 + $0x8] sm:$0xff]  ;;  %v3642_v12 = vld [vmem:[%s7674_s0] sm:$0xff]  ;;  %vm729_vm6 = vcmask 1046528   ;;  %vm2320_vm7 = vcmask 523264  }
   0x4   :  { %v3633_v9 = vld [vmem:[%s7674_s0 + $0x28] sm:$0xff]  ;;  %v3647_v13 = vld [vmem:[%s7674_s0 + $0x20] sm:$0xff]  ;;  %v3665_v17 = vld [vmem:[%s7674_s0 + $0x18] sm:$0xff]  ;;  %vm3540_vm8 = vmmov 0   ;;  %vm2938_vm9 = vcmask 15360  }
   0x5   :  { %v95_v11 = vpack.c.bf16 %v3633_v9, %v3628_v8  ;;  %v3652_v14 = vld [vmem:[%s7674_s0 + $0x48] sm:$0xff]  ;;  %v94_v15 = vpack.c.bf16 %v3647_v13, %v3642_v12  ;;  %v3670_v18 = vld [vmem:[%s7674_s0 + $0x38] sm:$0xff]  ;;  %v3679_v21 = vld [vmem:[%s7674_s0 + $0x40] sm:$0xff] }
   0x6   :  { %1850 = vperm.xlu1 %3158, %v3604_v3   ;;  %7939 = vst [vmem:[#allocation5_spill] sm:$0xff] %v3652_v14  ;;  %v3660_v16 = vld [vmem:[%s7674_s0 + $0x68] sm:$0xff]  ;;  %v97_v20 = vpack.c.bf16 %v3670_v18, %v3665_v17  ;;  %7941 = vst [vmem:[#allocation7_spill] sm:$0xff] %v3679_v21  ;;  %v3684_v22 = vld [vmem:[%s7674_s0 + $0x60] sm:$0xff] }
   0x7   :  { %1638 = vperm.xlu0 %3157, %v3609_v4   ;;  %7940 = vst [vmem:[#allocation6_spill] sm:$0xff] %v3660_v16  ;;  %127 = vmatprep.subr.bf16.mxu0 %v95_v11  ;;  %v99_v19 = vpack.c.bf16 %v3660_v16, %v3652_v14  ;;  %v3689_v23 = vld [vmem:[%s7674_s0 + $0x10] sm:$0xff]  ;;  %v3694_v24 = vld [vmem:[%s7672_s3 + $0x20] sm:$0xff]  ;;  %v98_v25 = vpack.c.bf16 %v3684_v22, %v3679_v21  ;;  %v3706_v27 = vld [vmem:[%s7674_s0 + $0x88] sm:$0xff] }
   0x8   :  { %128 = vmatpush1.bf16.msra.mxu0 %v94_v15  ;;  %v3701_v26 = vld [vmem:[%s7674_s0 + $0x30] sm:$0xff]  ;;  %v3711_v28 = vld [vmem:[%s7674_s0 + $0xa8] sm:$0xff]  ;;  %v3721_v31 = vld [vmem:[%s7674_s0 + $0x58] sm:$0xff]  ;;  %168 = vmatprep.subr.bf16.mxu1 %v97_v20 }
   0x9   :  { %129 = vmatprep.subr.bf16.mxu0 %v99_v19  ;;  %v96_v29 = vpack.c.bf16 %v3701_v26, %v3689_v23  ;;  %v103_v30 = vpack.c.bf16 %v3711_v28, %v3706_v27  ;;  %7942 = vst [vmem:[#allocation8_spill] sm:$0xff] %v3721_v31  ;;  %v3726_v32 = vld [vmem:[%s7674_s0 + $0x78] sm:$0xff]  ;;  %v3731_v33 = vld [vmem:[%s7674_s0 + $0x80] sm:$0xff]  ;;  %v3744_v36 = vld [vmem:[%s7674_s0 + $0x50] sm:$0xff] }
   0xa   :  { %3159 = vset.pattern.permute.xlu1 %v7683_v10  ;;  %v101_v34 = vpack.c.bf16 %v3726_v32, %v3721_v31  ;;  %v3739_v35 = vld [vmem:[%s7674_s0 + $0xa0] sm:$0xff]  ;;  %7943 = vst [vmem:[#allocation9_spill] sm:$0xff] %v3744_v36  ;;  %v3749_v37 = vld [vmem:[%s7674_s0 + $0x70] sm:$0xff]  ;;  %v3756_v39 = vld [vmem:[%s7674_s0 + $0xc8] sm:$0xff] }
   0xb   :  { %1854 = vperm.xlu0 %3157, %v3618_v6   ;;  %736 = vperm.xlu1 %3159, %v3609_v4   ;;  %v100_v38 = vpack.c.bf16 %v3749_v37, %v3744_v36  ;;  %7944 = vst [vmem:[#allocation10_spill] sm:$0xff] %v3756_v39  ;;  %v3761_v40 = vld [vmem:[%s7674_s0 + $0xe8] sm:$0xff]  ;;  %v3766_v41 = vld [vmem:[%s7674_s0 + $0x98] sm:$0xff]  ;;  %v3771_v42 = vld [vmem:[%s7673_s2 + $0x10] sm:$0xff]  ;;  %v102_v43 = vpack.c.bf16 %v3739_v35, %v3731_v33 }
   0xc   :  { %169 = vmatpush1.bf16.msra.mxu1 %v96_v29  ;;  %7945 = vst [vmem:[#allocation11_spill] sm:$0xff] %v3761_v40  ;;  %7946 = vst [vmem:[#allocation12_spill] sm:$0xff] %v3771_v42  ;;  %130 = vmatpush1.bf16.msra.mxu0 %v98_v25  ;;  %v3778_v44 = vld [vmem:[%s7674_s0 + $0xb8] sm:$0xff]  ;;  %v3783_v45 = vld [vmem:[%s7674_s0 + $0xc0] sm:$0xff]  ;;  %v107_v46 = vpack.c.bf16 %v3761_v40, %v3756_v39 }
   0xd   :  { %170 = vmatprep.subr.bf16.mxu1 %v101_v34  ;;  %7947 = vst [vmem:[#allocation13_spill] sm:$0xff] %v3783_v45  ;;  %131 = vmatprep.subr.bf16.mxu0 %v103_v30  ;;  %v105_v47 = vpack.c.bf16 %v3778_v44, %v3766_v41  ;;  %v3793_v48 = vld [vmem:[%s7674_s0 + $0xe0] sm:$0xff]  ;;  %v3798_v49 = vld [vmem:[%s7674_s0 + $0x90] sm:$0xff]  ;;  %v3809_v51 = vld [vmem:[%s7673_s2 + $0x28] sm:$0xff] }
   0xe   :  { %7948 = vst [vmem:[#allocation14_spill] sm:$0xff] %v3793_v48  ;;  %v3803_v50 = vld [vmem:[%s7674_s0 + $0xb0] sm:$0xff]  ;;  %v3814_v52 = vld [vmem:[%s7674_s0 + $0x108] sm:$0xff]  ;;  %v3827_v55 = vld [vmem:[%s7674_s0 + $0xd8] sm:$0xff]  ;;  %v106_v57 = vpack.c.bf16 %v3793_v48, %v3783_v45 }
   0xf   :  { %1646 = vperm.xlu0 %3157, %v3623_v7   ;;  %944 = vperm.xlu1 %3159, %v3592_v1   ;;  %7949 = vst [vmem:[#allocation15_spill] sm:$0xff] %v3814_v52  ;;  %v3819_v53 = vld [vmem:[%s7674_s0 + $0x128] sm:$0xff]  ;;  %v104_v54 = vpack.c.bf16 %v3803_v50, %v3798_v49  ;;  %7951 = vst [vmem:[#allocation17_spill] sm:$0xff] %v3827_v55  ;;  %v3832_v56 = vld [vmem:[%s7674_s0 + $0xf8] sm:$0xff] }
  0x10   :  { %7950 = vst [vmem:[#allocation16_spill] sm:$0xff] %v3819_v53  ;;  %171 = vmatpush1.bf16.msra.mxu1 %v100_v38  ;;  %7952 = vst [vmem:[#allocation18_spill] sm:$0xff] %v3832_v56  ;;  %132 = vmatpush1.bf16.msra.mxu0 %v102_v43  ;;  %v3839_v58 = vld [vmem:[%s7674_s0 + $0xd0] sm:$0xff]  ;;  %v111_v60 = vpack.c.bf16 %v3819_v53, %v3814_v52  ;;  %v3852_v61 = vld [vmem:[%s7674_s0 + $0x100] sm:$0xff]  ;;  %v109_v11 = vpack.c.bf16 %v3832_v56, %v3827_v55 }
  0x11   :  { %172 = vmatprep.subr.bf16.mxu1 %v105_v47  ;;  %7953 = vst [vmem:[#allocation19_spill] sm:$0xff] %v3839_v58  ;;  %v3844_v59 = vld [vmem:[%s7674_s0 + $0xf0] sm:$0xff]  ;;  %133 = vmatprep.subr.bf16.mxu0 %v107_v46  ;;  %7955 = vst [vmem:[#allocation21_spill] sm:$0xff] %v3852_v61  ;;  %v3857_v62 = vld [vmem:[%s7674_s0 + $0x120] sm:$0xff] }
  0x12   :  { %7954 = vst [vmem:[#allocation20_spill] sm:$0xff] %v3844_v59  ;;  %7956 = vst [vmem:[#allocation22_spill] sm:$0xff] %v3857_v62  ;;  %v3862_v63 = vld [vmem:[%s7672_s3 + $0x30] sm:$0xff]  ;;  %v3869_v15 = vld [vmem:[%s7674_s0 + $0x148] sm:$0xff]  ;;  %v108_v20 = vpack.c.bf16 %v3844_v59, %v3839_v58  ;;  %v110_v30 = vpack.c.bf16 %v3857_v62, %v3852_v61  ;;  %v7987_v61 = vmov 1  }
  0x13   :  { %1862 = vperm.xlu0 %3157, %v3694_v24   ;;  %3160 = vset.pattern.permute.xlu1 %v7685_v0  ;;  %7957 = vst [vmem:[#allocation23_spill] sm:$0xff] %v3869_v15  ;;  %v3874_v19 = vld [vmem:[%s7674_s0 + $0x168] sm:$0xff]  ;;  %v3882_v25 = vld [vmem:[%s7674_s0 + $0x118] sm:$0xff]  ;;  %v3895_v34 = vld [vmem:[%s7674_s0 + $0x110] sm:$0xff] }
  0x14   :  { %1642 = vperm.xlu1 %3160, %v3771_v42   ;;  %7958 = vst [vmem:[#allocation24_spill] sm:$0xff] %v3874_v19  ;;  %173 = vmatpush1.bf16.msra.mxu1 %v104_v54  ;;  %7959 = vst [vmem:[#allocation25_spill] sm:$0xff] %v3882_v25  ;;  %v3887_v29 = vld [vmem:[%s7674_s0 + $0x138] sm:$0xff]  ;;  %v3900_v38 = vld [vmem:[%s7674_s0 + $0x130] sm:$0xff]  ;;  %v115_v43 = vpack.c.bf16 %v3874_v19, %v3869_v15 }
  0x15   :  { %7960 = vst [vmem:[#allocation26_spill] sm:$0xff] %v3887_v29  ;;  %134 = vmatpush1.bf16.msra.mxu0 %v106_v57  ;;  %7961 = vst [vmem:[#allocation27_spill] sm:$0xff] %v3895_v34  ;;  %v3908_v46 = vld [vmem:[%s7674_s0 + $0x140] sm:$0xff]  ;;  %v3918_v54 = vld [vmem:[%s7673_s2 + $0x38] sm:$0xff]  ;;  %174 = vmatprep.subr.bf16.mxu1 %v109_v11  ;;  %v113_v57 = vpack.c.bf16 %v3887_v29, %v3882_v25  ;;  %v112_v5 = vpack.c.bf16 %v3900_v38, %v3895_v34 }
  0x16   :  { %7962 = vst [vmem:[#allocation28_spill] sm:$0xff] %v3900_v38  ;;  %135 = vmatprep.subr.bf16.mxu0 %v111_v60  ;;  %7963 = vst [vmem:[#allocation29_spill] sm:$0xff] %v3908_v46  ;;  %v3913_v47 = vld [vmem:[%s7674_s0 + $0x160] sm:$0xff]  ;;  %v3925_v60 = vld [vmem:[%s7674_s0 + $0x188] sm:$0xff] }
  0x17   :  { %1654 = vperm.xlu0 %3157, %v3809_v51   ;;  %7964 = vst [vmem:[#allocation30_spill] sm:$0xff] %v3913_v47  ;;  %7965 = vst [vmem:[#allocation31_spill] sm:$0xff] %v3918_v54  ;;  %v3937_v11 = vld [vmem:[%s7674_s0 + $0x158] sm:$0xff]  ;;  %v3955_v19 = vld [vmem:[%s7674_s0 + $0x150] sm:$0xff] }
  0x18   :  { %3161 = vset.pattern.permute.xlu1 %v7683_v10  ;;  %7966 = vst [vmem:[#allocation32_spill] sm:$0xff] %v3925_v60  ;;  %175 = vmatpush1.bf16.msra.mxu1 %v108_v20  ;;  %v3932_v10 = vld [vmem:[%s7674_s0 + $0x1a8] sm:$0xff]  ;;  %7968 = vst [vmem:[#allocation34_spill] sm:$0xff] %v3937_v11  ;;  %v3942_v0 = vld [vmem:[%s7674_s0 + $0x178] sm:$0xff]  ;;  %v114_v20 = vpack.c.bf16 %v3913_v47, %v3908_v46 }
  0x19   :  { %740 = vperm.xlu1 %3161, %v3771_v42   ;;  %7967 = vst [vmem:[#allocation33_spill] sm:$0xff] %v3932_v10  ;;  %7969 = vst [vmem:[#allocation35_spill] sm:$0xff] %v3942_v0  ;;  %136 = vmatpush1.bf16.msra.mxu0 %v110_v30  ;;  %v3950_v42 = vld [vmem:[%s7674_s0 + $0x180] sm:$0xff]  ;;  %v3960_v15 = vld [vmem:[%s7674_s0 + $0x170] sm:$0xff]  ;;  %v119_v38 = vpack.c.bf16 %v3932_v10, %v3925_v60  ;;  %v117_v53 = vpack.c.bf16 %v3942_v0, %v3937_v11 }
  0x1a   :  { %7970 = vst [vmem:[#allocation36_spill] sm:$0xff] %v3950_v42  ;;  %7971 = vst [vmem:[#allocation37_spill] sm:$0xff] %v3955_v19  ;;  %137 = vmatprep.subr.bf16.mxu0 %v115_v43  ;;  %v3966_v30 = vld [vmem:[%s7674_s0 + $0x1a0] sm:$0xff]  ;;  %v3971_v47 = vld [vmem:[%s7674_s0 + $0x198] sm:$0xff]  ;;  %176 = vmatprep.subr.bf16.mxu1 %v113_v57  ;;  %v116_v62 = vpack.c.bf16 %v3960_v15, %v3955_v19  ;;  %v7979_v57 = vmov 3  }
  0x1b   :  { %1870 = vperm.xlu0 %3157, %v3862_v63   ;;  %7972 = vst [vmem:[#allocation38_spill] sm:$0xff] %v3960_v15  ;;  %7973 = vst [vmem:[#allocation39_spill] sm:$0xff] %v3966_v30  ;;  %v3976_v46 = vld [vmem:[%s7674_s0 + $0x1b8] sm:$0xff]  ;;  %v3986_v43 = vld [vmem:[%s7672_s3 + $0x40] sm:$0xff]  ;;  %v118_v10 = vpack.c.bf16 %v3966_v30, %v3950_v42 }
  0x1c   :  { %7974 = vst [vmem:[#allocation40_spill] sm:$0xff] %v3971_v47  ;;  %7975 = vst [vmem:[#allocation41_spill] sm:$0xff] %v3976_v46  ;;  %v3981_v29 = vld [vmem:[%s7672_s3 + $0x18] sm:$0xff]  ;;  %177 = vmatpush1.bf16.msra.mxu1 %v112_v5  ;;  %v3997_v25 = vld [vmem:[%s7674_s0 + $0x1c8] sm:$0xff]  ;;  %v121_v5 = vpack.c.bf16 %v3976_v46, %v3971_v47 }
  0x1d   :  { %952 = vperm.xlu1 %3161, %v3618_v6   ;;  %7976 = vst [vmem:[#allocation42_spill] sm:$0xff] %v3981_v29  ;;  %7977 = vst [vmem:[#allocation43_spill] sm:$0xff] %v3997_v25  ;;  %v4002_v34 = vld [vmem:[%s7674_s0 + $0x1e8] sm:$0xff]  ;;  %138 = vmatpush1.bf16.msra.mxu0 %v114_v20  ;;  %v4012_v60 = vld [vmem:[%s7674_s0 + $0x1c0] sm:$0xff] }
  0x1e   :  { %7978 = vst [vmem:[#allocation44_spill] sm:$0xff] %v4002_v34  ;;  %7980 = vst [vmem:[#allocation45_spill] sm:$0xff] %v4012_v60  ;;  %v4017_v0 = vld [vmem:[%s7674_s0 + $0x190] sm:$0xff]  ;;  %v4029_v46 = vld [vmem:[%s7674_s0 + $0x1e0] sm:$0xff]  ;;  %139 = vmatprep.subr.bf16.mxu0 %v119_v38  ;;  %178 = vmatprep.subr.bf16.mxu1 %v117_v53  ;;  %v123_v15 = vpack.c.bf16 %v4002_v34, %v3997_v25 }
  0x1f   :  { %1662 = vperm.xlu0 %3157, %v3918_v54   ;;  %7981 = vst [vmem:[#allocation46_spill] sm:$0xff] %v4017_v0  ;;  %v4022_v20 = vld [vmem:[%s7674_s0 + $0x1b0] sm:$0xff]  ;;  %7983 = vst [vmem:[#allocation48_spill] sm:$0xff] %v4029_v46  ;;  %v4034_v30 = vld [vmem:[%s7674_s0 + $0x1d8] sm:$0xff]  ;;  %v122_v19 = vpack.c.bf16 %v4029_v46, %v4012_v60 }
  0x20   :  { %7982 = vst [vmem:[#allocation47_spill] sm:$0xff] %v4022_v20  ;;  %7984 = vst [vmem:[#allocation49_spill] sm:$0xff] %v4034_v30  ;;  %v4039_v47 = vld [vmem:[%s7674_s0 + $0x1f8] sm:$0xff]  ;;  %v4044_v42 = vld [vmem:[%s7673_s2 + $0x48] sm:$0xff]  ;;  %179 = vmatpush1.bf16.msra.mxu1 %v116_v62  ;;  %v120_v11 = vpack.c.bf16 %v4022_v20, %v4017_v0 }
  0x21   :  { %3162 = vset.pattern.permute.xlu1 %v7979_v57  ;;  %7985 = vst [vmem:[#allocation50_spill] sm:$0xff] %v4039_v47  ;;  %7986 = vst [vmem:[#allocation51_spill] sm:$0xff] %v4044_v42  ;;  %140 = vmatpush1.bf16.msra.mxu0 %v118_v10  ;;  %v125_v52 = vpack.c.bf16 %v4039_v47, %v4034_v30  ;;  %v4059_v53 = vld [vmem:[%s7674_s0 + $0x1d0] sm:$0xff]  ;;  %v4075_v38 = vld [vmem:[%s7673_s2 + $0x20] sm:$0xff]  ;;  %v7730_v47 = vmov 2  }
  0x22   :  { %1858 = vperm.xlu1 %3162, %v3981_v29   ;;  %180 = vmatprep.subr.bf16.mxu1 %v121_v5  ;;  %7988 = vst [vmem:[#allocation52_spill] sm:$0xff] %v4059_v53  ;;  %v4064_v10 = vld [vmem:[%s7674_s0 + $0x1f0] sm:$0xff]  ;;  %7990 = vst [vmem:[#allocation54_spill] sm:$0xff] %v4075_v38  ;;  %v126_v5 = vld [vmem:[%s7675_s1] sm:$0xf] }
  0x23   :  { %1878 = vperm.xlu0 %3157, %v3986_v43   ;;  %7989 = vst [vmem:[#allocation53_spill] sm:$0xff] %v4064_v10  ;;  %v4070_v62 = vld [vmem:[%s7672_s3 + $0x50] sm:$0xff]  ;;  %141 = vmatprep.subr.bf16.mxu0 %v123_v15  ;;  %v4087_v15 = vld [vmem:[%s7673_s2 + $0x58] sm:$0xff] }
  0x24   :  { %181 = vmatpush1.bf16.msra.mxu1 %v120_v11  ;;  %7991 = vst [vmem:[#allocation55_spill] sm:$0xff] %v4087_v15  ;;  %v4114_v11 = vld [vmem:[%s7672_s3 + $0x70] sm:$0xff] }
  0x25   :  { %142 = vmatpush1.bf16.msra.mxu0 %v122_v19  ;;  %182 = vmatprep.subr.bf16.mxu1 %v125_v52  ;;  %v4094_v52 = vld [vmem:[%s7672_s3 + $0x60] sm:$0xff]  ;;  %v4102_v19 = vld [vmem:[%s7673_s2 + $0x68] sm:$0xff] }
  0x26   :  { %3163 = vset.pattern.permute.xlu1 %v7987_v61  ;;  %7992 = vst [vmem:[#allocation56_spill] sm:$0xff] %v4102_v19 }
  0x27   :  { %1670 = vperm.xlu0 %3157, %v4044_v42   ;;  %956 = vperm.xlu1 %3163, %v3981_v29   ;;  %v124_v29 = vpack.c.bf16 %v4064_v10, %v4059_v53  ;;  %v221_v10 = vld [vmem:[%s7673_s2 + $0x60] sm:$0xff] }
  0x28   :  { %160 = vmatmul.mubr.bf16.vlgmr.msra.gmra.mrb[0].mxu0 %v126_v5 }
  0x29   :  { %183 = vmatpush1.bf16.msra.mxu1 %v124_v29  ;;  %v4109_v29 = vld [vmem:[%s7672_s3 + $0x28] sm:$0xff] }
  0x2a   :  { %7993 = vst [vmem:[#allocation57_spill] sm:$0xff] %v4109_v29 }
  0x2b   :  { %1886 = vperm.xlu0 %3157, %v4070_v62   ;;  %3164 = vset.pattern.permute.xlu1 %v7979_v57 }
  0x2c   :  { %1650 = vperm.xlu1 %3164, %v4075_v38   ;;  %201 = vmatmul.mubr.bf16.vlgmr.msra.gmra.mrb[0].mxu1 %v126_v5  ;;  %v4122_v5 = vld [vmem:[%s7673_s2 + $0x78] sm:$0xff] }
  0x2d   :  { %7994 = vst [vmem:[#allocation58_spill] sm:$0xff] %v4122_v5 }
  0x2f   :  { %1678 = vperm.xlu0 %3157, %v4087_v15  }
  0x30   :  { %3165 = vset.pattern.permute.xlu1 %v7987_v61 }
  0x31   :  { %748 = vperm.xlu1 %3165, %v4075_v38   ;;  %v215_v38 = vld [vmem:[%s7673_s2 + $0x30] sm:$0xff] }
  0x33   :  { %1894 = vperm.xlu0 %3157, %v4094_v52  }
  0x35   :  { %960 = vperm.xlu1 %3165, %v3694_v24  }
  0x37   :  { %1686 = vperm.xlu0 %3157, %v4102_v19  }
  0x39   :  { %3166 = vset.pattern.permute.xlu1 %v7979_v57 }
  0x3a   :  { %1866 = vperm.xlu1 %3166, %v4109_v29  }
  0x3b   :  { %1902 = vperm.xlu0 %3157, %v4114_v11  }
  0x3e   :  { %3167 = vset.pattern.permute.xlu1 %v7987_v61 }
  0x3f   :  { %1694 = vperm.xlu0 %3157, %v4122_v5   ;;  %964 = vperm.xlu1 %3167, %v4109_v29   ;;  %v232_v29 = vld [vmem:[%s7672_s3 + $0x38] sm:$0xff] }
  0x43   :  { %3186 = vset.pattern.permute.xlu0 %v7987_v61  ;;  %3168 = vset.pattern.permute.xlu1 %v7979_v57 }
  0x44   :  { %732 = vperm.xlu0 %3186, %v3597_v2   ;;  %1658 = vperm.xlu1 %3168, %v215_v38  }
  0x48   :  { %948 = vperm.xlu0 %3186, %v3604_v3   ;;  %3169 = vset.pattern.permute.xlu1 %v7987_v61 }
  0x49   :  { %756 = vperm.xlu1 %3169, %v215_v38   ;;  %v217_v38 = vld [vmem:[%s7673_s2 + $0x40] sm:$0xff] }
  0x4c   :  { %744 = vperm.xlu0 %3186, %v3623_v7  }
  0x4d   :  { %968 = vperm.xlu1 %3169, %v3862_v63  }
  0x50   :  { %752 = vperm.xlu0 %3186, %v3809_v51  }
  0x51   :  { %3170 = vset.pattern.permute.xlu1 %v7979_v57 }
  0x52   :  { %1874 = vperm.xlu1 %3170, %v232_v29  }
  0x54   :  { %760 = vperm.xlu0 %3186, %v3918_v54  }
  0x56   :  { %3171 = vset.pattern.permute.xlu1 %v7987_v61 }
  0x57   :  { %972 = vperm.xlu1 %3171, %v232_v29   ;;  %v234_v29 = vld [vmem:[%s7672_s3 + $0x48] sm:$0xff] }
  0x58   :  { %768 = vperm.xlu0 %3186, %v4044_v42  }
  0x5b   :  { %3172 = vset.pattern.permute.xlu1 %v7979_v57 }
  0x5c   :  { %776 = vperm.xlu0 %3186, %v4087_v15   ;;  %1666 = vperm.xlu1 %3172, %v217_v38  }
  0x60   :  { %784 = vperm.xlu0 %3186, %v4102_v19   ;;  %3173 = vset.pattern.permute.xlu1 %v7987_v61 }
  0x61   :  { %764 = vperm.xlu1 %3173, %v217_v38   ;;  %v219_v38 = vld [vmem:[%s7673_s2 + $0x50] sm:$0xff] }
  0x64   :  { %792 = vperm.xlu0 %3186, %v4122_v5  }
  0x65   :  { %976 = vperm.xlu1 %3173, %v3986_v43  }
  0x68   :  { %3190 = vset.pattern.permute.xlu0 %v7730_v47 }
  0x69   :  { %1187 = vperm.xlu0 %3190, %v3609_v4   ;;  %3174 = vset.pattern.permute.xlu1 %v7979_v57  ;;  %v223_v4 = vld [vmem:[%s7673_s2 + $0x70] sm:$0xff] }
  0x6a   :  { %1882 = vperm.xlu1 %3174, %v234_v29  }
  0x6d   :  { %1403 = vperm.xlu0 %3190, %v3618_v6   ;;  %v236_v6 = vld [vmem:[%s7672_s3 + $0x58] sm:$0xff] }
  0x6e   :  { %3175 = vset.pattern.permute.xlu1 %v7987_v61 }
  0x6f   :  { %980 = vperm.xlu1 %3175, %v234_v29  }
  0x71   :  { %1195 = vperm.xlu0 %3190, %v3623_v7  }
  0x73   :  { %3176 = vset.pattern.permute.xlu1 %v7979_v57 }
  0x74   :  { %1674 = vperm.xlu1 %3176, %v219_v38  }
  0x75   :  { %1411 = vperm.xlu0 %3190, %v3694_v24  }
  0x78   :  { %3177 = vset.pattern.permute.xlu1 %v7987_v61 }
  0x79   :  { %1203 = vperm.xlu0 %3190, %v3809_v51   ;;  %772 = vperm.xlu1 %3177, %v219_v38  }
  0x7d   :  { %1419 = vperm.xlu0 %3190, %v3862_v63   ;;  %984 = vperm.xlu1 %3177, %v4070_v62  }
  0x81   :  { %1211 = vperm.xlu0 %3190, %v3918_v54   ;;  %v4176_v29 = vpop.permute.xlu1 %1846  ;;  %3178 = vset.pattern.permute.xlu1 %v7979_v57 }
  0x82   :  { %v4179_v24 = vpop.permute.xlu0 %1634  ;;  %1890 = vperm.xlu1 %3178, %v236_v6  }
  0x83   :  { %v1698_v59 = vsub.f32 %v3628_v8, %v4179_v24  ;;  %v1699_v40 = vsub.f32 %v3689_v23, %v4179_v24 }
  0x85   :  { %1427 = vperm.xlu0 %3190, %v3986_v43   ;;  %v1851_v38 = vpop.permute.xlu1 %1850 }
  0x86   :  { %v4182_v47 = vpop.permute.xlu0 %1638  ;;  %3179 = vset.pattern.permute.xlu1 %v7987_v61 }
  0x87   :  { %988 = vperm.xlu1 %3179, %v236_v6   ;;  %v1701_v48 = vsub.f32 %v3647_v13, %v4182_v47 }
  0x89   :  { %1219 = vperm.xlu0 %3190, %v4044_v42   ;;  %v8005_v42 = vmov 0  }
  0x8a   :  { %v4186_v63 = vpop.permute.xlu0 %1854  ;;  %v4191_v34 = vpop.permute.xlu1 %736 }
  0x8b   :  { %7995 = vst [vmem:[#allocation59_spill] sm:$0xff] %v4191_v34  ;;  %3180 = vset.pattern.permute.xlu1 %v7979_v57  ;;  %v8044_v34 = vld [vmem:[#allocation25_spill] sm:$0xff] }
  0x8c   :  { %1682 = vperm.xlu1 %3180, %v221_v10  }
  0x8d   :  { %1435 = vperm.xlu0 %3190, %v4070_v62   ;;  %v238_v62 = vld [vmem:[%s7672_s3 + $0x68] sm:$0xff] }
  0x8e   :  { %v4194_v43 = vpop.permute.xlu0 %1646  ;;  %v4197_v46 = vpop.permute.xlu1 %944 }
  0x90   :  { %3181 = vset.pattern.permute.xlu1 %v7987_v61 }
  0x91   :  { %780 = vperm.xlu1 %3181, %v221_v10   ;;  %1227 = vperm.xlu0 %3190, %v4087_v15  }
  0x92   :  { %v4200_v6 = vpop.permute.xlu0 %1862 }
  0x93   :  { %v4203_v30 = vpop.permute.xlu1 %1642 }
  0x95   :  { %992 = vperm.xlu1 %3181, %v4094_v52   ;;  %1443 = vperm.xlu0 %3190, %v4094_v52  }
  0x96   :  { %v4206_v53 = vpop.permute.xlu0 %1654 }
  0x98   :  { %v4212_v25 = vpop.permute.xlu1 %740 }
  0x99   :  { %7996 = vst [vmem:[#allocation60_spill] sm:$0xff] %v4212_v25  ;;  %3182 = vset.pattern.permute.xlu1 %v7979_v57  ;;  %1235 = vperm.xlu0 %3190, %v4102_v19   ;;  %v8056_v25 = vld [vmem:[#allocation55_spill] sm:$0xff] }
  0x9a   :  { %v4215_v10 = vpop.permute.xlu0 %1870  ;;  %1898 = vperm.xlu1 %3182, %v238_v62  }
  0x9b   :  { %7997 = vst [vmem:[#allocation61_spill] sm:$0xff] %v4215_v10 }
  0x9c   :  { %v4218_v60 = vpop.permute.xlu1 %952 }
  0x9d   :  { %7998 = vst [vmem:[#allocation62_spill] sm:$0xff] %v4218_v60  ;;  %1451 = vperm.xlu0 %3190, %v4114_v11   ;;  %v240_v60 = vld [vmem:[%s7672_s3 + $0x78] sm:$0xff] }
  0x9e   :  { %v4220_v20 = vpop.permute.xlu0 %1662  ;;  %3183 = vset.pattern.permute.xlu1 %v7987_v61 }
  0x9f   :  { %7999 = vst [vmem:[#allocation63_spill] sm:$0xff] %v4220_v20  ;;  %996 = vperm.xlu1 %3183, %v238_v62   ;;  %v1702_v20 = vsub.f32 %v3633_v9, %v4182_v47 }
  0xa1   :  { %v4224_v52 = vpop.permute.xlu1 %1858  ;;  %1243 = vperm.xlu0 %3190, %v4122_v5   ;;  %v1913_v5 = vadd.f32 %v1851_v38, %v3647_v13 }
  0xa2   :  { %8000 = vst [vmem:[#allocation64_spill] sm:$0xff] %v4224_v52  ;;  %v4226_v0 = vpop.permute.xlu0 %1878  ;;  %v1703_v52 = vsub.f32 %v3701_v26, %v4182_v47 }
  0xa3   :  { %8001 = vst [vmem:[#allocation65_spill] sm:$0xff] %v4226_v0  ;;  %3184 = vset.pattern.permute.xlu1 %v7979_v57  ;;  %v1909_v0 = vadd.f32 %v4176_v29, %v3642_v12 }
  0xa4   :  { %1690 = vperm.xlu1 %3184, %v223_v4  }
  0xa5   :  { %3218 = vset.pattern.permute.xlu0 %v8005_v42  ;;  %v1697_v42 = vsub.f32 %v3642_v12, %v4179_v24  ;;  %v1973_v55 = vmax.f32 %v1909_v0, %v1913_v5  ;;  %v1782_v0 = vmin.f32 %v1698_v59, %v1702_v20 }
  0xa6   :  { %v4232_v19 = vpop.permute.xlu0 %1670  ;;  %v4235_v15 = vpop.permute.xlu1 %956  ;;  %243 = vperm.xlu0 %3218, %v3597_v2  }
  0xa7   :  { %8002 = vst [vmem:[#allocation66_spill] sm:$0xff] %v4232_v19  ;;  %8003 = vst [vmem:[#allocation67_spill] sm:$0xff] %v4235_v15  ;;  %v1910_v19 = vadd.f32 %v4176_v29, %v3628_v8  ;;  %v1914_v15 = vadd.f32 %v1851_v38, %v3633_v9  ;;  %v1761_v45 = vmin.f32 %v1697_v42, %v1701_v48  ;;  %v8011_v42 = vmov 2  }
  0xa8   :  { %3185 = vset.pattern.permute.xlu1 %v7987_v61  ;;  %v1708_v48 = vsub.f32 %v3721_v31, %v4203_v30 }
  0xa9   :  { %788 = vperm.xlu1 %3185, %v223_v4   ;;  %v1915_v4 = vadd.f32 %v1851_v38, %v3701_v26  ;;  %v1994_v58 = vmax.f32 %v1910_v19, %v1914_v15  ;;  %v1803_v15 = vmin.f32 %v1699_v40, %v1703_v52  ;;  %v1920_v19 = vadd.f32 %v4186_v63, %v3721_v31 }
  0xaa   :  { %v4238_v62 = vpop.permute.xlu0 %1886  ;;  %476 = vperm.xlu0 %3218, %v3604_v3   ;;  %v1917_v3 = vadd.f32 %v4186_v63, %v3679_v21  ;;  %v1709_v40 = vsub.f32 %v3684_v22, %v4194_v43 }
  0xab   :  { %8004 = vst [vmem:[#allocation68_spill] sm:$0xff] %v4238_v62  ;;  %v4244_v56 = vpop.permute.xlu1 %1650  ;;  %v1911_v62 = vadd.f32 %v4176_v29, %v3689_v23 }
  0xac   :  { %8006 = vst [vmem:[#allocation69_spill] sm:$0xff] %v4244_v56  ;;  %v1916_v56 = vadd.f32 %v1851_v38, %v3670_v18  ;;  %v1912_v38 = vadd.f32 %v4176_v29, %v3665_v17  ;;  %v1918_v29 = vadd.f32 %v4186_v63, %v3652_v14  ;;  %v4309_v20 = vmax.f32 %v1973_v55, %v1917_v3 }
  0xad   :  { %1000 = vperm.xlu1 %3185, %v4114_v11   ;;  %v1700_v11 = vsub.f32 %v3665_v17, %v4179_v24  ;;  %v2015_v54 = vmax.f32 %v1911_v62, %v1915_v4  ;;  %v1919_v24 = vadd.f32 %v4186_v63, %v3744_v36  ;;  %v1705_v62 = vsub.f32 %v3679_v21, %v4203_v30 }
  0xae   :  { %v4259_v1 = vpop.permute.xlu0 %1678  ;;  %v2036_v10 = vmax.f32 %v1912_v38, %v1916_v56  ;;  %v1706_v4 = vsub.f32 %v3652_v14, %v4203_v30  ;;  %258 = vperm.xlu0 %3218, %v3623_v7   ;;  %v4311_v63 = vmax.f32 %v1994_v58, %v1918_v29  ;;  %v1711_v3 = vsub.f32 %v3749_v37, %v4194_v43 }
  0xaf   :  { %8007 = vst [vmem:[#allocation70_spill] sm:$0xff] %v4259_v1  ;;  %v1704_v1 = vsub.f32 %v3670_v18, %v4182_v47  ;;  %v4313_v52 = vmax.f32 %v2015_v54, %v1919_v24  ;;  %v1712_v55 = vsub.f32 %v3726_v32, %v4194_v43  ;;  %v1762_v58 = vmin.f32 %v1761_v45, %v1705_v62 }
  0xb0   :  { %v4279_v39 = vpop.permute.xlu1 %748  ;;  %v1783_v54 = vmin.f32 %v1782_v0, %v1706_v4  ;;  %v4337_v29 = vadd.f32 %v4197_v46, %v3628_v8  ;;  %v4345_v45 = vadd.f32 %v4197_v46, %v3665_v17 }
  0xb1   :  { %3187 = vset.pattern.permute.xlu1 %v7979_v57  ;;  %v1824_v56 = vmin.f32 %v1700_v11, %v1704_v1  ;;  %v1707_v1 = vsub.f32 %v3744_v36, %v4203_v30  ;;  %v4319_v11 = vmax.f32 %v2036_v10, %v1920_v19  ;;  %v1710_v30 = vsub.f32 %v3660_v16, %v4194_v43 }
  0xb2   :  { %v4288_v47 = vpop.permute.xlu0 %1894  ;;  %1906 = vperm.xlu1 %3187, %v240_v60   ;;  %268 = vperm.xlu0 %3218, %v3809_v51   ;;  %v4333_v10 = vadd.f32 %v4197_v46, %v3642_v12  ;;  %8010 = vst [vmem:[#allocation73_spill] sm:$0xff] %v4345_v45  ;;  %v4349_v51 = vadd.f32 %v4200_v6, %v3731_v33 }
  0xb3   :  { %v1804_v24 = vmin.f32 %v1803_v15, %v1707_v1  ;;  %v1825_v19 = vmin.f32 %v1824_v56, %v1708_v48  ;;  %v4361_v15 = vadd.f32 %v4200_v6, %v3798_v49  ;;  %v1763_v48 = vmin.f32 %v1762_v58, %v1709_v40  ;;  %v8012_v40 = vld [vmem:[#allocation13_spill] sm:$0xff]  ;;  %v8023_v1 = vld [vmem:[#allocation62_spill] sm:$0xff] }
  0xb4   :  { %v4307_v59 = vpop.permute.xlu1 %960  ;;  %v1784_v7 = vmin.f32 %v1783_v54, %v1710_v30  ;;  %v8013_v30 = vld [vmem:[#allocation61_spill] sm:$0xff]  ;;  %v8015_v54 = vld [vmem:[#allocation10_spill] sm:$0xff]  ;;  %v4406_v4 = vadd.f32 %v8023_v1, %v3679_v21  ;;  %v4410_v5 = vadd.f32 %v8023_v1, %v3652_v14  ;;  %v8039_v21 = vld [vmem:[#allocation15_spill] sm:$0xff] }
  0xb5   :  { %v1805_v56 = vmin.f32 %v1804_v24, %v1711_v3  ;;  %v1826_v45 = vmin.f32 %v1825_v19, %v1712_v55  ;;  %v4387_v58 = vadd.f32 %v8013_v30, %v8012_v40  ;;  %v8018_v3 = vld [vmem:[#allocation31_spill] sm:$0xff]  ;;  %v8021_v24 = vld [vmem:[#allocation17_spill] sm:$0xff] }
  0xb6   :  { %v4317_v38 = vpop.permute.xlu0 %1686  ;;  %3188 = vset.pattern.permute.xlu1 %v7987_v61  ;;  %v4341_v61 = vadd.f32 %v4197_v46, %v3689_v23  ;;  %v4365_v46 = vadd.f32 %v4200_v6, %v3766_v41  ;;  %278 = vperm.xlu0 %3218, %v8018_v3   ;;  %v8019_v55 = vld [vmem:[#allocation19_spill] sm:$0xff]  ;;  %v4402_v19 = vadd.f32 %v8013_v30, %v8021_v24 }
  0xb7   :  { %8008 = vst [vmem:[#allocation71_spill] sm:$0xff] %v4317_v38  ;;  %1004 = vperm.xlu1 %3188, %v240_v60   ;;  %v4353_v60 = vadd.f32 %v4200_v6, %v3706_v27  ;;  %8014 = vst [vmem:[#allocation61_spill] sm:$0xff] %v4387_v58  ;;  %v4391_v6 = vadd.f32 %v8013_v30, %v8015_v54  ;;  %v4416_v3 = vadd.f32 %v8023_v1, %v3744_v36  ;;  %v8041_v24 = vld [vmem:[#allocation51_spill] sm:$0xff] }
  0xb8   :  { %8009 = vst [vmem:[#allocation72_spill] sm:$0xff] %v4341_v61  ;;  %8022 = vst [vmem:[#allocation76_spill] sm:$0xff] %v4402_v19  ;;  %v8042_v61 = vld [vmem:[#allocation27_spill] sm:$0xff] }
  0xb9   :  { %v4355_v43 = vpop.permute.xlu1 %1866  ;;  %8016 = vst [vmem:[#allocation74_spill] sm:$0xff] %v4391_v6  ;;  %8024 = vst [vmem:[#allocation62_spill] sm:$0xff] %v4406_v4  ;;  %v8037_v4 = vld [vmem:[#allocation65_spill] sm:$0xff] }
  0xba   :  { %v4357_v0 = vpop.permute.xlu0 %1902  ;;  %8025 = vst [vmem:[#allocation77_spill] sm:$0xff] %v4410_v5  ;;  %8027 = vst [vmem:[#allocation79_spill] sm:$0xff] %v4416_v3  ;;  %v8036_v5 = vld [vmem:[#allocation21_spill] sm:$0xff]  ;;  %288 = vperm.xlu0 %3218, %v8041_v24  }
  0xbb   :  { %3189 = vset.pattern.permute.xlu1 %v8011_v42  ;;  %v4441_v14 = vadd.f32 %v8037_v4, %v8036_v5 }
  0xbc   :  { %1183 = vperm.xlu1 %3189, %v3597_v2   ;;  %v4398_v2 = vadd.f32 %v8013_v30, %v8019_v55  ;;  %v8029_v30 = vld [vmem:[#allocation64_spill] sm:$0xff]  ;;  %v4445_v55 = vadd.f32 %v8037_v4, %v8039_v21 }
  0xbd   :  { %v1921_v19 = vadd.f32 %v8029_v30, %v3684_v22  ;;  %v1922_v58 = vadd.f32 %v8029_v30, %v3660_v16  ;;  %v1923_v36 = vadd.f32 %v8029_v30, %v3749_v37  ;;  %v1924_v3 = vadd.f32 %v8029_v30, %v3726_v32  ;;  %8038 = vst [vmem:[#allocation64_spill] sm:$0xff] %v4441_v14 }
  0xbe   :  { %v4393_v62 = vpop.permute.xlu0 %1694  ;;  %8020 = vst [vmem:[#allocation31_spill] sm:$0xff] %v4398_v2  ;;  %v4412_v6 = vpop.permute.xlu1 %964  ;;  %v4420_v2 = vadd.f32 %v8023_v1, %v3721_v31  ;;  %v8033_v1 = vld [vmem:[#allocation2_spill] sm:$0xff]  ;;  %v4450_v30 = vadd.f32 %v8037_v4, %v8042_v61  ;;  %v8046_v31 = vld [vmem:[#allocation69_spill] sm:$0xff]  ;;  %298 = vperm.xlu0 %3218, %v8056_v25  }
  0xbf   :  { %8017 = vst [vmem:[#allocation75_spill] sm:$0xff] %v4393_v62  ;;  %8026 = vst [vmem:[#allocation78_spill] sm:$0xff] %v4412_v6  ;;  %v1713_v40 = vsub.f32 %v3731_v33, %v8046_v31  ;;  %v1714_v5 = vsub.f32 %v3706_v27, %v8046_v31  ;;  %v1975_v21 = vmax.f32 %v4309_v20, %v1921_v19  ;;  %v8050_v19 = vld [vmem:[#allocation3_spill] sm:$0xff]  ;;  %v8057_v25 = vld [vmem:[#allocation29_spill] sm:$0xff] }
  0xc0   :  { %8028 = vst [vmem:[#allocation80_spill] sm:$0xff] %v4420_v2  ;;  %1395 = vperm.xlu1 %3189, %v8033_v1   ;;  %8040 = vst [vmem:[#allocation2_spill] sm:$0xff] %v4445_v55  ;;  %v4454_v2 = vadd.f32 %v8037_v4, %v8044_v34  ;;  %v1996_v24 = vmax.f32 %v4311_v63, %v1922_v58  ;;  %v1715_v61 = vsub.f32 %v3798_v49, %v8046_v31  ;;  %v8051_v63 = vld [vmem:[#allocation67_spill] sm:$0xff] }
  0xc1   :  { %8043 = vst [vmem:[#allocation21_spill] sm:$0xff] %v4450_v30  ;;  %v1716_v30 = vsub.f32 %v3766_v41, %v8046_v31  ;;  %v2017_v4 = vmax.f32 %v4313_v52, %v1923_v36  ;;  %v4479_v58 = vadd.f32 %v8051_v63, %v3684_v22  ;;  %v4483_v31 = vadd.f32 %v8051_v63, %v3660_v16  ;;  %v8060_v55 = vld [vmem:[#allocation23_spill] sm:$0xff] }
  0xc2   :  { %8045 = vst [vmem:[#allocation65_spill] sm:$0xff] %v4454_v2  ;;  %v2038_v2 = vmax.f32 %v4319_v11, %v1924_v3  ;;  %v4492_v20 = vadd.f32 %v8051_v63, %v3749_v37  ;;  %v1764_v6 = vmin.f32 %v1763_v48, %v1713_v40  ;;  %v1785_v54 = vmin.f32 %v1784_v7, %v1714_v5  ;;  %v8058_v11 = vld [vmem:[#allocation68_spill] sm:$0xff]  ;;  %v8065_v40 = vld [vmem:[#allocation34_spill] sm:$0xff] }
  0xc3   :  { %v4460_v14 = vpop.permute.xlu0 %732  ;;  %v4468_v34 = vpop.permute.xlu1 %1658  ;;  %8052 = vst [vmem:[#allocation15_spill] sm:$0xff] %v4479_v58  ;;  %8053 = vst [vmem:[#allocation51_spill] sm:$0xff] %v4483_v31  ;;  %v1806_v31 = vmin.f32 %v1805_v56, %v1715_v61  ;;  %v1827_v16 = vmin.f32 %v1826_v45, %v1716_v30  ;;  %v4501_v52 = vmax.f32 %v1975_v21, %v4349_v51  ;;  %v8062_v51 = vmov 0  }
  0xc4   :  { %1399 = vperm.xlu1 %3189, %v8050_v19   ;;  %v4496_v19 = vadd.f32 %v8051_v63, %v3726_v32  ;;  %v4504_v3 = vmax.f32 %v1996_v24, %v4353_v60  ;;  %v4508_v36 = vadd.f32 %v8058_v11, %v8057_v25  ;;  %v4512_v63 = vadd.f32 %v8058_v11, %v8060_v55  ;;  %v8063_v60 = vld [vmem:[#allocation37_spill] sm:$0xff]  ;;  %v8075_v24 = vld [vmem:[#allocation56_spill] sm:$0xff] }
  0xc5   :  { %v4515_v7 = vmax.f32 %v2017_v4, %v4361_v15  ;;  %v4518_v56 = vmax.f32 %v2038_v2, %v4365_v46  ;;  %v4525_v48 = vadd.f32 %v8058_v11, %v8063_v60  ;;  %v4529_v30 = vadd.f32 %v8058_v11, %v8065_v40  ;;  %v8070_v46 = vld [vmem:[#allocation4_spill] sm:$0xff]  ;;  %308 = vperm.xlu0 %3218, %v8075_v24  }
  0xc6   :  { %8059 = vst [vmem:[#allocation27_spill] sm:$0xff] %v4508_v36  ;;  %8061 = vst [vmem:[#allocation25_spill] sm:$0xff] %v4512_v63  ;;  %v8073_v60 = vsub.f32 %v3739_v35, %v4206_v53  ;;  %v8074_v11 = vsub.f32 %v3711_v28, %v4206_v53  ;;  %v8076_v61 = vsub.f32 %v3803_v50, %v4206_v53  ;;  %v8080_v25 = vld [vmem:[#allocation32_spill] sm:$0xff] }
  0xc7   :  { %v4498_v58 = vpop.permute.xlu0 %948  ;;  %8064 = vst [vmem:[#allocation69_spill] sm:$0xff] %v4525_v48  ;;  %8066 = vst [vmem:[#allocation3_spill] sm:$0xff] %v4529_v30  ;;  %v4577_v2 = vadd.f32 %v4288_v47, %v8080_v25  ;;  %v4591_v24 = vadd.f32 %v4307_v59, %v3731_v33  ;;  %v4600_v25 = vadd.f32 %v4355_v43, %v3739_v35  ;;  %v8096_v55 = vld [vmem:[#allocation52_spill] sm:$0xff] }
  0xc8   :  { %v4520_v45 = vpop.permute.xlu1 %756  ;;  %3191 = vset.pattern.permute.xlu1 %v8062_v51  ;;  %v4543_v48 = vmin.f32 %v1764_v6, %v8073_v60  ;;  %v4548_v40 = vmin.f32 %v1785_v54, %v8074_v11  ;;  %v4560_v6 = vmin.f32 %v1806_v31, %v8076_v61  ;;  %v8077_v60 = vsub.f32 %v3778_v44, %v4206_v53  ;;  %v8083_v61 = vld [vmem:[#allocation46_spill] sm:$0xff]  ;;  %v8085_v53 = vld [vmem:[#allocation40_spill] sm:$0xff] }
  0xc9   :  { %248 = vperm.xlu1 %3191, %v8070_v46   ;;  %v8078_v46 = vld [vmem:[#allocation36_spill] sm:$0xff]  ;;  %8081 = vst [vmem:[#allocation55_spill] sm:$0xff] %v4577_v2  ;;  %v1011_v63 = vadd.f32 %v4498_v58, %v3647_v13  ;;  %v1012_v36 = vadd.f32 %v4498_v58, %v3633_v9  ;;  %v4647_v5 = vadd.f32 %v4357_v0, %v8096_v55 }
  0xca   :  { %v4565_v54 = vmin.f32 %v1827_v16, %v8077_v60  ;;  %v4573_v4 = vadd.f32 %v4288_v47, %v8078_v46  ;;  %v4583_v16 = vadd.f32 %v4288_v47, %v8083_v61  ;;  %v4587_v60 = vadd.f32 %v4288_v47, %v8085_v53 }
  0xcb   :  { %v4550_v21 = vpop.permute.xlu0 %744  ;;  %v4595_v46 = vadd.f32 %v4307_v59, %v3706_v27  ;;  %v4604_v61 = vadd.f32 %v4355_v43, %v3711_v28  ;;  %v4608_v47 = vadd.f32 %v4355_v43, %v3803_v50  ;;  %v4612_v53 = vadd.f32 %v4355_v43, %v3778_v44  ;;  %8097 = vst [vmem:[#allocation4_spill] sm:$0xff] %v4647_v5  ;;  %v8098_v43 = vld [vmem:[#allocation49_spill] sm:$0xff]  ;;  %v8101_v5 = vld [vmem:[#allocation12_spill] sm:$0xff] }
  0xcc   :  { %8079 = vst [vmem:[#allocation67_spill] sm:$0xff] %v4573_v4  ;;  %v4579_v31 = vpop.permute.xlu1 %968  ;;  %8084 = vst [vmem:[#allocation68_spill] sm:$0xff] %v4583_v16  ;;  %v4623_v16 = vadd.f32 %v4307_v59, %v3766_v41  ;;  %v8094_v4 = vld [vmem:[#allocation43_spill] sm:$0xff] }
  0xcd   :  { %8082 = vst [vmem:[#allocation29_spill] sm:$0xff] %v4579_v31  ;;  %8086 = vst [vmem:[#allocation23_spill] sm:$0xff] %v4587_v60  ;;  %471 = vperm.xlu1 %3191, %v8033_v1   ;;  %v8087_v60 = vld [vmem:[#allocation58_spill] sm:$0xff]  ;;  %v4619_v1 = vadd.f32 %v4307_v59, %v3798_v49  ;;  %v8092_v59 = vld [vmem:[#allocation45_spill] sm:$0xff]  ;;  %v4643_v2 = vadd.f32 %v4357_v0, %v8094_v4  ;;  %v2019_v4 = vmax.f32 %v4515_v7, %v4608_v47 }
  0xce   :  { %318 = vperm.xlu0 %3218, %v8087_v60   ;;  %v4639_v31 = vadd.f32 %v4357_v0, %v8092_v59  ;;  %v4651_v60 = vadd.f32 %v4357_v0, %v8098_v43  ;;  %v1977_v59 = vmax.f32 %v4501_v52, %v4600_v25  ;;  %v2040_v55 = vmax.f32 %v4518_v56, %v4612_v53 }
  0xcf   :  { %v4614_v11 = vpop.permute.xlu0 %752  ;;  %8095 = vst [vmem:[#allocation34_spill] sm:$0xff] %v4643_v2  ;;  %v795_v43 = vsub.f32 %v3642_v12, %v4460_v14  ;;  %v1013_v52 = vadd.f32 %v4498_v58, %v3701_v26  ;;  %v797_v7 = vsub.f32 %v3689_v23, %v4460_v14  ;;  %v798_v56 = vsub.f32 %v3665_v17, %v4460_v14  ;;  %v8107_v23 = vld [vmem:[#allocation78_spill] sm:$0xff] }
  0xd0   :  { %8093 = vst [vmem:[#allocation37_spill] sm:$0xff] %v4639_v31  ;;  %8099 = vst [vmem:[#allocation56_spill] sm:$0xff] %v4651_v60  ;;  %v1998_v31 = vmax.f32 %v4504_v3, %v4604_v61  ;;  %v796_v60 = vsub.f32 %v3628_v8, %v4460_v14  ;;  %v1014_v3 = vadd.f32 %v4498_v58, %v3670_v18  ;;  %v8116_v61 = vld [vmem:[#allocation72_spill] sm:$0xff]  ;;  %v8117_v58 = vld [vmem:[#allocation73_spill] sm:$0xff] }
  0xd1   :  { %v4653_v30 = vpop.permute.xlu1 %1874  ;;  %3192 = vset.pattern.permute.xlu1 %v8011_v42  ;;  %v1071_v25 = vmax.f32 %v4333_v10, %v1011_v63  ;;  %v1092_v12 = vmax.f32 %v4337_v29, %v1012_v36  ;;  %v4692_v38 = vadd.f32 %v8107_v23, %v3739_v35  ;;  %v4696_v14 = vadd.f32 %v8107_v23, %v3711_v28  ;;  %v8113_v63 = vld [vmem:[#allocation59_spill] sm:$0xff] }
  0xd2   :  { %8100 = vst [vmem:[#allocation36_spill] sm:$0xff] %v4653_v30  ;;  %1191 = vperm.xlu1 %3192, %v8101_v5   ;;  %3356 = vset.pattern.permute.xlu0 %v7979_v57  ;;  %v4700_v17 = vadd.f32 %v8107_v23, %v3803_v50  ;;  %v4704_v10 = vadd.f32 %v8107_v23, %v3778_v44 }
  0xd3   :  { %v4665_v0 = vpop.permute.xlu0 %760  ;;  %8108 = vst [vmem:[#allocation46_spill] sm:$0xff] %v4696_v14  ;;  %v8114_v15 = vsub.f32 %v3647_v13, %v8113_v63  ;;  %v8115_v28 = vsub.f32 %v3633_v9, %v8113_v63  ;;  %v1113_v57 = vmax.f32 %v8116_v61, %v1013_v52  ;;  %v1134_v47 = vmax.f32 %v8117_v58, %v1014_v3  ;;  %v8120_v13 = vld [vmem:[#allocation62_spill] sm:$0xff]  ;;  %v8122_v9 = vld [vmem:[#allocation13_spill] sm:$0xff]  ;;  %v8125_v61 = vld [vmem:[#allocation19_spill] sm:$0xff] }
  0xd4   :  { %8102 = vst [vmem:[#allocation32_spill] sm:$0xff] %v4665_v0  ;;  %8109 = vst [vmem:[#allocation40_spill] sm:$0xff] %v4700_v17  ;;  %v8118_v23 = vsub.f32 %v3701_v26, %v8113_v63  ;;  %v8119_v8 = vsub.f32 %v3670_v18, %v8113_v63  ;;  %v8123_v52 = vld [vmem:[#allocation10_spill] sm:$0xff]  ;;  %v1723_v18 = vsub.f32 %v8125_v61, %v4468_v34  ;;  %v8128_v63 = vld [vmem:[#allocation79_spill] sm:$0xff] }
  0xd5   :  { %8110 = vst [vmem:[#allocation58_spill] sm:$0xff] %v4704_v10  ;;  %v859_v2 = vmin.f32 %v795_v43, %v8114_v15  ;;  %v880_v53 = vmin.f32 %v796_v60, %v8115_v28  ;;  %v1072_v15 = vmax.f32 %v1071_v25, %v8120_v13  ;;  %v8121_v43 = vld [vmem:[#allocation77_spill] sm:$0xff]  ;;  %v1721_v60 = vsub.f32 %v8122_v9, %v4468_v34  ;;  %v8124_v26 = vld [vmem:[#allocation6_spill] sm:$0xff]  ;;  %v8130_v13 = vld [vmem:[#allocation7_spill] sm:$0xff] }
  0xd6   :  { %v4706_v29 = vpop.permute.xlu1 %972  ;;  %3193 = vset.pattern.permute.xlu1 %v8062_v51  ;;  %v901_v62 = vmin.f32 %v797_v7, %v8118_v23  ;;  %v1722_v3 = vsub.f32 %v8123_v52, %v4468_v34  ;;  %v808_v7 = vsub.f32 %v8124_v26, %v4550_v21  ;;  %v1114_v28 = vmax.f32 %v1113_v57, %v8128_v63  ;;  %v8133_v0 = vld [vmem:[#allocation5_spill] sm:$0xff]  ;;  %v8137_v57 = vld [vmem:[#allocation51_spill] sm:$0xff]  ;;  %v8143_v17 = vld [vmem:[#allocation74_spill] sm:$0xff] }
  0xd7   :  { %8111 = vst [vmem:[#allocation45_spill] sm:$0xff] %v4706_v29  ;;  %v4709_v36 = vpop.permute.xlu0 %768  ;;  %253 = vperm.xlu1 %3193, %v8101_v5   ;;  %v1093_v29 = vmax.f32 %v1092_v12, %v8121_v43  ;;  %v807_v5 = vsub.f32 %v3684_v22, %v4550_v21  ;;  %v809_v12 = vsub.f32 %v3749_v37, %v4550_v21  ;;  %v8129_v22 = vld [vmem:[#allocation80_spill] sm:$0xff]  ;;  %v8136_v37 = vld [vmem:[#allocation15_spill] sm:$0xff] }
  0xd8   :  { %8112 = vst [vmem:[#allocation43_spill] sm:$0xff] %v4709_v36  ;;  %v922_v36 = vmin.f32 %v798_v56, %v8119_v8  ;;  %v8126_v56 = vld [vmem:[#allocation17_spill] sm:$0xff]  ;;  %v810_v8 = vsub.f32 %v3726_v32, %v4550_v21  ;;  %v1135_v23 = vmax.f32 %v1134_v47, %v8129_v22  ;;  %v8131_v43 = vld [vmem:[#allocation60_spill] sm:$0xff]  ;;  %v1073_v21 = vmax.f32 %v1072_v15, %v8136_v37  ;;  %v8144_v37 = vld [vmem:[#allocation31_spill] sm:$0xff] }
  0xd9   :  { %v1724_v25 = vsub.f32 %v8126_v56, %v4468_v34  ;;  %v8132_v52 = vsub.f32 %v8130_v13, %v8131_v43  ;;  %v8134_v30 = vsub.f32 %v8133_v0, %v8131_v43  ;;  %v3409_v32 = vld [vmem:[%s7672_s3 + $0x10] sm:$0xff]  ;;  %v1094_v63 = vmax.f32 %v1093_v29, %v8137_v57  ;;  %v8138_v47 = vld [vmem:[#allocation9_spill] sm:$0xff] }
  0xda   :  { %v8139_v22 = vsub.f32 %v8138_v47, %v8131_v43  ;;  %v4771_v14 = vmax.f32 %v1998_v31, %v8143_v17  ;;  %v4774_v29 = vmax.f32 %v2019_v4, %v8144_v37  ;;  %v8145_v57 = vld [vmem:[#allocation76_spill] sm:$0xff]  ;;  %v1136_v31 = vmax.f32 %v1135_v23, %v4496_v19  ;;  %v4806_v19 = vld [vmem:[%s7674_s0 + $0xa8] sm:$0xff] }
  0xdb   :  { %v4744_v58 = vpop.permute.xlu0 %776  ;;  %v860_v26 = vmin.f32 %v859_v2, %v8132_v52  ;;  %v881_v34 = vmin.f32 %v880_v53, %v8134_v30  ;;  %v4754_v10 = vpop.permute.xlu1 %1666  ;;  %481 = vperm.xlu1 %3193, %v3409_v32   ;;  %v8140_v2 = vld [vmem:[#allocation8_spill] sm:$0xff]  ;;  %v4777_v47 = vmax.f32 %v2040_v55, %v8145_v57  ;;  %v4791_v4 = vmin.f32 %v4560_v6, %v1723_v18 }
  0xdc   :  { %8127 = vst [vmem:[#allocation52_spill] sm:$0xff] %v4744_v58  ;;  %8135 = vst [vmem:[#allocation49_spill] sm:$0xff] %v4754_v10  ;;  %v902_v13 = vmin.f32 %v901_v62, %v8139_v22  ;;  %v8141_v52 = vsub.f32 %v8140_v2, %v8131_v43  ;;  %v8142_v58 = vld [vmem:[#allocation61_spill] sm:$0xff]  ;;  %v4794_v55 = vmin.f32 %v4565_v54, %v1724_v25  ;;  %v8155_v2 = vld [vmem:[#allocation40_spill] sm:$0xff] }
  0xdd   :  { %v861_v30 = vmin.f32 %v860_v26, %v807_v5  ;;  %v882_v53 = vmin.f32 %v881_v34, %v808_v7  ;;  %v4768_v10 = vmax.f32 %v1977_v59, %v8142_v58  ;;  %v4785_v5 = vmin.f32 %v4548_v40, %v1722_v3  ;;  %v8147_v40 = vld [vmem:[#allocation42_spill] sm:$0xff]  ;;  %v8160_v37 = vld [vmem:[#allocation20_spill] sm:$0xff] }
  0xde   :  { %v923_v0 = vmin.f32 %v922_v36, %v8141_v52  ;;  %v903_v32 = vmin.f32 %v902_v13, %v809_v12  ;;  %v4782_v36 = vmin.f32 %v4543_v48, %v1721_v60  ;;  %v1115_v59 = vmax.f32 %v1114_v28, %v4492_v20 }
  0xdf   :  { %v4779_v62 = vpop.permute.xlu0 %784  ;;  %3194 = vset.pattern.permute.xlu1 %v8011_v42  ;;  %v1074_v17 = vmax.f32 %v1073_v21, %v4591_v24  ;;  %v1095_v48 = vmax.f32 %v1094_v63, %v4595_v46  ;;  %v815_v20 = vsub.f32 %v3739_v35, %v4614_v11  ;;  %v816_v6 = vsub.f32 %v4806_v19, %v4614_v11  ;;  %v8154_v21 = vld [vmem:[#allocation46_spill] sm:$0xff] }
  0xe0   :  { %v924_v15 = vmin.f32 %v923_v0, %v810_v8  ;;  %8146 = vst [vmem:[#allocation12_spill] sm:$0xff] %v4779_v62  ;;  %v4798_v60 = vpop.permute.xlu1 %764  ;;  %1407 = vperm.xlu1 %3194, %v8147_v40   ;;  %v8148_v54 = vsub.f32 %v3731_v33, %v4279_v39  ;;  %v8149_v46 = vsub.f32 %v3706_v27, %v4279_v39  ;;  %v8156_v0 = vld [vmem:[#allocation58_spill] sm:$0xff]  ;;  %v3451_v62 = vld [vmem:[%s7674_s0 + $0x158] sm:$0xff] }
  0xe1   :  { %v817_v7 = vsub.f32 %v3803_v50, %v4614_v11  ;;  %v818_v35 = vsub.f32 %v3778_v44, %v4614_v11  ;;  %v8150_v18 = vsub.f32 %v3798_v49, %v4279_v39  ;;  %v8151_v12 = vsub.f32 %v3766_v41, %v4279_v39  ;;  %v3411_v44 = vld [vmem:[%s7674_s0 + $0xc8] sm:$0xff]  ;;  %v3412_v41 = vld [vmem:[%s7674_s0 + $0xc0] sm:$0xff] }
  0xe2   :  { %v862_v24 = vmin.f32 %v861_v30, %v8148_v54  ;;  %v883_v3 = vmin.f32 %v882_v53, %v8149_v46  ;;  %v1116_v58 = vmax.f32 %v1115_v59, %v4619_v1  ;;  %v1137_v27 = vmax.f32 %v1136_v31, %v4623_v16  ;;  %v8153_v16 = vld [vmem:[#allocation29_spill] sm:$0xff] }
  0xe3   :  { %v904_v25 = vmin.f32 %v903_v32, %v8150_v18  ;;  %v925_v8 = vmin.f32 %v924_v15, %v8151_v12  ;;  %v4826_v33 = vpop.permute.xlu0 %792  ;;  %v819_v50 = vsub.f32 %v8122_v9, %v4520_v45  ;;  %v820_v49 = vsub.f32 %v3411_v44, %v4520_v45  ;;  %v4884_v59 = vld [vmem:[%s7674_s0 + $0xf8] sm:$0xff] }
  0xe4   :  { %8152 = vst [vmem:[#allocation78_spill] sm:$0xff] %v4826_v33  ;;  %v821_v11 = vsub.f32 %v8125_v61, %v4520_v45  ;;  %v822_v39 = vsub.f32 %v8126_v56, %v4520_v45  ;;  %v1031_v1 = vadd.f32 %v3412_v41, %v8153_v16  ;;  %v1032_v9 = vadd.f32 %v3411_v44, %v8153_v16  ;;  %v4845_v28 = vpop.permute.xlu1 %976  ;;  %v8164_v18 = vld [vmem:[#allocation45_spill] sm:$0xff]  ;;  %v5317_v33 = vld [vmem:[%s7674_s0 + $0x150] sm:$0xff] }
  0xe5   :  { %3195 = vset.pattern.permute.xlu1 %v8062_v51  ;;  %v1033_v23 = vadd.f32 %v8153_v16, %v8125_v61  ;;  %v1034_v43 = vadd.f32 %v8153_v16, %v8126_v56  ;;  %v863_v26 = vmin.f32 %v862_v24, %v815_v20  ;;  %v884_v45 = vmin.f32 %v883_v3, %v816_v6  ;;  %v4860_v61 = vld [vmem:[%s7674_s0 + $0xe0] sm:$0xff]  ;;  %v8158_v56 = vld [vmem:[#allocation36_spill] sm:$0xff] }
  0xe6   :  { %486 = vperm.xlu1 %3195, %v8147_v40   ;;  %v1075_v34 = vmax.f32 %v1074_v17, %v4692_v38  ;;  %v1096_v63 = vmax.f32 %v1095_v48, %v8154_v21  ;;  %v905_v22 = vmin.f32 %v904_v25, %v817_v7  ;;  %v926_v13 = vmin.f32 %v925_v8, %v818_v35  ;;  %v4869_v38 = vld [vmem:[%s7674_s0 + $0xe8] sm:$0xff]  ;;  %v8162_v17 = vld [vmem:[#allocation32_spill] sm:$0xff]  ;;  %v8165_v8 = vld [vmem:[#allocation54_spill] sm:$0xff] }
  0xe7   :  { %v1117_v52 = vmax.f32 %v1116_v58, %v8155_v2  ;;  %v1138_v30 = vmax.f32 %v1137_v27, %v8156_v0  ;;  %8157 = vst [vmem:[#allocation59_spill] sm:$0xff] %v4860_v61  ;;  %v4864_v53 = vadd.f32 %v4860_v61, %v8158_v56  ;;  %8159 = vst [vmem:[#allocation72_spill] sm:$0xff] %v4869_v38  ;;  %v4897_v20 = vld [vmem:[%s7674_s0 + $0xf0] sm:$0xff] }
  0xe8   :  { %v4873_v32 = vadd.f32 %v4869_v38, %v8158_v56  ;;  %v4875_v15 = vpop.permute.xlu0 %1187  ;;  %v4879_v57 = vadd.f32 %v8158_v56, %v8160_v37  ;;  %8161 = vst [vmem:[#allocation73_spill] sm:$0xff] %v4884_v59  ;;  %v4888_v31 = vadd.f32 %v4884_v59, %v8158_v56  ;;  %v823_v48 = vsub.f32 %v4860_v61, %v8162_v17  ;;  %v3419_v0 = vld [vmem:[%s7674_s0 + $0x110] sm:$0xff]  ;;  %v3420_v56 = vld [vmem:[%s7674_s0 + $0x118] sm:$0xff] }
  0xe9   :  { %v824_v40 = vsub.f32 %v4869_v38, %v8162_v17  ;;  %8163 = vst [vmem:[#allocation62_spill] sm:$0xff] %v4897_v20  ;;  %v825_v6 = vsub.f32 %v4897_v20, %v8162_v17  ;;  %v826_v54 = vsub.f32 %v4884_v59, %v8162_v17  ;;  %v864_v24 = vmin.f32 %v863_v26, %v819_v50  ;;  %v4903_v3 = vpop.permute.xlu1 %1882 }
  0xea   :  { %v885_v46 = vmin.f32 %v884_v45, %v820_v49  ;;  %3196 = vset.pattern.permute.xlu1 %v8011_v42  ;;  %v906_v7 = vmin.f32 %v905_v22, %v821_v11  ;;  %v927_v35 = vmin.f32 %v926_v13, %v822_v39  ;;  %v4908_v25 = vadd.f32 %v4860_v61, %v8164_v18  ;;  %v3418_v13 = vld [vmem:[%s7674_s0 + $0x108] sm:$0xff] }
  0xeb   :  { %v4912_v12 = vadd.f32 %v4869_v38, %v8164_v18  ;;  %1199 = vperm.xlu1 %3196, %v8165_v8   ;;  %v4915_v58 = vmax.f32 %v1075_v34, %v1031_v1  ;;  %v4917_v27 = vmax.f32 %v1096_v63, %v1032_v9  ;;  %v4921_v50 = vadd.f32 %v4897_v20, %v8164_v18  ;;  %v8166_v63 = vld [vmem:[#allocation49_spill] sm:$0xff] }
  0xec   :  { %v4925_v44 = vadd.f32 %v4884_v59, %v8164_v18  ;;  %v4927_v49 = vpop.permute.xlu0 %1403  ;;  %v4929_v11 = vmax.f32 %v1117_v52, %v1033_v23  ;;  %v4931_v39 = vmax.f32 %v1138_v30, %v1034_v43  ;;  %v1979_v41 = vmax.f32 %v4768_v10, %v4864_v53  ;;  %v3427_v43 = vld [vmem:[%s7672_s3 + $0x20] sm:$0xff] }
  0xed   :  { %v2000_v16 = vmax.f32 %v4771_v14, %v4873_v32  ;;  %v2021_v1 = vmax.f32 %v4774_v29, %v4879_v57  ;;  %v2042_v9 = vmax.f32 %v4777_v47, %v4888_v31  ;;  %v865_v26 = vmin.f32 %v864_v24, %v823_v48  ;;  %v3417_v47 = vld [vmem:[%s7674_s0 + $0x100] sm:$0xff]  ;;  %v8168_v57 = vld [vmem:[#allocation63_spill] sm:$0xff] }
  0xee   :  { %v886_v45 = vmin.f32 %v885_v46, %v824_v40  ;;  %v907_v34 = vmin.f32 %v906_v7, %v825_v6  ;;  %v928_v21 = vmin.f32 %v927_v35, %v826_v54  ;;  %v4945_v10 = vpop.permute.xlu1 %980  ;;  %v1729_v22 = vsub.f32 %v3417_v47, %v8166_v63  ;;  %v8167_v32 = vld [vmem:[#allocation14_spill] sm:$0xff]  ;;  %v8170_v48 = vld [vmem:[#allocation11_spill] sm:$0xff]  ;;  %v4987_v7 = vld [vmem:[%s7674_s0 + $0x30] sm:$0xff] }
  0xef   :  { %3197 = vset.pattern.permute.xlu1 %v8062_v51  ;;  %v1730_v2 = vsub.f32 %v3418_v13, %v8166_v63  ;;  %v1731_v30 = vsub.f32 %v3419_v0, %v8166_v63  ;;  %v1732_v53 = vsub.f32 %v3420_v56, %v8166_v63  ;;  %v8169_v31 = vsub.f32 %v8167_v32, %v8168_v57  ;;  %v4994_v35 = vld [vmem:[%s7674_s0 + $0x38] sm:$0xff]  ;;  %v8177_v63 = vld [vmem:[#allocation43_spill] sm:$0xff] }
  0xf0   :  { %263 = vperm.xlu1 %3197, %v8165_v8   ;;  %v4961_v52 = vpop.permute.xlu0 %1195  ;;  %v8171_v40 = vsub.f32 %v8170_v48, %v8168_v57  ;;  %v8172_v54 = vsub.f32 %v8160_v37, %v8168_v57  ;;  %v827_v46 = vsub.f32 %v3417_v47, %v4798_v60  ;;  %8173 = vst [vmem:[#allocation77_spill] sm:$0xff] %v4987_v7  ;;  %8174 = vst [vmem:[#allocation13_spill] sm:$0xff] %v4994_v35  ;;  %v8175_v37 = vld [vmem:[#allocation18_spill] sm:$0xff] }
  0xf1   :  { %v1767_v17 = vmin.f32 %v4782_v36, %v8169_v31  ;;  %v1252_v36 = vsub.f32 %v4987_v7, %v4875_v15  ;;  %v5005_v8 = vld [vmem:[%s7674_s0 + $0x120] sm:$0xff]  ;;  %v5012_v31 = vld [vmem:[%s7674_s0 + $0x70] sm:$0xff] }
  0xf2   :  { %v1788_v6 = vmin.f32 %v4785_v5, %v8171_v40  ;;  %v1809_v24 = vmin.f32 %v4791_v4, %v8172_v54  ;;  %v1253_v5 = vsub.f32 %v4994_v35, %v4875_v15  ;;  %v8176_v4 = vsub.f32 %v8175_v37, %v8168_v57  ;;  %8178 = vst [vmem:[#allocation10_spill] sm:$0xff] %v5012_v31  ;;  %v5043_v7 = vld [vmem:[%s7674_s0 + $0x130] sm:$0xff] }
  0xf3   :  { %v831_v32 = vsub.f32 %v5005_v8, %v8177_v63  ;;  %v1260_v48 = vsub.f32 %v5012_v31, %v4961_v52  ;;  %v828_v40 = vsub.f32 %v3418_v13, %v4798_v60  ;;  %v829_v54 = vsub.f32 %v3419_v0, %v4798_v60  ;;  %v5033_v14 = vpop.permute.xlu1 %1674 }
  0xf4   :  { %v1830_v18 = vmin.f32 %v4794_v55, %v8176_v4  ;;  %v5019_v55 = vld [vmem:[%s7674_s0 + $0x78] sm:$0xff]  ;;  %v830_v37 = vsub.f32 %v3420_v56, %v4798_v60  ;;  %v5029_v4 = vld [vmem:[%s7674_s0 + $0x128] sm:$0xff]  ;;  %491 = vperm.xlu1 %3197, %v3427_v43   ;;  %v5038_v23 = vpop.permute.xlu0 %1411  ;;  %v1789_v31 = vmin.f32 %v1788_v6, %v1730_v2  ;;  %v1810_v60 = vmin.f32 %v1809_v24, %v1731_v30  ;;  %v8182_v2 = vld [vmem:[#allocation64_spill] sm:$0xff] }
  0xf5   :  { %8179 = vst [vmem:[#allocation6_spill] sm:$0xff] %v5019_v55  ;;  %v1261_v57 = vsub.f32 %v5019_v55, %v4961_v52  ;;  %v832_v29 = vsub.f32 %v5029_v4, %v8177_v63  ;;  %8180 = vst [vmem:[#allocation19_spill] sm:$0xff] %v5038_v23  ;;  %v1768_v55 = vmin.f32 %v1767_v17, %v1729_v22  ;;  %v5052_v43 = vld [vmem:[%s7674_s0 + $0x138] sm:$0xff] }
  0xf6   :  { %v1831_v35 = vmin.f32 %v1830_v18, %v1732_v53  ;;  %v833_v59 = vsub.f32 %v5043_v7, %v8177_v63  ;;  %v866_v20 = vmin.f32 %v865_v26, %v827_v46  ;;  %v1352_v38 = vmin.f32 %v1260_v48, %v1252_v36  ;;  %8181 = vst [vmem:[#allocation17_spill] sm:$0xff] %v5052_v43  ;;  %v8183_v53 = vld [vmem:[#allocation2_spill] sm:$0xff]  ;;  %v8184_v6 = vld [vmem:[#allocation21_spill] sm:$0xff] }
  0xf7   :  { %v5047_v61 = vmin.f32 %v1261_v57, %v1253_v5  ;;  %v834_v22 = vsub.f32 %v5052_v43, %v8177_v63  ;;  %v5057_v30 = vmax.f32 %v1979_v41, %v8182_v2  ;;  %v5060_v17 = vmax.f32 %v2000_v16, %v8183_v53  ;;  %v8185_v5 = vld [vmem:[#allocation65_spill] sm:$0xff]  ;;  %v8186_v63 = vld [vmem:[#allocation22_spill] sm:$0xff]  ;;  %v8189_v16 = vld [vmem:[#allocation16_spill] sm:$0xff] }
  0xf8   :  { %v5063_v24 = vmax.f32 %v2021_v1, %v8184_v6  ;;  %v887_v26 = vmin.f32 %v886_v45, %v828_v40  ;;  %v908_v46 = vmin.f32 %v907_v34, %v829_v54  ;;  %v929_v36 = vmin.f32 %v928_v21, %v830_v37  ;;  %3198 = vset.pattern.permute.xlu1 %v8011_v42  ;;  %v5069_v48 = vpop.permute.xlu0 %1203  ;;  %v8187_v57 = vld [vmem:[#allocation66_spill] sm:$0xff]  ;;  %v8191_v45 = vld [vmem:[#allocation28_spill] sm:$0xff]  ;;  %v5091_v37 = vpop.permute.xlu1 %772  ;;  %v8195_v6 = vld [vmem:[#allocation57_spill] sm:$0xff] }
  0xf9   :  { %v5066_v18 = vmax.f32 %v2042_v9, %v8185_v5  ;;  %v8188_v41 = vsub.f32 %v8186_v63, %v8187_v57  ;;  %v8190_v53 = vsub.f32 %v8189_v16, %v8187_v57  ;;  %v8192_v34 = vsub.f32 %v8191_v45, %v8187_v57  ;;  %v8193_v9 = vld [vmem:[#allocation26_spill] sm:$0xff]  ;;  %1415 = vperm.xlu1 %3198, %v8195_v6  }
  0xfa   :  { %v8194_v40 = vsub.f32 %v8193_v9, %v8187_v57  ;;  %v1039_v5 = vadd.f32 %v3417_v47, %v4845_v28  ;;  %v1041_v63 = vadd.f32 %v3419_v0, %v4845_v28  ;;  %v3430_v57 = vld [vmem:[%s7674_s0 + $0xb0] sm:$0xff]  ;;  %v5110_v47 = vmin.f32 %v908_v46, %v833_v59 }
  0xfb   :  { %v5074_v2 = vmin.f32 %v1768_v55, %v8188_v41  ;;  %v5079_v1 = vmin.f32 %v1789_v31, %v8190_v53  ;;  %v5084_v21 = vmin.f32 %v1810_v60, %v8192_v34  ;;  %v5094_v55 = vmin.f32 %v866_v20, %v831_v32  ;;  %v8196_v0 = vld [vmem:[#allocation52_spill] sm:$0xff] }
  0xfc   :  { %v5089_v54 = vmin.f32 %v1831_v35, %v8194_v40  ;;  %v1040_v31 = vadd.f32 %v3418_v13, %v4845_v28  ;;  %v1042_v60 = vadd.f32 %v3420_v56, %v4845_v28  ;;  %v1945_v41 = vadd.f32 %v5005_v8, %v4903_v3  ;;  %v5117_v28 = vld [vmem:[%s7674_s0 + $0x160] sm:$0xff]  ;;  %v5121_v16 = vpop.permute.xlu0 %1419  ;;  %v5156_v9 = vld [vmem:[%s7674_s0 + $0x170] sm:$0xff]  ;;  %v8214_v40 = vld [vmem:[#allocation27_spill] sm:$0xff] }
  0xfd   :  { %v1946_v35 = vadd.f32 %v5029_v4, %v4903_v3  ;;  %v1268_v20 = vsub.f32 %v3430_v57, %v5069_v48  ;;  %v5108_v32 = vmin.f32 %v887_v26, %v832_v29  ;;  %v5112_v13 = vmin.f32 %v929_v36, %v834_v22  ;;  %8197 = vst [vmem:[#allocation79_spill] sm:$0xff] %v5121_v16  ;;  %v5134_v29 = vld [vmem:[%s7674_s0 + $0x168] sm:$0xff]  ;;  %v5138_v26 = vpop.permute.xlu1 %984  ;;  %v8215_v56 = vld [vmem:[#allocation25_spill] sm:$0xff] }
  0xfe   :  { %v5125_v53 = vadd.f32 %v5043_v7, %v4903_v3  ;;  %v5129_v59 = vadd.f32 %v5052_v43, %v4903_v3  ;;  %3199 = vset.pattern.permute.xlu1 %v8062_v51  ;;  %v8198_v36 = vmax.f32 %v4915_v58, %v4908_v25  ;;  %v8199_v3 = vmax.f32 %v4917_v27, %v4912_v12 }
  0xff   :  { %v5141_v46 = vmin.f32 %v1352_v38, %v1268_v20  ;;  %v5163_v38 = vld [vmem:[%s7674_s0 + $0x178] sm:$0xff]  ;;  %496 = vperm.xlu1 %3199, %v8195_v6   ;;  %v8200_v12 = vmax.f32 %v4929_v11, %v4921_v50  ;;  %v8201_v27 = vmax.f32 %v4931_v39, %v4925_v44  ;;  %v2002_v57 = vmax.f32 %v5060_v17, %v1946_v35  ;;  %v5183_v20 = vld [vmem:[%s7674_s0 + $0x1a0] sm:$0xff]  ;;  %v5190_v50 = vld [vmem:[%s7674_s0 + $0x1a8] sm:$0xff] }
 0x100   :  { %v5146_v45 = vmax.f32 %v8198_v36, %v1039_v5  ;;  %v5151_v34 = vmax.f32 %v8199_v3, %v1040_v31  ;;  %v1981_v31 = vmax.f32 %v5057_v30, %v1945_v41  ;;  %8202 = vst [vmem:[#allocation80_spill] sm:$0xff] %v5183_v20  ;;  %8203 = vst [vmem:[#allocation7_spill] sm:$0xff] %v5190_v50  ;;  %v5197_v11 = vld [vmem:[%s7674_s0 + $0x1b0] sm:$0xff]  ;;  %v5204_v30 = vld [vmem:[%s7674_s0 + $0x1b8] sm:$0xff] }
 0x101   :  { %v5171_v58 = vmax.f32 %v8200_v12, %v1041_v63  ;;  %v5176_v5 = vmax.f32 %v8201_v27, %v1042_v60  ;;  %8204 = vst [vmem:[#allocation60_spill] sm:$0xff] %v5197_v11  ;;  %8205 = vst [vmem:[#allocation5_spill] sm:$0xff] %v5204_v30  ;;  %v5208_v63 = vpop.permute.xlu0 %1211  ;;  %v5210_v60 = vpop.f32.mrb[0].mxu0  ;;  %v2023_v41 = vmax.f32 %v5063_v24, %v5125_v53  ;;  %v5219_v36 = vld [vmem:[%s7674_s0 + $0x1e0] sm:$0xff]  ;;  %v5226_v12 = vld [vmem:[%s7674_s0 + $0x1e8] sm:$0xff] }
 0x102   :  { %8206 = vst [vmem:[#allocation15_spill] sm:$0xff] %v5210_v60  ;;  %v2044_v35 = vmax.f32 %v5066_v18, %v5129_v59  ;;  %8207 = vst [vmem:[#allocation51_spill] sm:$0xff] %v5219_v36  ;;  %v5230_v24 = vpop.f32.mrb[1].mxu0  ;;  %v5232_v53 = vpop.permute.xlu1 %1890  ;;  %v5238_v18 = vld [vmem:[%s7674_s0 + $0x1f0] sm:$0xff]  ;;  %v5245_v3 = vld [vmem:[%s7674_s0 + $0x1f8] sm:$0xff]  ;;  %v5265_v27 = vadd.f32 %v5005_v8, %v4945_v10  ;;  %v5269_v25 = vadd.f32 %v5029_v4, %v4945_v10 }
 0x103   :  { %8208 = vst [vmem:[#allocation9_spill] sm:$0xff] %v5226_v12  ;;  %8209 = vst [vmem:[#allocation8_spill] sm:$0xff] %v5230_v24  ;;  %3200 = vset.pattern.permute.xlu1 %v8011_v42  ;;  %v5252_v17 = vld [vmem:[%s7674_s0 + $0x20] sm:$0xff]  ;;  %v5259_v59 = vld [vmem:[%s7674_s0 + $0x28] sm:$0xff]  ;;  %v165_v6 = vpop.f32.mrb[2].mxu0  ;;  %v5272_v22 = vmax.f32 %v1981_v31, %v8214_v40  ;;  %v5275_v16 = vmax.f32 %v2002_v57, %v8215_v56  ;;  %v5312_v36 = vadd.f32 %v5043_v7, %v4945_v10 }
 0x104   :  { %8210 = vst [vmem:[#allocation61_spill] sm:$0xff] %v5238_v18  ;;  %8211 = vst [vmem:[#allocation74_spill] sm:$0xff] %v5245_v3  ;;  %v1250_v39 = vsub.f32 %v5252_v17, %v4875_v15  ;;  %v1251_v44 = vsub.f32 %v5259_v59, %v4875_v15  ;;  %v166_v15 = vpop.f32.mrb[3].mxu0  ;;  %v5283_v6 = vld [vmem:[%s7674_s0 + $0x140] sm:$0xff]  ;;  %v5290_v40 = vld [vmem:[%s7674_s0 + $0x148] sm:$0xff]  ;;  %v5308_v18 = vpop.f32.mrb[0].mxu1  ;;  %v1740_v20 = vsub.f32 %v3451_v62, %v5033_v14 }
 0x105   :  { %8212 = vst [vmem:[#allocation31_spill] sm:$0xff] %v5252_v17  ;;  %8213 = vst [vmem:[#allocation76_spill] sm:$0xff] %v5259_v59  ;;  %v3445_v17 = vld [vmem:[%s7673_s2 + $0x30] sm:$0xff]  ;;  %v1737_v59 = vsub.f32 %v5283_v6, %v5033_v14  ;;  %v1738_v56 = vsub.f32 %v5290_v40, %v5033_v14  ;;  %v5297_v31 = vld [vmem:[%s7674_s0 + $0x60] sm:$0xff] }
 0x106   :  { %1207 = vperm.xlu1 %3200, %v3445_v17   ;;  %8216 = vst [vmem:[#allocation42_spill] sm:$0xff] %v5297_v31  ;;  %v1258_v57 = vsub.f32 %v5297_v31, %v4961_v52  ;;  %v5304_v15 = vld [vmem:[%s7674_s0 + $0x68] sm:$0xff]  ;;  %8218 = vst [vmem:[#allocation46_spill] sm:$0xff] %v5308_v18  ;;  %v1739_v31 = vsub.f32 %v5317_v33, %v5033_v14  ;;  %v8219_v12 = vld [vmem:[#allocation69_spill] sm:$0xff] }
 0x107   :  { %8217 = vst [vmem:[#allocation29_spill] sm:$0xff] %v5304_v15  ;;  %v1259_v3 = vsub.f32 %v5304_v15, %v4961_v52  ;;  %v5322_v30 = vmax.f32 %v2023_v41, %v8219_v12  ;;  %v8220_v11 = vld [vmem:[#allocation3_spill] sm:$0xff]  ;;  %v5327_v52 = vpop.f32.mrb[1].mxu1  ;;  %v5331_v15 = vadd.f32 %v5052_v43, %v4945_v10  ;;  %v5340_v41 = vld [vmem:[%s7674_s0 + $0x40] sm:$0xff]  ;;  %v5355_v12 = vpop.permute.xlu0 %1427  ;;  %v836_v43 = vsub.f32 %v5290_v40, %v5091_v37 }
 0x108   :  { %v5325_v50 = vmax.f32 %v2044_v35, %v8220_v11  ;;  %8221 = vst [vmem:[#allocation40_spill] sm:$0xff] %v5327_v52  ;;  %8222 = vst [vmem:[#allocation58_spill] sm:$0xff] %v5340_v41  ;;  %v5344_v11 = vadd.f32 %v5340_v41, %v4927_v49  ;;  %v5349_v10 = vld [vmem:[%s7674_s0 + $0x48] sm:$0xff]  ;;  %v206_v14 = vpop.f32.mrb[2].mxu1  ;;  %v5361_v41 = vpop.permute.xlu1 %988  ;;  %v1310_v18 = vmin.f32 %v1258_v57, %v1250_v39 }
 0x109   :  { %8224 = vst [vmem:[#allocation20_spill] sm:$0xff] %v5349_v10  ;;  %v5353_v35 = vadd.f32 %v5349_v10, %v4927_v49  ;;  %8226 = vst [vmem:[#allocation45_spill] sm:$0xff] %v5355_v12  ;;  %v5376_v14 = vld [vmem:[%s7674_s0 + $0x58] sm:$0xff]  ;;  %v207_v52 = vpop.f32.mrb[3].mxu1  ;;  %v1770_v12 = vmin.f32 %v5074_v2, %v1737_v59  ;;  %v1791_v10 = vmin.f32 %v5079_v1, %v1738_v56  ;;  %v3456_v1 = vld [vmem:[%s7674_s0 + $0xa0] sm:$0xff] }
 0x10a   :  { %8223 = vst [vmem:[#allocation36_spill] sm:$0xff] %v5344_v11  ;;  %3201 = vset.pattern.permute.xlu1 %v8062_v51  ;;  %v5367_v11 = vld [vmem:[%s7674_s0 + $0x50] sm:$0xff]  ;;  %8229 = vst [vmem:[#allocation14_spill] sm:$0xff] %v5376_v14  ;;  %v5380_v24 = vadd.f32 %v5376_v14, %v4927_v49  ;;  %v1331_v60 = vmin.f32 %v1259_v3, %v1251_v44  ;;  %v1833_v52 = vmin.f32 %v5089_v54, %v1740_v20  ;;  %v5406_v54 = vld [vmem:[%s7674_s0 + $0x80] sm:$0xff] }
 0x10b   :  { %8225 = vst [vmem:[#allocation32_spill] sm:$0xff] %v5353_v35  ;;  %8227 = vst [vmem:[#allocation54_spill] sm:$0xff] %v5367_v11  ;;  %v5371_v35 = vadd.f32 %v5367_v11, %v4927_v49  ;;  %273 = vperm.xlu1 %3201, %v3445_v17   ;;  %v1812_v11 = vmin.f32 %v5084_v21, %v1739_v31  ;;  %v837_v49 = vsub.f32 %v5317_v33, %v5091_v37  ;;  %v3458_v20 = vld [vmem:[%s7674_s0 + $0xb8] sm:$0xff]  ;;  %v8236_v56 = vld [vmem:[#allocation24_spill] sm:$0xff] }
 0x10c   :  { %8230 = vst [vmem:[#allocation63_spill] sm:$0xff] %v5380_v24  ;;  %v838_v2 = vsub.f32 %v3451_v62, %v5091_v37  ;;  %v1266_v44 = vsub.f32 %v3456_v1, %v5069_v48  ;;  %v1267_v21 = vsub.f32 %v4806_v19, %v5069_v48  ;;  %v1121_v39 = vmax.f32 %v5171_v58, %v5312_v36  ;;  %v5416_v3 = vpop.permute.xlu1 %1682  ;;  %v8233_v58 = vld [vmem:[#allocation30_spill] sm:$0xff] }
 0x10d   :  { %8228 = vst [vmem:[#allocation49_spill] sm:$0xff] %v5371_v35  ;;  %v835_v35 = vsub.f32 %v5283_v6, %v5091_v37  ;;  %v1142_v17 = vmax.f32 %v5176_v5, %v5331_v15  ;;  %8231 = vst [vmem:[#allocation11_spill] sm:$0xff] %v5406_v54  ;;  %v5410_v37 = vadd.f32 %v5406_v54, %v5038_v23  ;;  %v8234_v36 = vld [vmem:[#allocation70_spill] sm:$0xff]  ;;  %v3459_v15 = vld [vmem:[%s7672_s3 + $0x30] sm:$0xff] }
 0x10e   :  { %v1269_v19 = vsub.f32 %v3458_v20, %v5069_v48  ;;  %v8235_v5 = vsub.f32 %v8233_v58, %v8234_v36  ;;  %v8237_v31 = vsub.f32 %v8236_v56, %v8234_v36  ;;  %v5434_v48 = vld [vmem:[%s7674_s0 + $0x90] sm:$0xff]  ;;  %v889_v58 = vmin.f32 %v5108_v32, %v836_v43  ;;  %v8242_v56 = vld [vmem:[#allocation38_spill] sm:$0xff]  ;;  %v8244_v54 = vld [vmem:[#allocation35_spill] sm:$0xff] }
 0x10f   :  { %8232 = vst [vmem:[#allocation18_spill] sm:$0xff] %v5410_v37  ;;  %501 = vperm.xlu1 %3201, %v3459_v15   ;;  %8238 = vst [vmem:[#allocation43_spill] sm:$0xff] %v5434_v48  ;;  %v5438_v1 = vadd.f32 %v5434_v48, %v5038_v23  ;;  %v868_v20 = vmin.f32 %v5094_v55, %v835_v35  ;;  %v5457_v37 = vpop.permute.xlu0 %1219  ;;  %v931_v48 = vmin.f32 %v5112_v13, %v838_v2 }
 0x110   :  { %v5421_v59 = vmin.f32 %v1770_v12, %v8235_v5  ;;  %v5426_v57 = vmin.f32 %v1791_v10, %v8237_v31  ;;  %v5443_v12 = vld [vmem:[%s7674_s0 + $0x98] sm:$0xff]  ;;  %v910_v5 = vmin.f32 %v5110_v47, %v837_v49  ;;  %v8243_v31 = vsub.f32 %v8242_v56, %v8234_v36 }
 0x111   :  { %8239 = vst [vmem:[#allocation64_spill] sm:$0xff] %v5438_v1  ;;  %8240 = vst [vmem:[#allocation2_spill] sm:$0xff] %v5443_v12  ;;  %v5447_v10 = vadd.f32 %v5443_v12, %v5038_v23  ;;  %v8245_v1 = vsub.f32 %v8244_v54, %v8234_v36  ;;  %v1311_v12 = vmin.f32 %v1310_v18, %v1266_v44  ;;  %v8250_v54 = vld [vmem:[#allocation59_spill] sm:$0xff]  ;;  %v8251_v36 = vld [vmem:[#allocation72_spill] sm:$0xff] }
 0x112   :  { %v5455_v15 = vmin.f32 %v1812_v11, %v8243_v31  ;;  %v1332_v55 = vmin.f32 %v1331_v60, %v1267_v21  ;;  %v1953_v43 = vadd.f32 %v5117_v28, %v5232_v53  ;;  %v1954_v32 = vadd.f32 %v5134_v29, %v5232_v53  ;;  %v8253_v31 = vld [vmem:[#allocation73_spill] sm:$0xff] }
 0x113   :  { %8241 = vst [vmem:[#allocation21_spill] sm:$0xff] %v5447_v10  ;;  %v5463_v23 = vmin.f32 %v1833_v52, %v8245_v1  ;;  %v1955_v47 = vadd.f32 %v5156_v9, %v5232_v53  ;;  %v1374_v11 = vmin.f32 %v5047_v61, %v1269_v19  ;;  %v1047_v13 = vadd.f32 %v5283_v6, %v5138_v26 }
 0x114   :  { %v1048_v35 = vadd.f32 %v5290_v40, %v5138_v26  ;;  %v1049_v60 = vadd.f32 %v5317_v33, %v5138_v26  ;;  %v1050_v18 = vadd.f32 %v3451_v62, %v5138_v26  ;;  %3202 = vset.pattern.permute.xlu1 %v8011_v42  ;;  %v8246_v49 = vsub.f32 %v5117_v28, %v8196_v0  ;;  %v5497_v33 = vpop.permute.xlu1 %780  ;;  %v3462_v26 = vld [vmem:[%s7672_s3 + $0x38] sm:$0xff] }
 0x115   :  { %v8247_v61 = vsub.f32 %v5134_v29, %v8196_v0  ;;  %v8248_v6 = vsub.f32 %v5156_v9, %v8196_v0  ;;  %v1956_v62 = vadd.f32 %v5163_v38, %v5232_v53  ;;  %1423 = vperm.xlu1 %3202, %v3462_v26   ;;  %v8249_v44 = vsub.f32 %v5163_v38, %v8196_v0  ;;  %v8252_v53 = vld [vmem:[#allocation62_spill] sm:$0xff] }
 0x116   :  { %v5483_v52 = vmin.f32 %v868_v20, %v8246_v49  ;;  %v1274_v19 = vsub.f32 %v8250_v54, %v5208_v63  ;;  %v1275_v1 = vsub.f32 %v8251_v36, %v5208_v63  ;;  %v1276_v20 = vsub.f32 %v8252_v53, %v5208_v63 }
 0x117   :  { %v5488_v2 = vmin.f32 %v889_v58, %v8247_v61  ;;  %v5493_v40 = vmin.f32 %v910_v5, %v8248_v6  ;;  %v5505_v21 = vmin.f32 %v931_v48, %v8249_v44  ;;  %v1983_v58 = vmax.f32 %v5272_v22, %v1953_v43  ;;  %v5518_v48 = vpop.permute.xlu0 %1435  ;;  %v8257_v43 = vld [vmem:[#allocation67_spill] sm:$0xff] }
 0x118   :  { %v2004_v5 = vmax.f32 %v5275_v16, %v1954_v32  ;;  %v2025_v56 = vmax.f32 %v5322_v30, %v1955_v47  ;;  %v1277_v0 = vsub.f32 %v8253_v31, %v5208_v63  ;;  %8254 = vst [vmem:[#allocation65_spill] sm:$0xff] %v5518_v48  ;;  %v8255_v49 = vmax.f32 %v5146_v45, %v5265_v27  ;;  %v8258_v47 = vld [vmem:[#allocation55_spill] sm:$0xff]  ;;  %v8265_v48 = vld [vmem:[#allocation40_spill] sm:$0xff] }
 0x119   :  { %v8256_v6 = vmax.f32 %v5151_v34, %v5269_v25  ;;  %v5530_v22 = vmax.f32 %v1121_v39, %v1049_v60  ;;  %v5532_v16 = vmax.f32 %v1142_v17, %v1050_v18  ;;  %v2046_v30 = vmax.f32 %v5325_v50, %v1956_v62  ;;  %v5547_v34 = vpop.permute.xlu1 %992  ;;  %3203 = vset.pattern.permute.xlu1 %v8062_v51 }
 0x11a   :  { %v5523_v61 = vmax.f32 %v8255_v49, %v1047_v13  ;;  %v5537_v63 = vadd.f32 %v5117_v28, %v5361_v41  ;;  %v5541_v45 = vadd.f32 %v5134_v29, %v5361_v41  ;;  %v5545_v27 = vadd.f32 %v5156_v9, %v5361_v41  ;;  %506 = vperm.xlu1 %3203, %v3462_v26   ;;  %v8262_v49 = vld [vmem:[#allocation15_spill] sm:$0xff] }
 0x11b   :  { %v5528_v44 = vmax.f32 %v8256_v6, %v1048_v35  ;;  %v5552_v25 = vadd.f32 %v5163_v38, %v5361_v41  ;;  %v1312_v50 = vmin.f32 %v1311_v12, %v1274_v19  ;;  %v1333_v39 = vmin.f32 %v1332_v55, %v1275_v1  ;;  %v8259_v35 = vld [vmem:[#allocation68_spill] sm:$0xff]  ;;  %v8261_v19 = vld [vmem:[#allocation23_spill] sm:$0xff]  ;;  %v5581_v36 = vpop.permute.xlu0 %1227 }
 0x11c   :  { %v1354_v17 = vmin.f32 %v5141_v46, %v1276_v20  ;;  %v5556_v32 = vmax.f32 %v1983_v58, %v8257_v43  ;;  %v5559_v13 = vmax.f32 %v2004_v5, %v8258_v47  ;;  %v5562_v60 = vmax.f32 %v2025_v56, %v8259_v35  ;;  %v8260_v46 = vld [vmem:[#allocation17_spill] sm:$0xff]  ;;  %v3464_v1 = vld [vmem:[%s7674_s0 + $0x188] sm:$0xff]  ;;  %v3465_v20 = vld [vmem:[%s7674_s0 + $0x190] sm:$0xff] }
 0x11d   :  { %v1375_v18 = vmin.f32 %v1374_v11, %v1277_v0  ;;  %v1282_v62 = vsub.f32 %v5005_v8, %v5457_v37  ;;  %v1283_v41 = vsub.f32 %v5029_v4, %v5457_v37  ;;  %v1284_v12 = vsub.f32 %v5043_v7, %v5457_v37  ;;  %v3463_v4 = vld [vmem:[%s7674_s0 + $0x180] sm:$0xff]  ;;  %v5597_v5 = vpop.permute.xlu1 %1898  ;;  %v3466_v56 = vld [vmem:[%s7674_s0 + $0x198] sm:$0xff]  ;;  %v8264_v47 = vld [vmem:[#allocation8_spill] sm:$0xff] }
 0x11e   :  { %v1285_v55 = vsub.f32 %v8260_v46, %v5457_v37  ;;  %v5579_v8 = vmax.f32 %v2046_v30, %v8261_v19  ;;  %v1745_v37 = vsub.f32 %v3463_v4, %v5416_v3  ;;  %v1746_v53 = vsub.f32 %v3464_v1, %v5416_v3  ;;  %3204 = vset.pattern.permute.xlu1 %v8011_v42  ;;  %v3467_v0 = vld [vmem:[%s7673_s2 + $0x40] sm:$0xff] }
 0x11f   :  { %v1747_v58 = vsub.f32 %v3465_v20, %v5416_v3  ;;  %v1748_v31 = vsub.f32 %v3466_v56, %v5416_v3  ;;  %1215 = vperm.xlu1 %3204, %v3467_v0   ;;  %v8263_v30 = vld [vmem:[#allocation46_spill] sm:$0xff]  ;;  %v1313_v46 = vmin.f32 %v1312_v50, %v1282_v62  ;;  %v1334_v19 = vmin.f32 %v1333_v39, %v1283_v41 }
 0x120   :  { %v1355_v7 = vmin.f32 %v1354_v17, %v1284_v12  ;;  %v1376_v11 = vmin.f32 %v1375_v18, %v1285_v55  ;;  %v843_v54 = vsub.f32 %v3463_v4, %v5497_v33  ;;  %v844_v26 = vsub.f32 %v3464_v1, %v5497_v33  ;;  %v5624_v18 = vpop.permute.xlu0 %1443  ;;  %v8277_v12 = vld [vmem:[#allocation47_spill] sm:$0xff] }
 0x121   :  { %v845_v3 = vsub.f32 %v3465_v20, %v5497_v33  ;;  %v7865_v10 = vrot.slane %v8265_v48, 4  ;;  %v1772_v24 = vmin.f32 %v5421_v59, %v1745_v37  ;;  %v1793_v6 = vmin.f32 %v5426_v57, %v1746_v53  ;;  %v5619_v39 = vpop.permute.xlu1 %996  ;;  %8266 = vst [vmem:[#allocation22_spill] sm:$0xff] %v5624_v18 }
 0x122   :  { %v1814_v43 = vmin.f32 %v5455_v15, %v1747_v58  ;;  %v846_v35 = vsub.f32 %v3466_v56, %v5497_v33  ;;  %v1835_v50 = vmin.f32 %v5463_v23, %v1748_v31  ;;  %v1290_v17 = vsub.f32 %v5117_v28, %v5581_v36 }
 0x123   :  { %3205 = vset.pattern.permute.xlu1 %v8062_v51  ;;  %v8267_v59 = vrot.slane %v8262_v49, 6  ;;  %v8269_v57 = vrot.slane %v8263_v30, 6  ;;  %v8270_v15 = vrot.slane %v8264_v47, 4  ;;  %v1291_v23 = vsub.f32 %v5134_v29, %v5581_v36  ;;  %v8273_v29 = vld [vmem:[#allocation71_spill] sm:$0xff] }
 0x124   :  { %283 = vperm.xlu1 %3205, %v3467_v0   ;;  %v1292_v28 = vsub.f32 %v5156_v9, %v5581_v36  ;;  %v870_v55 = vmin.f32 %v5483_v52, %v843_v54  ;;  %v891_v37 = vmin.f32 %v5488_v2, %v844_v26  ;;  %v912_v53 = vmin.f32 %v5493_v40, %v845_v3  ;;  %v8272_v0 = vld [vmem:[#allocation39_spill] sm:$0xff]  ;;  %v8275_v9 = vld [vmem:[#allocation33_spill] sm:$0xff] }
 0x125   :  { %v5629_v62 = vpack.i.bf16 %v8267_v59, %v8264_v47  ;;  %v5635_v33 = vpack.i.bf16 %v8270_v15, %v8269_v57  ;;  %v1293_v58 = vsub.f32 %v5163_v38, %v5581_v36  ;;  %v933_v31 = vmin.f32 %v5505_v21, %v846_v35  ;;  %v8279_v26 = vld [vmem:[#allocation41_spill] sm:$0xff]  ;;  %v1691_v3 = vpop.permute.xlu1 %1690 }
 0x126   :  { %v8274_v59 = vsub.f32 %v8272_v0, %v8273_v29  ;;  %v8276_v15 = vsub.f32 %v8275_v9, %v8273_v29  ;;  %v8278_v52 = vsub.f32 %v8277_v12, %v8273_v29  ;;  %v1055_v2 = vadd.f32 %v3463_v4, %v5547_v34  ;;  %v8282_v12 = vld [vmem:[#allocation12_spill] sm:$0xff] }
 0x127   :  { %8268 = vst [vmem:[#allocation66_spill] sm:$0xff] %v5629_v62  ;;  %8271 = vst [vmem:[#allocation16_spill] sm:$0xff] %v5635_v33  ;;  %v1056_v40 = vadd.f32 %v3464_v1, %v5547_v34  ;;  %v8280_v38 = vsub.f32 %v8279_v26, %v8273_v29  ;;  %v5663_v36 = vmin.f32 %v1313_v46, %v1290_v17  ;;  %v8281_v1 = vld [vmem:[#allocation80_spill] sm:$0xff]  ;;  %v8284_v46 = vld [vmem:[#allocation7_spill] sm:$0xff] }
 0x128   :  { %v1773_v57 = vmin.f32 %v1772_v24, %v8274_v59  ;;  %v1794_v41 = vmin.f32 %v1793_v6, %v8276_v15  ;;  %v1815_v54 = vmin.f32 %v1814_v43, %v8278_v52  ;;  %v1057_v24 = vadd.f32 %v3465_v20, %v5547_v34  ;;  %v3468_v6 = vld [vmem:[%s7672_s3 + $0x40] sm:$0xff] }
 0x129   :  { %v1836_v21 = vmin.f32 %v1835_v50, %v8280_v38  ;;  %v1058_v35 = vadd.f32 %v3466_v56, %v5547_v34  ;;  %511 = vperm.xlu1 %3205, %v3468_v6   ;;  %v5670_v43 = vmin.f32 %v1334_v19, %v1291_v23  ;;  %v5672_v4 = vmin.f32 %v1355_v7, %v1292_v28  ;;  %v8286_v34 = vld [vmem:[#allocation60_spill] sm:$0xff]  ;;  %v5689_v19 = vpop.permute.xlu0 %1235  ;;  %v5694_v7 = vld [vmem:[%s7674_s0 + $0x1c0] sm:$0xff]  ;;  %v5700_v28 = vld [vmem:[%s7674_s0 + $0x1c8] sm:$0xff] }
 0x12a   :  { %v8283_v0 = vsub.f32 %v8281_v1, %v8282_v12  ;;  %v8285_v20 = vsub.f32 %v8284_v46, %v8282_v12  ;;  %v8287_v56 = vsub.f32 %v8286_v34, %v8282_v12  ;;  %v5687_v59 = vmin.f32 %v1376_v11, %v1293_v58  ;;  %v5706_v11 = vld [vmem:[%s7674_s0 + $0x1d0] sm:$0xff] }
 0x12b   :  { %v1753_v23 = vsub.f32 %v5694_v7, %v1691_v3  ;;  %v8290_v15 = vmax.f32 %v5523_v61, %v5537_v63  ;;  %v8291_v26 = vmax.f32 %v5528_v44, %v5541_v45  ;;  %v1961_v6 = vadd.f32 %v8281_v1, %v5597_v5 }
 0x12c   :  { %v5677_v50 = vmin.f32 %v870_v55, %v8283_v0  ;;  %v892_v17 = vmin.f32 %v891_v37, %v8285_v20  ;;  %v5685_v29 = vmin.f32 %v912_v53, %v8287_v56  ;;  %v1754_v55 = vsub.f32 %v5700_v28, %v1691_v3  ;;  %v8288_v53 = vld [vmem:[#allocation5_spill] sm:$0xff] }
 0x12d   :  { %v1755_v37 = vsub.f32 %v5706_v11, %v1691_v3  ;;  %v8289_v58 = vsub.f32 %v8288_v53, %v8282_v12  ;;  %v5717_v52 = vmax.f32 %v8290_v15, %v1055_v2  ;;  %v5722_v38 = vmax.f32 %v8291_v26, %v1056_v40  ;;  %3206 = vset.pattern.permute.xlu1 %v8011_v42  ;;  %v5743_v2 = vpop.permute.xlu1 %788 }
 0x12e   :  { %v1962_v0 = vadd.f32 %v8284_v46, %v5597_v5  ;;  %v8293_v61 = vmax.f32 %v5532_v16, %v5552_v25  ;;  %v1963_v44 = vadd.f32 %v8286_v34, %v5597_v5  ;;  %v1964_v45 = vadd.f32 %v8288_v53, %v5597_v5 }
 0x12f   :  { %v5712_v9 = vmin.f32 %v933_v31, %v8289_v58  ;;  %v8292_v31 = vmax.f32 %v5530_v22, %v5545_v27  ;;  %v3472_v22 = vld [vmem:[%s7672_s3 + $0x48] sm:$0xff]  ;;  %v8294_v25 = vrot.slane %v8263_v30, 2  ;;  %v8296_v40 = vrot.slane %v8265_v48, 6  ;;  %v8307_v30 = vld [vmem:[#allocation34_spill] sm:$0xff] }
 0x130   :  { %v5736_v63 = vmax.f32 %v8293_v61, %v1058_v35  ;;  %1431 = vperm.xlu1 %3206, %v3472_v22   ;;  %v3473_v35 = vld [vmem:[%s7674_s0 + $0x1d8] sm:$0xff]  ;;  %v1774_v56 = vmin.f32 %v1773_v57, %v1753_v23  ;;  %v1795_v58 = vmin.f32 %v1794_v41, %v1754_v55  ;;  %v1816_v15 = vmin.f32 %v1815_v54, %v1755_v37  ;;  %v8300_v23 = vld [vmem:[#allocation75_spill] sm:$0xff] }
 0x131   :  { %v5731_v12 = vmax.f32 %v8292_v31, %v1057_v24  ;;  %v5756_v5 = vpack.i.bf16 %v8294_v25, %v7865_v10  ;;  %v5761_v24 = vpack.i.bf16 %v8296_v40, %v8265_v48  ;;  %v1756_v20 = vsub.f32 %v3473_v35, %v1691_v3  ;;  %v5772_v40 = vpop.permute.xlu0 %1451  ;;  %v8299_v3 = vld [vmem:[#allocation48_spill] sm:$0xff]  ;;  %v8306_v48 = vld [vmem:[#allocation37_spill] sm:$0xff] }
 0x132   :  { %v1985_v26 = vmax.f32 %v5556_v32, %v1961_v6  ;;  %v2006_v31 = vmax.f32 %v5559_v13, %v1962_v0  ;;  %v852_v61 = vsub.f32 %v5700_v28, %v5743_v2  ;;  %8298 = vst [vmem:[#allocation57_spill] sm:$0xff] %v5772_v40  ;;  %v2027_v10 = vmax.f32 %v5562_v60, %v1963_v44  ;;  %v1001_v60 = vpop.permute.xlu1 %1000  ;;  %v8302_v6 = vld [vmem:[#allocation44_spill] sm:$0xff] }
 0x133   :  { %8295 = vst [vmem:[#allocation28_spill] sm:$0xff] %v5756_v5  ;;  %8297 = vst [vmem:[#allocation26_spill] sm:$0xff] %v5761_v24  ;;  %v2048_v27 = vmax.f32 %v5579_v8, %v1964_v45  ;;  %v5778_v41 = vadd.f32 %v8281_v1, %v5619_v39  ;;  %v1060_v32 = vadd.f32 %v8284_v46, %v5619_v39  ;;  %v8304_v45 = vld [vmem:[#allocation53_spill] sm:$0xff] }
 0x134   :  { %v5784_v13 = vadd.f32 %v8286_v34, %v5619_v39  ;;  %v1062_v57 = vadd.f32 %v8288_v53, %v5619_v39  ;;  %v851_v54 = vsub.f32 %v5694_v7, %v5743_v2  ;;  %3207 = vset.pattern.permute.xlu1 %v8062_v51  ;;  %v8301_v55 = vsub.f32 %v8299_v3, %v8300_v23 }
 0x135   :  { %v8303_v0 = vsub.f32 %v8302_v6, %v8300_v23  ;;  %v8305_v39 = vsub.f32 %v8304_v45, %v8300_v23  ;;  %v1837_v16 = vmin.f32 %v1836_v21, %v1756_v20  ;;  %516 = vperm.xlu1 %3207, %v3472_v22   ;;  %v853_v40 = vsub.f32 %v5706_v11, %v5743_v2 }
 0x136   :  { %v1775_v37 = vmin.f32 %v1774_v56, %v8301_v55  ;;  %v893_v18 = vmin.f32 %v892_v17, %v852_v61  ;;  %v5805_v8 = vmax.f32 %v1985_v26, %v8306_v48  ;;  %v2007_v3 = vmax.f32 %v2006_v31, %v8307_v30  ;;  %v8308_v55 = vld [vmem:[#allocation4_spill] sm:$0xff]  ;;  %v5820_v30 = vpop.permute.xlu0 %1243 }
 0x137   :  { %v1796_v44 = vmin.f32 %v1795_v58, %v8303_v0  ;;  %v1817_v25 = vmin.f32 %v1816_v15, %v8305_v39  ;;  %v1104_v58 = vmax.f32 %v5722_v38, %v1060_v32  ;;  %v5812_v6 = vmax.f32 %v2027_v10, %v8308_v55  ;;  %v8309_v15 = vld [vmem:[#allocation56_spill] sm:$0xff]  ;;  %v8310_v38 = vld [vmem:[#allocation50_spill] sm:$0xff]  ;;  %v1907_v0 = vpop.permute.xlu1 %1906 }
 0x138   :  { %v2049_v21 = vmax.f32 %v2048_v27, %v8309_v15  ;;  %v1125_v22 = vmax.f32 %v5731_v12, %v5784_v13  ;;  %v1146_v17 = vmax.f32 %v5736_v63, %v1062_v57  ;;  %v854_v48 = vsub.f32 %v3473_v35, %v5743_v2  ;;  %v8312_v27 = vld [vmem:[#allocation9_spill] sm:$0xff]  ;;  %v8313_v12 = vld [vmem:[#allocation78_spill] sm:$0xff] }
 0x139   :  { %v872_v20 = vmin.f32 %v5677_v50, %v851_v54  ;;  %v1776_v26 = vrot.slane %v1775_v37, 4  ;;  %v1797_v31 = vrot.slane %v1796_v44, 4  ;;  %v1818_v61 = vrot.slane %v1817_v25, 4  ;;  %3208 = vset.pattern.permute.xlu1 %v8011_v42  ;;  %v3474_v54 = vld [vmem:[%s7673_s2 + $0x50] sm:$0xff] }
 0x13a   :  { %v8311_v10 = vsub.f32 %v8310_v38, %v8300_v23  ;;  %v8314_v13 = vsub.f32 %v8312_v27, %v8313_v12  ;;  %v914_v2 = vmin.f32 %v5685_v29, %v853_v40  ;;  %v1064_v50 = vadd.f32 %v5700_v28, %v1001_v60  ;;  %1223 = vperm.xlu1 %3208, %v3474_v54   ;;  %v8318_v38 = vld [vmem:[#allocation74_spill] sm:$0xff] }
 0x13b   :  { %v1970_v57 = vadd.f32 %v8312_v27, %v1907_v0  ;;  %v1066_v23 = vadd.f32 %v3473_v35, %v1001_v60  ;;  %v935_v40 = vmin.f32 %v5712_v9, %v854_v48  ;;  %v5847_v35 = vmin.f32 %v1775_v37, %v1776_v26  ;;  %v1005_v9 = vpop.permute.xlu1 %1004 }
 0x13c   :  { %v1838_v32 = vmin.f32 %v1837_v16, %v8311_v10  ;;  %v894_v63 = vmin.f32 %v893_v18, %v8314_v13  ;;  %v8315_v16 = vld [vmem:[#allocation51_spill] sm:$0xff]  ;;  %v8316_v18 = vld [vmem:[#allocation61_spill] sm:$0xff]  ;;  %v5849_v13 = vmin.f32 %v1796_v44, %v1797_v31  ;;  %v5851_v45 = vmin.f32 %v1817_v25, %v1818_v61 }
 0x13d   :  { %v8317_v29 = vsub.f32 %v8315_v16, %v8313_v12  ;;  %v2008_v15 = vmax.f32 %v2007_v3, %v1970_v57  ;;  %v8320_v55 = vsub.f32 %v8316_v18, %v8313_v12  ;;  %v1105_v49 = vmax.f32 %v1104_v58, %v1064_v50 }
 0x13e   :  { %8319 = vst [vmem:[#allocation52_spill] sm:$0xff] %v5851_v45  ;;  %v1839_v39 = vrot.slane %v1838_v32, 4  ;;  %v895_v56 = vrot.slane %v894_v63, 4  ;;  %3209 = vset.pattern.permute.xlu1 %v8062_v51  ;;  %v1147_v3 = vmax.f32 %v1146_v17, %v1066_v23  ;;  %v1068_v37 = vadd.f32 %v8312_v27, %v1005_v9 }
 0x13f   :  { %v873_v28 = vmin.f32 %v872_v20, %v8317_v29  ;;  %v915_v47 = vmin.f32 %v914_v2, %v8320_v55  ;;  %v1972_v20 = vadd.f32 %v8318_v38, %v1907_v0  ;;  %v2009_v48 = vrot.slane %v2008_v15, 4  ;;  %293 = vperm.xlu1 %3209, %v3474_v54  }
 0x140   :  { %v1070_v44 = vadd.f32 %v8318_v38, %v1005_v9  ;;  %v8321_v26 = vsub.f32 %v8318_v38, %v8313_v12  ;;  %v1063_v61 = vadd.f32 %v5694_v7, %v1001_v60  ;;  %v1065_v58 = vadd.f32 %v5706_v11, %v1001_v60  ;;  %v3475_v7 = vld [vmem:[%s7672_s3 + $0x50] sm:$0xff]  ;;  %v5874_v11 = vpop.permute.xlu1 %1183 }
 0x141   :  { %v874_v25 = vrot.slane %v873_v28, 4  ;;  %v1969_v2 = vadd.f32 %v8315_v16, %v1907_v0  ;;  %v1971_v50 = vadd.f32 %v8316_v18, %v1907_v0  ;;  %v1106_v17 = vmax.f32 %v1105_v49, %v1068_v37 }
 0x142   :  { %v936_v31 = vmin.f32 %v935_v40, %v8321_v26  ;;  %v1148_v57 = vmax.f32 %v1147_v3, %v1070_v44  ;;  %v916_v23 = vrot.slane %v915_v47, 4  ;;  %v2050_v55 = vmax.f32 %v2049_v21, %v1972_v20 }
 0x143   :  { %v1067_v29 = vadd.f32 %v8315_v16, %v1005_v9  ;;  %v1069_v54 = vadd.f32 %v8316_v18, %v1005_v9  ;;  %v5869_v10 = vmin.f32 %v1838_v32, %v1839_v39  ;;  %v896_v12 = vmin.f32 %v894_v63, %v895_v56  ;;  %521 = vperm.xlu1 %3209, %v3475_v7   ;;  %v5883_v39 = vpop.permute.xlu0 %243 }
 0x144   :  { %v2010_v40 = vmax.f32 %v2008_v15, %v2009_v48  ;;  %v1107_v26 = vrot.slane %v1106_v17, 4  ;;  %v937_v49 = vrot.slane %v936_v31, 4  ;;  %v8322_v60 = vmax.f32 %v5717_v52, %v5778_v41  ;;  %v5888_v52 = vpop.permute.xlu1 %1395 }
 0x145   :  { %v1126_v0 = vmax.f32 %v1125_v22, %v1065_v58  ;;  %v1149_v20 = vrot.slane %v1148_v57, 4  ;;  %v5879_v9 = vmin.f32 %v873_v28, %v874_v25  ;;  %v1987_v56 = vmax.f32 %v5805_v8, %v1969_v2 }
 0x146   :  { %v1084_v21 = vmax.f32 %v8322_v60, %v1063_v61  ;;  %v2029_v32 = vmax.f32 %v5812_v6, %v1971_v50  ;;  %v1108_v63 = vmax.f32 %v1106_v17, %v1107_v26  ;;  %v5885_v15 = vmin.f32 %v915_v47, %v916_v23  ;;  %v3476_v6 = vld [vmem:[%s7672_s3 + $0x58] sm:$0xff]  ;;  %v5897_v47 = vld [vmem:[%s7674_s0] sm:$0xff]  ;;  %v5904_v61 = vld [vmem:[%s7674_s0 + $0x8] sm:$0xff] }
 0x147   :  { %v2051_v3 = vrot.slane %v2050_v55, 4  ;;  %v1127_v37 = vmax.f32 %v1126_v0, %v1069_v54  ;;  %v2011_v44 = vrot.slane %v2010_v40, 2  ;;  %3210 = vset.pattern.permute.xlu1 %v8011_v42  ;;  %v897_v41 = vrot.slane %v896_v12, 2  ;;  %v5911_v50 = vld [vmem:[%s7674_s0 + $0x10] sm:$0xff] }
 0x148   :  { %8323 = vst [vmem:[#allocation27_spill] sm:$0xff] %v5885_v15  ;;  %v1085_v48 = vmax.f32 %v1084_v21, %v1067_v29  ;;  %v1109_v7 = vrot.slane %v1108_v63, 2  ;;  %v1799_v22 = vrot.slane %v5849_v13, 2  ;;  %v938_v8 = vmin.f32 %v936_v31, %v937_v49  ;;  %1439 = vperm.xlu1 %3210, %v3476_v6   ;;  %v5926_v60 = vpop.permute.xlu1 %1399  ;;  %v5929_v31 = vpop.permute.xlu0 %476 }
 0x149   :  { %v1150_v28 = vmax.f32 %v1148_v57, %v1149_v20  ;;  %v1988_v58 = vrot.slane %v1987_v56, 4  ;;  %v2030_v2 = vrot.slane %v2029_v32, 4  ;;  %v5918_v57 = vld [vmem:[%s7674_s0 + $0x18] sm:$0xff]  ;;  %v5922_v29 = vmax.f32 %v2050_v55, %v2051_v3 }
 0x14a   :  { %v1086_v54 = vrot.slane %v1085_v48, 4  ;;  %v1128_v26 = vrot.slane %v1127_v37, 4  ;;  %v1246_v49 = vsub.f32 %v5897_v47, %v5874_v11  ;;  %v898_v21 = vmin.f32 %v896_v12, %v897_v41 }
 0x14b   :  { %v1110_v0 = vmax.f32 %v1108_v63, %v1109_v7  ;;  %v1800_v20 = vmin.f32 %v5849_v13, %v1799_v22  ;;  %v2012_v17 = vmax.f32 %v2010_v40, %v2011_v44  ;;  %v1151_v25 = vrot.slane %v1150_v28, 2  ;;  %v8324_v22 = vld [vmem:[#allocation31_spill] sm:$0xff] }
 0x14c   :  { %v1247_v23 = vsub.f32 %v5904_v61, %v5874_v11  ;;  %v1248_v55 = vsub.f32 %v5911_v50, %v5874_v11  ;;  %v1249_v3 = vsub.f32 %v5918_v57, %v5874_v11  ;;  %3211 = vset.pattern.permute.xlu1 %v8062_v51  ;;  %v899_v12 = vrot.slane %v898_v21, 1  ;;  %v5950_v45 = vpop.permute.xlu1 %248 }
 0x14d   :  { %526 = vperm.xlu1 %3211, %v3476_v6   ;;  %v1111_v63 = vrot.slane %v1110_v0, 1  ;;  %v1801_v7 = vrot.slane %v1800_v20, 1  ;;  %v2013_v13 = vrot.slane %v2012_v17, 1  ;;  %v5938_v40 = vmax.f32 %v1987_v56, %v1988_v58 }
 0x14e   :  { %v5940_v44 = vmax.f32 %v2029_v32, %v2030_v2  ;;  %v2053_v41 = vrot.slane %v5922_v29, 2  ;;  %v5945_v24 = vadd.f32 %v8324_v22, %v5929_v31  ;;  %v5947_v5 = vmax.f32 %v1085_v48, %v1086_v54 }
 0x14f   :  { %v1315_v11 = vmin.f32 %v5663_v36, %v1246_v49  ;;  %v1112_v15 = vmax.f32 %v1110_v0, %v1111_v63  ;;  %v2014_v6 = vmax.f32 %v2012_v17, %v2013_v13  ;;  %v900_v33 = vmin.f32 %v898_v21, %v899_v12  ;;  %v3481_v36 = vld [vmem:[%s7673_s2 + $0x60] sm:$0xff] }
 0x150   :  { %8325 = vst [vmem:[#allocation25_spill] sm:$0xff] %v5945_v24  ;;  %v1802_v62 = vmin.f32 %v1800_v20, %v1801_v7  ;;  %v939_v56 = vrot.slane %v938_v8, 2  ;;  %v1152_v58 = vmax.f32 %v1150_v28, %v1151_v25  ;;  %v5952_v32 = vmax.f32 %v1127_v37, %v1128_v26 }
 0x151   :  { %v1336_v2 = vmin.f32 %v5670_v43, %v1247_v23  ;;  %v1357_v14 = vmin.f32 %v5672_v4, %v1248_v55  ;;  %v1378_v24 = vmin.f32 %v5687_v59, %v1249_v3  ;;  %3212 = vset.pattern.permute.xlu1 %v8011_v42  ;;  %v5961_v48 = vsub.f32 %v900_v33, %v1112_v15  ;;  %v8328_v59 = vld [vmem:[#allocation76_spill] sm:$0xff]  ;;  %v472_v33 = vpop.permute.xlu1 %471 }
 0x152   :  { %1231 = vperm.xlu1 %3212, %v3481_v36   ;;  %v5963_v17 = vsub.f32 %v1802_v62, %v2014_v6  ;;  %v940_v28 = vmin.f32 %v938_v8, %v939_v56  ;;  %v1153_v37 = vrot.slane %v1152_v58, 1  ;;  %v1990_v25 = vrot.slane %v5938_v40, 2  ;;  %v8334_v6 = vld [vmem:[#allocation13_spill] sm:$0xff] }
 0x153   :  { %8326 = vst [vmem:[#allocation69_spill] sm:$0xff] %v5961_v48  ;;  %v2032_v43 = vrot.slane %v5940_v44, 2  ;;  %v1088_v4 = vrot.slane %v5947_v5, 2  ;;  %v5970_v23 = vadd.f32 %v8328_v59, %v5929_v31  ;;  %v8329_v54 = vsub.f32 %v8281_v1, %v5689_v19 }
 0x154   :  { %8327 = vst [vmem:[#allocation3_spill] sm:$0xff] %v5963_v17  ;;  %v3226_v62 = vpack.i.bf16 %v5961_v48, %v5963_v17  ;;  %v941_v15 = vrot.slane %v940_v28, 1  ;;  %v1841_v8 = vrot.slane %v5869_v10, 2  ;;  %v8330_v49 = vsub.f32 %v8284_v46, %v5689_v19  ;;  %v6740_v48 = vld [vmem:[%s7674_s0 + $0x198] sm:$0xff] }
 0x155   :  { %v1316_v26 = vmin.f32 %v1315_v11, %v8329_v54  ;;  %v8331_v0 = vsub.f32 %v8286_v34, %v5689_v19  ;;  %v8332_v55 = vsub.f32 %v8288_v53, %v5689_v19  ;;  %v5989_v3 = vadd.f32 %v5897_v47, %v5888_v52  ;;  %8408 = vst [vmem:[#allocation60_spill] sm:$0xff] %v6740_v48 }
 0x156   :  { %v1337_v21 = vmin.f32 %v1336_v2, %v8330_v49  ;;  %v1130_v12 = vrot.slane %v5952_v32, 2  ;;  %3227 = vrot.lane.b32.xlu0 %v3226_v62, %s3538_s29  ;;  %3213 = vset.pattern.permute.xlu1 %v8062_v51  ;;  %v1154_v46 = vmax.f32 %v1152_v58, %v1153_v37  ;;  %v1842_v63 = vmin.f32 %v5869_v10, %v1841_v8  ;;  %v6028_v37 = vpop.permute.xlu1 %1191 }
 0x157   :  { %v1358_v20 = vmin.f32 %v1357_v14, %v8331_v0  ;;  %v1379_v1 = vmin.f32 %v1378_v24, %v8332_v55  ;;  %v2054_v14 = vmax.f32 %v5922_v29, %v2053_v41  ;;  %v5998_v34 = vadd.f32 %v5904_v61, %v5888_v52  ;;  %303 = vperm.xlu1 %3213, %v3481_v36   ;;  %v8333_v41 = vld [vmem:[#allocation77_spill] sm:$0xff] }
 0x158   :  { %v6002_v19 = vadd.f32 %v5911_v50, %v5888_v52  ;;  %v6006_v53 = vadd.f32 %v5918_v57, %v5888_v52  ;;  %v6010_v24 = vadd.f32 %v8324_v22, %v5926_v60  ;;  %v6014_v10 = vadd.f32 %v8328_v59, %v5926_v60 }
 0x159   :  { %v942_v29 = vmin.f32 %v940_v28, %v941_v15  ;;  %v1843_v7 = vrot.slane %v1842_v63, 1  ;;  %v2055_v13 = vrot.slane %v2054_v14, 1  ;;  %v1464_v11 = vadd.f32 %v8333_v41, %v5926_v60 }
 0x15a   :  { %v6020_v56 = vadd.f32 %v8334_v6, %v5926_v60  ;;  %v8335_v52 = vsub.f32 %v8315_v16, %v5820_v30  ;;  %v8336_v2 = vsub.f32 %v8312_v27, %v5820_v30  ;;  %v8337_v28 = vsub.f32 %v8316_v18, %v5820_v30  ;;  %v3482_v18 = vld [vmem:[%s7672_s3 + $0x60] sm:$0xff] }
 0x15b   :  { %v6033_v62 = vsub.f32 %v942_v29, %v1154_v46  ;;  %v1844_v15 = vmin.f32 %v1842_v63, %v1843_v7  ;;  %v2056_v8 = vmax.f32 %v2054_v14, %v2055_v13  ;;  %v8339_v60 = vsub.f32 %v8318_v38, %v5820_v30  ;;  %531 = vperm.xlu1 %3213, %v3482_v18   ;;  %v6079_v63 = vpop.permute.xlu1 %253  ;;  %v8350_v18 = vld [vmem:[#allocation29_spill] sm:$0xff] }
 0x15c   :  { %v1317_v58 = vmin.f32 %v1316_v26, %v8335_v52  ;;  %v1338_v36 = vmin.f32 %v1337_v21, %v8336_v2  ;;  %v1359_v54 = vmin.f32 %v1358_v20, %v8337_v28  ;;  %v325_v16 = vsub.f32 %v8324_v22, %v5950_v45  ;;  %v8347_v2 = vld [vmem:[#allocation20_spill] sm:$0xff] }
 0x15d   :  { %8338 = vst [vmem:[#allocation30_spill] sm:$0xff] %v6033_v62  ;;  %v6038_v49 = vmin.f32 %v1379_v1, %v8339_v60  ;;  %v326_v27 = vsub.f32 %v8328_v59, %v5950_v45  ;;  %v327_v26 = vsub.f32 %v8333_v41, %v5950_v45  ;;  %v1522_v21 = vmax.f32 %v5989_v3, %v6010_v24 }
 0x15e   :  { %v328_v38 = vsub.f32 %v8334_v6, %v5950_v45  ;;  %v6055_v22 = vsub.f32 %v1844_v15, %v2056_v8  ;;  %v1564_v59 = vmax.f32 %v6002_v19, %v1464_v11  ;;  %v1585_v0 = vmax.f32 %v6006_v53, %v6020_v56  ;;  %v8346_v56 = vld [vmem:[#allocation58_spill] sm:$0xff] }
 0x15f   :  { %v6061_v20 = vadd.f32 %v5897_v47, %v472_v33  ;;  %v6064_v55 = vadd.f32 %v5904_v61, %v472_v33  ;;  %v6067_v1 = vadd.f32 %v5911_v50, %v472_v33  ;;  %v6071_v3 = vadd.f32 %v8333_v41, %v5929_v31  ;;  %3214 = vset.pattern.permute.xlu1 %v8011_v42  ;;  %v8348_v8 = vld [vmem:[#allocation54_spill] sm:$0xff] }
 0x160   :  { %8340 = vst [vmem:[#allocation70_spill] sm:$0xff] %v6055_v22  ;;  %v6075_v45 = vadd.f32 %v8334_v6, %v5929_v31  ;;  %v3236_v46 = vpack.i.bf16 %v6033_v62, %v6055_v22  ;;  %v8341_v14 = vsub.f32 %v5897_v47, %v5883_v39  ;;  %v8342_v53 = vsub.f32 %v5904_v61, %v5883_v39  ;;  %v3483_v61 = vld [vmem:[%s7672_s3 + $0x68] sm:$0xff]  ;;  %v6713_v22 = vld [vmem:[%s7674_s0 + $0x180] sm:$0xff] }
 0x161   :  { %v8343_v29 = vsub.f32 %v5911_v50, %v5883_v39  ;;  %v6097_v7 = vadd.f32 %v5918_v57, %v472_v33  ;;  %v8344_v47 = vsub.f32 %v5918_v57, %v5883_v39  ;;  %1447 = vperm.xlu1 %3214, %v3483_v61   ;;  %v6109_v50 = vpop.permute.xlu0 %258  ;;  %v876_v41 = vrot.slane %v5879_v9, 2  ;;  %v8345_v39 = vld [vmem:[#allocation25_spill] sm:$0xff]  ;;  %8401 = vst [vmem:[#allocation33_spill] sm:$0xff] %v6713_v22  ;;  %v8402_v62 = vld [vmem:[#allocation22_spill] sm:$0xff] }
 0x162   :  { %v6084_v19 = vmin.f32 %v8341_v14, %v325_v16  ;;  %v6089_v24 = vmin.f32 %v8342_v53, %v326_v27  ;;  %3237 = vrot.lane.b32.xlu0 %v3236_v46, %s3538_s29  ;;  %v1778_v33 = vrot.slane %v5847_v35, 2  ;;  %v1991_v11 = vmax.f32 %v5938_v40, %v1990_v25  ;;  %v482_v16 = vpop.permute.xlu1 %481  ;;  %v8353_v46 = vld [vmem:[#allocation66_spill] sm:$0xff]  ;;  %v8355_v53 = vld [vmem:[#allocation36_spill] sm:$0xff] }
 0x163   :  { %v6094_v31 = vmin.f32 %v8343_v29, %v327_v26  ;;  %v6103_v13 = vmin.f32 %v8344_v47, %v328_v38  ;;  %v613_v57 = vmax.f32 %v6061_v20, %v8345_v39  ;;  %v634_v6 = vmax.f32 %v6064_v55, %v5970_v23  ;;  %v8349_v23 = vld [vmem:[#allocation42_spill] sm:$0xff]  ;;  %v8356_v29 = vld [vmem:[#allocation49_spill] sm:$0xff] }
 0x164   :  { %v1254_v52 = vsub.f32 %v8346_v56, %v6028_v37  ;;  %v1255_v28 = vsub.f32 %v8347_v2, %v6028_v37  ;;  %v655_v15 = vmax.f32 %v6067_v1, %v6071_v3  ;;  %v1256_v60 = vsub.f32 %v8348_v8, %v6028_v37  ;;  %v8351_v20 = vld [vmem:[#allocation10_spill] sm:$0xff] }
 0x165   :  { %v1779_v40 = vmin.f32 %v5847_v35, %v1778_v33  ;;  %v1992_v25 = vrot.slane %v1991_v11, 1  ;;  %v676_v27 = vmax.f32 %v6097_v7, %v6075_v45  ;;  %v8352_v1 = vld [vmem:[#allocation14_spill] sm:$0xff]  ;;  %v6144_v45 = vmax.f32 %v1522_v21, %v8355_v53  ;;  %3215 = vset.pattern.permute.xlu1 %v8062_v51  ;;  %v8357_v21 = vld [vmem:[#allocation63_spill] sm:$0xff] }
 0x166   :  { %v1257_v3 = vsub.f32 %v8352_v1, %v6028_v37  ;;  %3247 = vrot.lane.b32.xlu0 %v8353_v46, %s3538_s29  ;;  %v8354_v35 = vld [vmem:[#allocation6_spill] sm:$0xff]  ;;  %v1565_v7 = vmax.f32 %v1564_v59, %v8356_v29  ;;  %v6147_v47 = vmin.f32 %v1317_v58, %v1254_v52  ;;  %v6149_v33 = vmin.f32 %v1338_v36, %v1255_v28  ;;  %v6162_v52 = vpop.permute.xlu1 %1407  ;;  %v8360_v29 = vld [vmem:[#allocation52_spill] sm:$0xff] }
 0x167   :  { %v1780_v39 = vrot.slane %v1779_v40, 1  ;;  %v1993_v30 = vmax.f32 %v1991_v11, %v1992_v25  ;;  %v6152_v37 = vmin.f32 %v1359_v54, %v1256_v60  ;;  %v329_v46 = vsub.f32 %v8346_v56, %v6079_v63  ;;  %536 = vperm.xlu1 %3215, %v3483_v61   ;;  %v8358_v54 = vld [vmem:[#allocation16_spill] sm:$0xff] }
 0x168   :  { %v330_v14 = vsub.f32 %v8347_v2, %v6079_v63  ;;  %v1586_v53 = vmax.f32 %v1585_v0, %v8357_v21  ;;  %v557_v58 = vadd.f32 %v8346_v56, %v482_v16  ;;  %v558_v36 = vadd.f32 %v8347_v2, %v482_v16  ;;  %v3484_v0 = vld [vmem:[%s7674_s0 + $0x70] sm:$0xff]  ;;  %v3485_v56 = vld [vmem:[%s7674_s0 + $0x78] sm:$0xff]  ;;  %v8366_v21 = vld [vmem:[#allocation11_spill] sm:$0xff] }
 0x169   :  { %v559_v59 = vadd.f32 %v8348_v8, %v482_v16  ;;  %v1781_v11 = vmin.f32 %v1779_v40, %v1780_v39  ;;  %v560_v28 = vadd.f32 %v8352_v1, %v482_v16  ;;  %v6169_v60 = vadd.f32 %v8349_v23, %v6162_v52 }
 0x16a   :  { %3257 = vrot.lane.b32.xlu0 %v8358_v54, %s3538_s29  ;;  %v1472_v61 = vadd.f32 %v3484_v0, %v6162_v52  ;;  %v1473_v2 = vadd.f32 %v3485_v56, %v6162_v52  ;;  %v331_v40 = vsub.f32 %v8348_v8, %v6079_v63  ;;  %v332_v16 = vsub.f32 %v8352_v1, %v6079_v63  ;;  %v8361_v63 = vld [vmem:[#allocation27_spill] sm:$0xff] }
 0x16b   :  { %v6183_v25 = vsub.f32 %v1781_v11, %v1993_v30  ;;  %v1820_v39 = vrot.slane %v8360_v29, 2  ;;  %3216 = vset.pattern.permute.xlu1 %v8011_v42  ;;  %v1089_v38 = vmax.f32 %v5947_v5, %v1088_v4  ;;  %v6192_v26 = vmax.f32 %v613_v57, %v557_v58  ;;  %v3486_v30 = vld [vmem:[%s7673_s2 + $0x70] sm:$0xff]  ;;  %v487_v5 = vpop.permute.xlu1 %486 }
 0x16c   :  { %v1566_v54 = vmax.f32 %v1565_v7, %v1472_v61  ;;  %v1587_v55 = vmax.f32 %v1586_v53, %v1473_v2  ;;  %v6194_v8 = vmax.f32 %v634_v6, %v558_v36  ;;  %1239 = vperm.xlu1 %3216, %v3486_v30   ;;  %v918_v1 = vrot.slane %v8361_v63, 2  ;;  %v8362_v61 = vld [vmem:[#allocation28_spill] sm:$0xff]  ;;  %v8364_v6 = vld [vmem:[#allocation21_spill] sm:$0xff] }
 0x16d   :  { %8359 = vst [vmem:[#allocation24_spill] sm:$0xff] %v6183_v25  ;;  %v1821_v7 = vmin.f32 %v8360_v29, %v1820_v39  ;;  %v6201_v53 = vmax.f32 %v655_v15, %v559_v59  ;;  %v6203_v11 = vmax.f32 %v676_v27, %v560_v28  ;;  %v8363_v4 = vld [vmem:[#allocation64_spill] sm:$0xff]  ;;  %v6214_v36 = vadd.f32 %v8349_v23, %v487_v5 }
 0x16e   :  { %3267 = vrot.lane.b32.xlu0 %v8362_v61, %s3538_s29  ;;  %v6208_v57 = vmax.f32 %v1566_v54, %v8363_v4  ;;  %v6211_v58 = vmax.f32 %v1587_v55, %v8364_v6  ;;  %v6217_v2 = vadd.f32 %v8350_v18, %v487_v5  ;;  %v6219_v15 = vadd.f32 %v3484_v0, %v487_v5 }
 0x16f   :  { %v6221_v27 = vadd.f32 %v3485_v56, %v487_v5  ;;  %v877_v59 = vmin.f32 %v5879_v9, %v876_v41  ;;  %v1131_v28 = vmax.f32 %v5952_v32, %v1130_v12  ;;  %v1822_v55 = vrot.slane %v1821_v7, 1  ;;  %v1200_v5 = vpop.permute.xlu1 %1199  ;;  %v3488_v56 = vld [vmem:[%s7672_s3 + $0x70] sm:$0xff] }
 0x170   :  { %v2033_v29 = vmax.f32 %v5940_v44, %v2032_v43  ;;  %v615_v39 = vmax.f32 %v6192_v26, %v6214_v36  ;;  %v636_v0 = vmax.f32 %v6194_v8, %v6217_v2  ;;  %3217 = vset.pattern.permute.xlu1 %v8062_v51  ;;  %v1381_v32 = vmin.f32 %v6038_v49, %v1257_v3  ;;  %v8365_v43 = vld [vmem:[#allocation26_spill] sm:$0xff]  ;;  %v3487_v49 = vld [vmem:[%s7674_s0 + $0x88] sm:$0xff] }
 0x171   :  { %v386_v12 = vmin.f32 %v6084_v19, %v329_v46  ;;  %v407_v44 = vmin.f32 %v6089_v24, %v330_v14  ;;  %313 = vperm.xlu1 %3217, %v3486_v30   ;;  %v428_v54 = vmin.f32 %v6094_v31, %v331_v40  ;;  %v449_v61 = vmin.f32 %v6103_v13, %v332_v16  ;;  %v8367_v24 = vld [vmem:[#allocation43_spill] sm:$0xff]  ;;  %v8368_v14 = vld [vmem:[#allocation2_spill] sm:$0xff] }
 0x172   :  { %3277 = vrot.lane.b32.xlu0 %v8365_v43, %s3538_s29  ;;  %v2034_v41 = vrot.slane %v2033_v29, 1  ;;  %v1090_v4 = vrot.slane %v1089_v38, 1  ;;  %v919_v6 = vmin.f32 %v8361_v63, %v918_v1  ;;  %v1262_v9 = vsub.f32 %v8366_v21, %v1200_v5  ;;  %v8385_v26 = vld [vmem:[#allocation18_spill] sm:$0xff] }
 0x173   :  { %v1263_v19 = vsub.f32 %v3487_v49, %v1200_v5  ;;  %v1264_v3 = vsub.f32 %v8367_v24, %v1200_v5  ;;  %v1265_v46 = vsub.f32 %v8368_v14, %v1200_v5  ;;  %v878_v30 = vrot.slane %v877_v59, 1  ;;  %v264_v5 = vpop.permute.xlu1 %263  ;;  %v6376_v2 = vld [vmem:[%s7674_s0 + $0xa0] sm:$0xff] }
 0x174   :  { %v1132_v43 = vrot.slane %v1131_v28, 1  ;;  %v1823_v31 = vmin.f32 %v1821_v7, %v1822_v55  ;;  %v2035_v40 = vmax.f32 %v2033_v29, %v2034_v41  ;;  %v6256_v13 = vmin.f32 %v6147_v47, %v1262_v9 }
 0x175   :  { %v6259_v16 = vmin.f32 %v6149_v33, %v1263_v19  ;;  %v6262_v63 = vmin.f32 %v6152_v37, %v1264_v3  ;;  %v6264_v1 = vmin.f32 %v1381_v32, %v1265_v46  ;;  %541 = vperm.xlu1 %3217, %v3488_v56   ;;  %v8369_v7 = vsub.f32 %v8349_v23, %v6109_v50 }
 0x176   :  { %v8370_v47 = vsub.f32 %v8350_v18, %v6109_v50  ;;  %v8371_v33 = vsub.f32 %v8351_v20, %v6109_v50  ;;  %v6278_v9 = vsub.f32 %v1823_v31, %v2035_v40  ;;  %v8373_v32 = vsub.f32 %v8354_v35, %v6109_v50 }
 0x177   :  { %v387_v55 = vmin.f32 %v386_v12, %v8369_v7  ;;  %v1471_v56 = vadd.f32 %v8350_v18, %v6162_v52  ;;  %v1091_v23 = vmax.f32 %v1089_v38, %v1090_v4  ;;  %v920_v12 = vrot.slane %v919_v6, 1  ;;  %v8376_v18 = vld [vmem:[#allocation15_spill] sm:$0xff]  ;;  %v3489_v7 = vld [vmem:[%s7672_s3 + $0x78] sm:$0xff] }
 0x178   :  { %v408_v29 = vmin.f32 %v407_v44, %v8370_v47  ;;  %v429_v37 = vmin.f32 %v428_v54, %v8371_v33  ;;  %8372 = vst [vmem:[#allocation38_spill] sm:$0xff] %v6278_v9  ;;  %v450_v41 = vmin.f32 %v449_v61, %v8373_v32  ;;  %v337_v19 = vsub.f32 %v8366_v21, %v264_v5  ;;  %v8374_v54 = vld [vmem:[#allocation32_spill] sm:$0xff] }
 0x179   :  { %v338_v3 = vsub.f32 %v3487_v49, %v264_v5  ;;  %v339_v44 = vsub.f32 %v8367_v24, %v264_v5  ;;  %v340_v20 = vsub.f32 %v8368_v14, %v264_v5  ;;  %v8375_v46 = vmax.f32 %v5998_v34, %v6014_v10  ;;  %3219 = vset.pattern.permute.xlu1 %v8011_v42  ;;  %v8377_v34 = vld [vmem:[#allocation19_spill] sm:$0xff]  ;;  %v6309_v42 = vld [vmem:[%s7674_s0 + $0xd0] sm:$0xff] }
 0x17a   :  { %v879_v50 = vmin.f32 %v877_v59, %v878_v30  ;;  %v1133_v35 = vmax.f32 %v1131_v28, %v1132_v43  ;;  %v7877_v52 = vrot.slane %v8376_v18, 2  ;;  %v6294_v38 = vmin.f32 %v387_v55, %v337_v19  ;;  %1455 = vperm.xlu1 %3219, %v3489_v7   ;;  %v8378_v59 = vld [vmem:[#allocation79_spill] sm:$0xff]  ;;  %v6316_v30 = vld [vmem:[%s7674_s0 + $0xd8] sm:$0xff]  ;;  %v492_v55 = vpop.permute.xlu1 %491  ;;  %v8379_v47 = vld [vmem:[#allocation8_spill] sm:$0xff] }
 0x17b   :  { %v1544_v31 = vmax.f32 %v8375_v46, %v8374_v54  ;;  %v6296_v61 = vmin.f32 %v408_v29, %v338_v3  ;;  %v6298_v4 = vmin.f32 %v429_v37, %v339_v44  ;;  %v6300_v40 = vmin.f32 %v450_v41, %v340_v20 }
 0x17c   :  { %v1475_v10 = vadd.f32 %v3487_v49, %v8377_v34  ;;  %v1484_v28 = vadd.f32 %v6309_v42, %v8378_v59  ;;  %v1485_v43 = vadd.f32 %v6316_v30, %v8378_v59  ;;  %v7878_v29 = vrot.slane %v8379_v47, 6 }
 0x17d   :  { %v1545_v33 = vmax.f32 %v1544_v31, %v1471_v56  ;;  %v6321_v37 = vsub.f32 %v879_v50, %v1091_v23  ;;  %v921_v32 = vmin.f32 %v919_v6, %v920_v12  ;;  %v7876_v41 = vrot.slane %v8376_v18, 4  ;;  %v8382_v23 = vld [vmem:[#allocation46_spill] sm:$0xff]  ;;  %v3495_v31 = vld [vmem:[%s7674_s0 + $0xb8] sm:$0xff] }
 0x17e   :  { %v565_v5 = vadd.f32 %v8366_v21, %v492_v55  ;;  %v566_v19 = vadd.f32 %v3487_v49, %v492_v55  ;;  %v567_v3 = vadd.f32 %v8367_v24, %v492_v55  ;;  %v568_v44 = vadd.f32 %v8368_v14, %v492_v55  ;;  %3220 = vset.pattern.permute.xlu1 %v8062_v51  ;;  %v1416_v46 = vpop.permute.xlu1 %1415 }
 0x17f   :  { %8380 = vst [vmem:[#allocation35_spill] sm:$0xff] %v6321_v37  ;;  %v6328_v20 = vsub.f32 %v921_v32, %v1133_v35  ;;  %v6333_v56 = vpack.i.bf16 %v8376_v18, %v7877_v52  ;;  %v7888_v6 = vrot.slane %v8382_v23, 4  ;;  %v7887_v12 = vrot.slane %v8379_v47, 2  ;;  %546 = vperm.xlu1 %3220, %v3489_v7  }
 0x180   :  { %v6340_v21 = vmax.f32 %v615_v39, %v565_v5  ;;  %v6345_v51 = vmax.f32 %v636_v0, %v566_v19  ;;  %v8383_v49 = vmax.f32 %v6201_v53, %v6219_v15  ;;  %v8384_v14 = vmax.f32 %v6203_v11, %v6221_v27  ;;  %v3494_v27 = vld [vmem:[%s7674_s0 + $0xb0] sm:$0xff]  ;;  %v269_v19 = vpop.permute.xlu0 %268 }
 0x181   :  { %8381 = vst [vmem:[#allocation59_spill] sm:$0xff] %v6328_v20  ;;  %v8386_v36 = vmax.f32 %v6144_v45, %v6169_v60  ;;  %v6363_v8 = vmax.f32 %v1545_v33, %v1475_v10  ;;  %v3221_v53 = vpack.i.bf16 %v6321_v37, %v6183_v25  ;;  %v6371_v11 = vpack.i.bf16 %v7876_v41, %v7878_v29  ;;  %v6384_v60 = vld [vmem:[%s7674_s0 + $0xa8] sm:$0xff] }
 0x182   :  { %v6350_v24 = vmax.f32 %v8383_v49, %v567_v3  ;;  %v6355_v54 = vmax.f32 %v8384_v14, %v568_v44  ;;  %v6379_v45 = vadd.f32 %v6376_v2, %v1416_v46  ;;  %v6387_v15 = vadd.f32 %v6384_v60, %v1416_v46 }
 0x183   :  { %v6361_v39 = vmax.f32 %v8386_v36, %v8385_v26  ;;  %v1480_v0 = vadd.f32 %v3494_v27, %v1416_v46  ;;  %v1481_v50 = vadd.f32 %v3495_v31, %v1416_v46  ;;  %v3231_v35 = vpack.i.bf16 %v6328_v20, %v6278_v9  ;;  %3222 = vrot.lane.b32.xlu1 %v3221_v53, %s3538_s29  ;;  %v497_v46 = vpop.permute.xlu1 %496  ;;  %v6722_v20 = vld [vmem:[%s7674_s0 + $0x188] sm:$0xff] }
 0x184   :  { %v7893_v7 = vrot.slane %v8379_v47, 5  ;;  %v7892_v34 = vrot.slane %v8382_v23, 3  ;;  %v7879_v10 = vrot.slane %v8376_v18, 3  ;;  %v7890_v3 = vrot.slane %v8379_v47, 1  ;;  %8404 = vst [vmem:[#allocation41_spill] sm:$0xff] %v6722_v20 }
 0x185   :  { %v1526_v55 = vmax.f32 %v6361_v39, %v6379_v45  ;;  %v1568_v32 = vmax.f32 %v6208_v57, %v1480_v0  ;;  %v1589_v5 = vmax.f32 %v6211_v58, %v1481_v50  ;;  %v7886_v44 = vrot.slane %v8379_v47, 7  ;;  %v8387_v0 = vld [vmem:[#allocation40_spill] sm:$0xff] }
 0x186   :  { %v7880_v49 = vrot.slane %v8376_v18, 5  ;;  %v7882_v14 = vrot.slane %v8382_v23, 5  ;;  %v7881_v57 = vrot.slane %v8379_v47, 3  ;;  %v7884_v58 = vrot.slane %v8387_v0, 3  ;;  %v3365_v18 = vld [vmem:[%s7676_s4 + $0x60] sm:$0xff]  }
 0x187   :  { %v6411_v26 = vmax.f32 %v1568_v32, %v1484_v28  ;;  %v6413_v36 = vmax.f32 %v1589_v5, %v1485_v43  ;;  %v569_v53 = vadd.f32 %v6376_v2, %v497_v46  ;;  %v570_v50 = vadd.f32 %v6384_v60, %v497_v46  ;;  %3232 = vrot.lane.b32.xlu1 %v3231_v35, %s3538_s29 }
 0x188   :  { %v571_v41 = vadd.f32 %v3494_v27, %v497_v46  ;;  %v572_v52 = vadd.f32 %v3495_v31, %v497_v46  ;;  %v341_v29 = vsub.f32 %v6376_v2, %v269_v19  ;;  %v7891_v33 = vrot.slane %v8387_v0, 1 }
 0x189   :  { %v7883_v28 = vrot.slane %v8382_v23, 1  ;;  %v6427_v43 = vpack.i.bf16 %v7879_v10, %v7893_v7  ;;  %v617_v32 = vmax.f32 %v6340_v21, %v569_v53  ;;  %v638_v5 = vmax.f32 %v6345_v51, %v570_v50  ;;  %v3496_v50 = vld [vmem:[%s7674_s0 + $0xc0] sm:$0xff] }
 0x18a   :  { %v659_v46 = vmax.f32 %v6350_v24, %v571_v41  ;;  %v680_v2 = vmax.f32 %v6355_v54, %v572_v52  ;;  %v6437_v35 = vpack.i.bf16 %v7880_v49, %v7886_v44  ;;  %v6443_v10 = vpack.i.bf16 %v7890_v3, %v7892_v34  ;;  %v1208_v54 = vpop.permute.xlu1 %1207 }
 0x18b   :  { %8388 = vst [vmem:[#allocation72_spill] sm:$0xff] %v6427_v43  ;;  %v6449_v21 = vpack.i.bf16 %v7881_v57, %v7882_v14  ;;  %v7885_v52 = vrot.slane %v8382_v23, 7  ;;  %v342_v41 = vsub.f32 %v6384_v60, %v269_v19  ;;  %v343_v51 = vsub.f32 %v3494_v27, %v269_v19  ;;  %v3497_v57 = vld [vmem:[%s7674_s0 + $0xc8] sm:$0xff]  ;;  %3242 = vrot.lane.b32.xlu1 %v6333_v56, %s3538_s29  ;;  %v3361_v43 = vld [vmem:[%s7676_s4 + $0x50] sm:$0xff]  }
 0x18c   :  { %8389 = vst [vmem:[#allocation62_spill] sm:$0xff] %v6437_v35  ;;  %8390 = vst [vmem:[#allocation73_spill] sm:$0xff] %v6443_v10  ;;  %v344_v24 = vsub.f32 %v3495_v31, %v269_v19  ;;  %v6457_v53 = vpack.i.bf16 %v7883_v28, %v7884_v58  ;;  %v1270_v49 = vsub.f32 %v3496_v50, %v1208_v54  ;;  %v6701_v35 = vld [vmem:[%s7674_s0 + $0x158] sm:$0xff] }
 0x18d   :  { %8391 = vst [vmem:[#allocation67_spill] sm:$0xff] %v6449_v21  ;;  %v1271_v14 = vsub.f32 %v3497_v57, %v1208_v54  ;;  %v1272_v60 = vsub.f32 %v6309_v42, %v1208_v54  ;;  %v1273_v27 = vsub.f32 %v6316_v30, %v1208_v54  ;;  %v6473_v31 = vpack.i.bf16 %v7885_v52, %v7891_v33  ;;  %v8400_v21 = vld [vmem:[#allocation65_spill] sm:$0xff] }
 0x18e   :  { %8392 = vst [vmem:[#allocation55_spill] sm:$0xff] %v6457_v53  ;;  %v6476_v19 = vmin.f32 %v6256_v13, %v1270_v49  ;;  %v3261_v56 = vpack.i.bf16 %v7887_v12, %v7888_v6  ;;  %v7889_v52 = vrot.slane %v8387_v0, 2  ;;  %v389_v44 = vmin.f32 %v6294_v38, %v341_v29  ;;  %v6679_v53 = vld [vmem:[%s7674_s0 + $0x140] sm:$0xff] }
 0x18f   :  { %8393 = vst [vmem:[#allocation68_spill] sm:$0xff] %v6473_v31  ;;  %v6479_v28 = vmin.f32 %v6259_v16, %v1271_v14  ;;  %v6482_v58 = vmin.f32 %v6262_v63, %v1272_v60  ;;  %v6485_v54 = vmin.f32 %v6264_v1, %v1273_v27  ;;  %v410_v13 = vmin.f32 %v6296_v61, %v342_v41  ;;  %v274_v63 = vpop.permute.xlu1 %273 }
 0x190   :  { %v431_v16 = vmin.f32 %v6298_v4, %v343_v51  ;;  %v452_v49 = vmin.f32 %v6300_v40, %v344_v24  ;;  %3252 = vrot.lane.b32.xlu1 %v6371_v11, %s3538_s29  ;;  %v345_v1 = vsub.f32 %v3496_v50, %v274_v63  ;;  %v346_v14 = vsub.f32 %v3497_v57, %v274_v63 }
 0x191   :  { %v347_v60 = vsub.f32 %v6309_v42, %v274_v63  ;;  %v348_v27 = vsub.f32 %v6316_v30, %v274_v63  ;;  %v3271_v4 = vpack.i.bf16 %v8382_v23, %v7889_v52  ;;  %v1482_v40 = vadd.f32 %v3496_v50, %v8378_v59  ;;  %v3498_v63 = vld [vmem:[%s7674_s0 + $0x110] sm:$0xff] }
 0x192   :  { %v6500_v12 = vmin.f32 %v389_v44, %v345_v1  ;;  %v6502_v6 = vmin.f32 %v410_v13, %v346_v14  ;;  %v1483_v11 = vadd.f32 %v3497_v57, %v8378_v59  ;;  %v8394_v1 = vld [vmem:[#allocation45_spill] sm:$0xff]  ;;  %v6683_v31 = vadd.f32 %v6679_v53, %v8400_v21 }
 0x193   :  { %v432_v38 = vmin.f32 %v431_v16, %v347_v60  ;;  %v453_v61 = vmin.f32 %v452_v49, %v348_v27  ;;  %v502_v29 = vpop.permute.xlu1 %501  ;;  %v1492_v59 = vadd.f32 %v3498_v63, %v8394_v1  ;;  %v6705_v10 = vadd.f32 %v6701_v35, %v8400_v21 }
 0x194   :  { %3262 = vrot.lane.b32.xlu1 %v3261_v56, %s3538_s29  ;;  %v573_v41 = vadd.f32 %v3496_v50, %v502_v29  ;;  %v574_v51 = vadd.f32 %v3497_v57, %v502_v29  ;;  %v575_v44 = vadd.f32 %v6309_v42, %v502_v29  ;;  %v576_v24 = vadd.f32 %v6316_v30, %v502_v29 }
 0x195   :  { %v6524_v42 = vmax.f32 %v1526_v55, %v1482_v40  ;;  %v8395_v30 = vmax.f32 %v6363_v8, %v6387_v15  ;;  %v3501_v8 = vld [vmem:[%s7674_s0 + $0xf0] sm:$0xff]  ;;  %v3502_v15 = vld [vmem:[%s7674_s0 + $0xf8] sm:$0xff]  ;;  %v6717_v9 = vadd.f32 %v6713_v22, %v8402_v62  ;;  %v6744_v25 = vadd.f32 %v6740_v48, %v8402_v62 }
 0x196   :  { %v6512_v13 = vmax.f32 %v617_v32, %v573_v41  ;;  %v6514_v16 = vmax.f32 %v638_v5, %v574_v51  ;;  %v660_v49 = vmax.f32 %v659_v46, %v575_v44  ;;  %v681_v56 = vmax.f32 %v680_v2, %v576_v24  ;;  %v6534_v32 = vld [vmem:[%s7674_s0 + $0xe0] sm:$0xff]  ;;  %v6542_v46 = vld [vmem:[%s7674_s0 + $0xe8] sm:$0xff] }
 0x197   :  { %v1424_v50 = vpop.permute.xlu1 %1423  ;;  %v6529_v57 = vmax.f32 %v8395_v30, %v1483_v11  ;;  %v6574_v30 = vpop.permute.xlu0 %278  ;;  %8403 = vst [vmem:[#allocation47_spill] sm:$0xff] %v6717_v9  ;;  %8409 = vst [vmem:[#allocation5_spill] sm:$0xff] %v6744_v25  ;;  %v3364_v9 = vld [vmem:[%s7676_s4 + $0x18] sm:$0xff]  }
 0x198   :  { %3272 = vrot.lane.b32.xlu1 %v3271_v4, %s3538_s29  ;;  %v6537_v5 = vadd.f32 %v6534_v32, %v1424_v50  ;;  %v6545_v39 = vadd.f32 %v6542_v46, %v1424_v50  ;;  %v1488_v45 = vadd.f32 %v3501_v8, %v1424_v50  ;;  %v6553_v55 = vadd.f32 %v3502_v15, %v1424_v50 }
 0x199   :  { %v349_v48 = vsub.f32 %v6534_v32, %v6574_v30  ;;  %v350_v25 = vsub.f32 %v6542_v46, %v6574_v30 }
 0x19a   :  { %v1570_v60 = vmax.f32 %v6411_v26, %v1488_v45  ;;  %v6579_v45 = vld [vmem:[%s7674_s0 + $0x100] sm:$0xff] }
 0x19b   :  { %v507_v29 = vpop.permute.xlu1 %506  ;;  %v391_v47 = vmin.f32 %v6500_v12, %v349_v48  ;;  %v3367_v48 = vld [vmem:[%s7676_s4 + $0xc0] sm:$0xff]  }
 0x19c   :  { %v6562_v4 = vmax.f32 %v1570_v60, %v1492_v59  ;;  %v6565_v40 = vadd.f32 %v6534_v32, %v507_v29  ;;  %v6568_v11 = vadd.f32 %v6542_v46, %v507_v29  ;;  %v579_v41 = vadd.f32 %v3501_v8, %v507_v29  ;;  %v6791_v46 = vld [vmem:[%s7674_s0 + $0x120] sm:$0xff]  ;;  %3029 = vmatprep.subr.bf16.mxu1 %v3367_v48 }
 0x19d   :  { %v580_v51 = vadd.f32 %v3502_v15, %v507_v29  ;;  %v6585_v29 = vld [vmem:[%s7674_s0 + $0x108] sm:$0xff]  ;;  %v6870_v12 = vld [vmem:[%s7674_s0 + $0x1a0] sm:$0xff] }
 0x19e   :  { %v661_v24 = vmax.f32 %v660_v49, %v579_v41  ;;  %v3505_v49 = vld [vmem:[%s7674_s0 + $0x118] sm:$0xff]  ;;  %v351_v41 = vsub.f32 %v3501_v8, %v6574_v30  ;;  %8422 = vst [vmem:[#allocation51_spill] sm:$0xff] %v6870_v12 }
 0x19f   :  { %v682_v50 = vmax.f32 %v681_v56, %v580_v51  ;;  %v1216_v59 = vpop.permute.xlu1 %1215  ;;  %v352_v51 = vsub.f32 %v3502_v15, %v6574_v30  ;;  %v6877_v30 = vld [vmem:[%s7674_s0 + $0x1a8] sm:$0xff] }
 0x1a0   :  { %v1278_v60 = vsub.f32 %v6579_v45, %v1216_v59  ;;  %v1279_v52 = vsub.f32 %v6585_v29, %v1216_v59  ;;  %v1280_v3 = vsub.f32 %v3498_v63, %v1216_v59  ;;  %v1281_v56 = vsub.f32 %v3505_v49, %v1216_v59 }
 0x1a1   :  { %v433_v27 = vmin.f32 %v432_v38, %v351_v41  ;;  %v454_v14 = vmin.f32 %v453_v61, %v352_v51  ;;  %v6624_v38 = vld [vmem:[%s7674_s0 + $0x130] sm:$0xff] }
 0x1a2   :  { %v6594_v33 = vmin.f32 %v6476_v19, %v1278_v60  ;;  %v6597_v34 = vmin.f32 %v6479_v28, %v1279_v52  ;;  %v1363_v7 = vmin.f32 %v6482_v58, %v1280_v3  ;;  %v6601_v26 = vmin.f32 %v6485_v54, %v1281_v56 }
 0x1a3   :  { %v6603_v44 = vpop.permute.xlu1 %283 }
 0x1a4   :  { %8396 = vst [vmem:[#allocation17_spill] sm:$0xff] %v6597_v34  ;;  %8397 = vst [vmem:[#allocation23_spill] sm:$0xff] %v6601_v26  ;;  %v355_v59 = vsub.f32 %v3498_v63, %v6603_v44  ;;  %v356_v8 = vsub.f32 %v3505_v49, %v6603_v44  ;;  %v6847_v26 = vld [vmem:[%s7674_s0 + $0x170] sm:$0xff]  ;;  %v6917_v34 = vld [vmem:[%s7674_s0 + $0x1e0] sm:$0xff] }
 0x1a5   :  { %8420 = vst [vmem:[#allocation9_spill] sm:$0xff] %v6847_v26 }
 0x1a6   :  { %v6607_v15 = vmin.f32 %v433_v27, %v355_v59  ;;  %v6609_v19 = vmin.f32 %v454_v14, %v356_v8  ;;  %v6634_v27 = vpop.permute.xlu0 %288  ;;  %v3357_v59 = vld [vmem:[%s7676_s4 + $0x40] sm:$0xff]  }
 0x1a7   :  { %3007 = vmatprep.subr.bf16.mxu0 %v3357_v59  ;;  %v3360_v59 = vld [vmem:[%s7676_s4 + $0x8] sm:$0xff]  }
 0x1a8   :  { %v6611_v60 = vpop.permute.xlu1 %511 }
 0x1a9   :  { %v583_v28 = vadd.f32 %v3498_v63, %v6611_v60  ;;  %v584_v3 = vadd.f32 %v3505_v49, %v6611_v60  ;;  %v6662_v63 = vadd.f32 %v6579_v45, %v8394_v1 }
 0x1aa   :  { %v6645_v41 = vpop.permute.xlu0 %298 }
 0x1ab   :  { %v6615_v58 = vmax.f32 %v661_v24, %v583_v28  ;;  %v6617_v52 = vmax.f32 %v682_v50, %v584_v3  ;;  %v6641_v50 = vld [vmem:[%s7674_s0 + $0x150] sm:$0xff]  ;;  %8398 = vst [vmem:[#allocation39_spill] sm:$0xff] %v6645_v41  ;;  %v3358_v28 = vld [vmem:[%s7676_s4] sm:$0xff]   ;;  %v3359_v3 = vld [vmem:[%s7676_s4 + $0x48] sm:$0xff]  }
 0x1ac   :  { %3008 = vmatpush3.bf16.msra.mxu0 %v3358_v28  ;;  %v6696_v28 = vadd.f32 %v6641_v50, %v8400_v21 }
 0x1ad   :  { %3009 = vmatprep.subr.bf16.mxu0 %v3359_v3  ;;  %v6731_v3 = vld [vmem:[%s7674_s0 + $0x190] sm:$0xff] }
 0x1ae   :  { %v6671_v2 = vpop.permute.xlu0 %308  ;;  %8406 = vst [vmem:[#allocation12_spill] sm:$0xff] %v6731_v3  ;;  %v6735_v17 = vadd.f32 %v6731_v3, %v8402_v62 }
 0x1af   :  { %v6619_v54 = vpop.permute.xlu1 %1431 }
 0x1b0   :  { %v6628_v61 = vadd.f32 %v6624_v38, %v6619_v54  ;;  %8407 = vst [vmem:[#allocation7_spill] sm:$0xff] %v6735_v17  ;;  %v6760_v17 = vld [vmem:[%s7674_s0 + $0x1c8] sm:$0xff]  ;;  %3010 = vmatpush3.bf16.msra.mxu0 %v3360_v59  ;;  %v3363_v59 = vld [vmem:[%s7676_s4 + $0x58] sm:$0xff]  }
 0x1b1   :  { %8414 = vst [vmem:[#allocation53_spill] sm:$0xff] %v6760_v17  ;;  %3011 = vmatprep.subr.bf16.mxu0 %v3361_v43  ;;  %v412_v43 = vmin.f32 %v6502_v6, %v350_v25  ;;  %v6863_v25 = vld [vmem:[%s7674_s0 + $0x178] sm:$0xff]  ;;  %v3368_v6 = vld [vmem:[%s7676_s4 + $0x80] sm:$0xff]  }
 0x1b2   :  { %v6836_v22 = vpop.permute.xlu0 %318  ;;  %8421 = vst [vmem:[#allocation78_spill] sm:$0xff] %v6863_v25  ;;  %3030 = vmatpush3.bf16.msra.mxu1 %v3368_v6  ;;  %v6924_v6 = vld [vmem:[%s7674_s0 + $0x1e8] sm:$0xff] }
 0x1b3   :  { %8424 = vst [vmem:[#allocation61_spill] sm:$0xff] %v6924_v6 }
 0x1b4   :  { %v6632_v14 = vpop.permute.xlu1 %516 }
 0x1b9   :  { %v6636_v24 = vpop.permute.xlu1 %1223 }
 0x1ba   :  { %v1288_v56 = vsub.f32 %v6641_v50, %v6636_v24 }
 0x1bc   :  { %v6647_v51 = vmin.f32 %v1363_v7, %v1288_v56  ;;  %v6666_v7 = vadd.f32 %v6585_v29, %v8394_v1  ;;  %v6669_v56 = vadd.f32 %v3505_v49, %v8394_v1  ;;  %v6688_v1 = vld [vmem:[%s7674_s0 + $0x148] sm:$0xff] }
 0x1bd   :  { %v6692_v49 = vadd.f32 %v6688_v1, %v8400_v21  ;;  %v6726_v21 = vadd.f32 %v6722_v20, %v8402_v62  ;;  %v8412_v20 = vld [vmem:[#allocation57_spill] sm:$0xff] }
 0x1be   :  { %8399 = vst [vmem:[#allocation71_spill] sm:$0xff] %v6647_v51  ;;  %v6652_v8 = vpop.permute.xlu1 %293  ;;  %v6751_v51 = vld [vmem:[%s7674_s0 + $0x1c0] sm:$0xff]  ;;  %v6764_v62 = vadd.f32 %v6760_v17, %v8412_v20  ;;  %v6782_v17 = vld [vmem:[%s7674_s0 + $0x1d8] sm:$0xff] }
 0x1bf   :  { %8405 = vst [vmem:[#allocation80_spill] sm:$0xff] %v6726_v21  ;;  %8411 = vst [vmem:[#allocation75_spill] sm:$0xff] %v6751_v51  ;;  %v6755_v3 = vadd.f32 %v6751_v51, %v8412_v20  ;;  %v6773_v51 = vld [vmem:[%s7674_s0 + $0x1d0] sm:$0xff]  ;;  %v6786_v32 = vadd.f32 %v6782_v17, %v8412_v20  ;;  %v1494_v21 = vadd.f32 %v6791_v46, %v6619_v54 }
 0x1c0   :  { %8415 = vst [vmem:[#allocation37_spill] sm:$0xff] %v6764_v62  ;;  %8416 = vst [vmem:[#allocation34_spill] sm:$0xff] %v6773_v51  ;;  %v6818_v62 = vld [vmem:[%s7674_s0 + $0x138] sm:$0xff] }
 0x1c1   :  { %8413 = vst [vmem:[#allocation44_spill] sm:$0xff] %v6755_v3  ;;  %v6777_v3 = vadd.f32 %v6773_v51, %v8412_v20  ;;  %8418 = vst [vmem:[#allocation56_spill] sm:$0xff] %v6782_v17  ;;  %v3362_v20 = vld [vmem:[%s7676_s4 + $0x10] sm:$0xff]   ;;  %v354_v17 = vsub.f32 %v6585_v29, %v6603_v44  ;;  %v360_v23 = vsub.f32 %v6818_v62, %v6634_v27  ;;  %v6832_v51 = vld [vmem:[%s7674_s0 + $0x168] sm:$0xff] }
 0x1c2   :  { %v6746_v37 = vpop.permute.xlu1 %521  ;;  %8419 = vst [vmem:[#allocation50_spill] sm:$0xff] %v6786_v32  ;;  %v353_v32 = vsub.f32 %v6579_v45, %v6603_v44  ;;  %v6825_v44 = vld [vmem:[%s7674_s0 + $0x160] sm:$0xff]  ;;  %3012 = vmatpush3.bf16.msra.mxu0 %v3362_v20  ;;  %v1497_v26 = vadd.f32 %v6818_v62, %v6619_v54  ;;  %v6894_v20 = vld [vmem:[%s7674_s0 + $0x1b0] sm:$0xff] }
 0x1c3   :  { %8410 = vst [vmem:[#allocation48_spill] sm:$0xff] %v6746_v37  ;;  %8417 = vst [vmem:[#allocation4_spill] sm:$0xff] %v6777_v3  ;;  %v6798_v3 = vld [vmem:[%s7674_s0 + $0x128] sm:$0xff]  ;;  %v413_v25 = vmin.f32 %v412_v43, %v354_v17  ;;  %3013 = vmatprep.subr.bf16.mxu0 %v3363_v59  ;;  %v6901_v17 = vld [vmem:[%s7674_s0 + $0x1b8] sm:$0xff]  ;;  %v581_v59 = vadd.f32 %v6579_v45, %v6611_v60  ;;  %v8423_v43 = vmax.f32 %v6524_v42, %v6537_v5 }
 0x1c4   :  { %v392_v41 = vmin.f32 %v391_v47, %v353_v32  ;;  %v1495_v12 = vadd.f32 %v6798_v3, %v6619_v54  ;;  %v3366_v54 = vld [vmem:[%s7676_s4 + $0x20] sm:$0xff]   ;;  %v8425_v42 = vmax.f32 %v6529_v57, %v6545_v39  ;;  %v6939_v32 = vld [vmem:[%s7674_s0 + $0x1f0] sm:$0xff]  ;;  %v6946_v45 = vld [vmem:[%s7674_s0 + $0x1f8] sm:$0xff]  ;;  %v8431_v57 = vsub.f32 %v6624_v38, %v6634_v27 }
 0x1c5   :  { %v1529_v48 = vmax.f32 %v8423_v43, %v6662_v63  ;;  %v8426_v63 = vmax.f32 %v6413_v36, %v6553_v55  ;;  %8427 = vst [vmem:[#allocation74_spill] sm:$0xff] %v6939_v32  ;;  %8428 = vst [vmem:[#allocation31_spill] sm:$0xff] %v6946_v45  ;;  %v8429_v55 = vsub.f32 %v6791_v46, %v6634_v27 }
 0x1c6   :  { %v1550_v5 = vmax.f32 %v8425_v42, %v6666_v7  ;;  %3014 = vmatpush3.bf16.msra.mxu0 %v3364_v9  ;;  %v435_v45 = vmin.f32 %v6607_v15, %v8431_v57  ;;  %v456_v9 = vmin.f32 %v6609_v19, %v360_v23  ;;  %v588_v23 = vadd.f32 %v6818_v62, %v6632_v14  ;;  %v8438_v57 = vld [vmem:[#allocation23_spill] sm:$0xff] }
 0x1c7   :  { %v6851_v37 = vpop.permute.xlu1 %1439  ;;  %v1592_v43 = vmax.f32 %v8426_v63, %v6669_v56  ;;  %v393_v7 = vmin.f32 %v392_v41, %v8429_v55  ;;  %v8430_v56 = vsub.f32 %v6798_v3, %v6634_v27  ;;  %v582_v63 = vadd.f32 %v6585_v29, %v6611_v60  ;;  %3015 = vmatprep.subr.bf16.mxu0 %v3365_v18 }
 0x1c8   :  { %v6950_v39 = vpop.permute.xlu0 %3227  ;;  %v1530_v47 = vmax.f32 %v1529_v48, %v1494_v21  ;;  %v1551_v32 = vmax.f32 %v1550_v5, %v1495_v12  ;;  %v8432_v41 = vmax.f32 %v6512_v13, %v6565_v40  ;;  %v586_v18 = vadd.f32 %v6798_v3, %v6632_v14  ;;  %v8435_v48 = vld [vmem:[#allocation17_spill] sm:$0xff] }
 0x1c9   :  { %v414_v42 = vmin.f32 %v413_v25, %v8430_v56  ;;  %v1593_v6 = vmax.f32 %v1592_v43, %v1497_v26  ;;  %v585_v25 = vadd.f32 %v6791_v46, %v6632_v14  ;;  %v587_v29 = vadd.f32 %v6624_v38, %v6632_v14  ;;  %v8437_v5 = vld [vmem:[#allocation9_spill] sm:$0xff] }
 0x1ca   :  { %v620_v55 = vmax.f32 %v8432_v41, %v581_v59  ;;  %v361_v26 = vsub.f32 %v6679_v53, %v6652_v8  ;;  %v362_v13 = vsub.f32 %v6688_v1, %v6652_v8  ;;  %v363_v40 = vsub.f32 %v6641_v50, %v6652_v8  ;;  %3016 = vmatpush3.bf16.msra.mxu0 %v3366_v54 }
 0x1cb   :  { %v8433_v15 = vmax.f32 %v6514_v16, %v6568_v11  ;;  %v1286_v60 = vsub.f32 %v6679_v53, %v6636_v24  ;;  %v364_v38 = vsub.f32 %v6701_v35, %v6652_v8  ;;  %v1531_v14 = vmax.f32 %v1530_v47, %v6683_v31 }
 0x1cc   :  { %v6952_v36 = vpop.permute.xlu1 %526  ;;  %v1287_v21 = vsub.f32 %v6688_v1, %v6636_v24  ;;  %v1552_v3 = vmax.f32 %v1551_v32, %v6692_v49  ;;  %v8434_v16 = vmax.f32 %v6562_v4, %v6628_v61  ;;  %v7002_v62 = vmax.f32 %v1593_v6, %v6705_v10  ;;  %v8436_v6 = vld [vmem:[#allocation48_spill] sm:$0xff] }
 0x1cd   :  { %v641_v19 = vmax.f32 %v8433_v15, %v582_v63  ;;  %v621_v8 = vmax.f32 %v620_v55, %v585_v25  ;;  %v663_v12 = vmax.f32 %v6615_v58, %v587_v29  ;;  %v1289_v47 = vsub.f32 %v6701_v35, %v6636_v24 }
 0x1ce   :  { %v1573_v11 = vmax.f32 %v8434_v16, %v6696_v28  ;;  %v684_v49 = vmax.f32 %v6617_v52, %v588_v23  ;;  %v394_v32 = vmin.f32 %v393_v7, %v361_v26  ;;  %v415_v54 = vmin.f32 %v414_v42, %v362_v13  ;;  %v8444_v26 = vld [vmem:[#allocation15_spill] sm:$0xff]  ;;  %v8447_v16 = vld [vmem:[#allocation8_spill] sm:$0xff] }
 0x1cf   :  { %v642_v31 = vmax.f32 %v641_v19, %v586_v18  ;;  %v436_v4 = vmin.f32 %v435_v45, %v363_v40  ;;  %v1322_v61 = vmin.f32 %v6594_v33, %v1286_v60  ;;  %v457_v10 = vmin.f32 %v456_v9, %v364_v38  ;;  %v8440_v9 = vld [vmem:[#allocation39_spill] sm:$0xff] }
 0x1d0   :  { %v1502_v28 = vadd.f32 %v6825_v44, %v6851_v37  ;;  %v1503_v59 = vadd.f32 %v6832_v51, %v6851_v37  ;;  %v1343_v58 = vmin.f32 %v8435_v48, %v1287_v21  ;;  %v589_v24 = vadd.f32 %v6679_v53, %v8436_v6 }
 0x1d1   :  { %v6992_v27 = vpop.permute.xlu1 %1231  ;;  %v590_v52 = vadd.f32 %v6688_v1, %v8436_v6  ;;  %v1504_v45 = vadd.f32 %v8437_v5, %v6851_v37  ;;  %v7027_v7 = vmin.f32 %v8438_v57, %v1289_v47  ;;  %v591_v56 = vadd.f32 %v6641_v50, %v8436_v6  ;;  %v8439_v1 = vld [vmem:[#allocation78_spill] sm:$0xff] }
 0x1d2   :  { %v592_v53 = vadd.f32 %v6701_v35, %v8436_v6  ;;  %v1505_v63 = vadd.f32 %v8439_v1, %v6851_v37  ;;  %v8441_v41 = vsub.f32 %v6825_v44, %v8440_v9  ;;  %v8442_v25 = vsub.f32 %v6832_v51, %v8440_v9  ;;  %v8450_v6 = vld [vmem:[#allocation80_spill] sm:$0xff] }
 0x1d3   :  { %v8443_v50 = vsub.f32 %v8437_v5, %v8440_v9  ;;  %v1532_v23 = vmax.f32 %v1531_v14, %v1502_v28  ;;  %v1553_v35 = vmax.f32 %v1552_v3, %v1503_v59  ;;  %v8445_v13 = vrot.slane %v8444_v26, 7 }
 0x1d4   :  { %v7004_v46 = vpop.permute.xlu0 %3237  ;;  %v395_v55 = vmin.f32 %v394_v32, %v8441_v41  ;;  %v416_v18 = vmin.f32 %v415_v54, %v8442_v25  ;;  %v8446_v37 = vsub.f32 %v8439_v1, %v8440_v9  ;;  %v622_v19 = vmax.f32 %v621_v8, %v589_v24 }
 0x1d5   :  { %v437_v29 = vmin.f32 %v436_v4, %v8443_v50  ;;  %v643_v60 = vmax.f32 %v642_v31, %v590_v52  ;;  %v1574_v38 = vmax.f32 %v1573_v11, %v1504_v45  ;;  %v8448_v47 = vrot.slane %v8447_v16, 5  ;;  %v8451_v52 = vld [vmem:[#allocation33_spill] sm:$0xff] }
 0x1d6   :  { %v7024_v33 = vpop.permute.xlu1 %303  ;;  %v458_v15 = vmin.f32 %v457_v10, %v8446_v37  ;;  %v664_v14 = vmax.f32 %v663_v12, %v591_v56  ;;  %v685_v3 = vmax.f32 %v684_v49, %v592_v53  ;;  %v3230_v4 = vunpack.i.h.bf16 %v6950_v39  ;;  %v8449_v49 = vld [vmem:[#allocation47_spill] sm:$0xff] }
 0x1d7   :  { %v3229_v59 = vunpack.i.l.bf16 %v6950_v39  ;;  %v1595_v10 = vmax.f32 %v7002_v62, %v1505_v63  ;;  %v593_v11 = vadd.f32 %v6825_v44, %v6952_v36  ;;  %v594_v8 = vadd.f32 %v6832_v51, %v6952_v36  ;;  %v8452_v51 = vld [vmem:[#allocation46_spill] sm:$0xff]  ;;  %v8454_v56 = vld [vmem:[#allocation7_spill] sm:$0xff] }
 0x1d8   :  { %v7022_v43 = vpop.permute.xlu0 %3247  ;;  %v595_v31 = vadd.f32 %v8437_v5, %v6952_v36  ;;  %v7068_v48 = vmax.f32 %v1532_v23, %v8449_v49  ;;  %v7071_v24 = vmax.f32 %v1553_v35, %v8450_v6  ;;  %v596_v62 = vadd.f32 %v8439_v1, %v6952_v36  ;;  %v8456_v23 = vld [vmem:[#allocation12_spill] sm:$0xff]  ;;  %v8487_v39 = vld [vmem:[#allocation59_spill] sm:$0xff] }
 0x1d9   :  { %v3250_v42 = vunpack.i.h.bf16 %v7022_v43  ;;  %v1294_v44 = vsub.f32 %v8451_v52, %v6992_v27  ;;  %v8453_v57 = vrot.slane %v8452_v51, 3  ;;  %v7083_v53 = vmax.f32 %v1574_v38, %v8454_v56 }
 0x1da   :  { %v532_v54 = vpop.permute.xlu1 %531  ;;  %v369_v36 = vsub.f32 %v8451_v52, %v7024_v33  ;;  %v623_v25 = vmax.f32 %v622_v19, %v593_v11  ;;  %v644_v50 = vmax.f32 %v643_v60, %v594_v8  ;;  %v371_v35 = vsub.f32 %v8456_v23, %v7024_v33 }
 0x1db   :  { %v2289_v40 = vsel %vm717_vm0, %v8445_v13, %v3250_v42  ;;  %v8455_v42 = vld [vmem:[#allocation41_spill] sm:$0xff]  ;;  %v665_v37 = vmax.f32 %v664_v14, %v595_v31  ;;  %v1296_v38 = vsub.f32 %v8456_v23, %v6992_v27  ;;  %v1323_v49 = vmin.f32 %v1322_v61, %v1294_v44  ;;  %v8461_v44 = vld [vmem:[#allocation51_spill] sm:$0xff] }
 0x1dc   :  { %v7051_v21 = vpop.permute.xlu0 %3257  ;;  %v2290_v32 = vsel %vm719_vm1, %v2289_v40, %v8448_v47  ;;  %v1295_v63 = vsub.f32 %v8455_v42, %v6992_v27  ;;  %v370_v1 = vsub.f32 %v8455_v42, %v7024_v33  ;;  %v8457_v13 = vld [vmem:[#allocation5_spill] sm:$0xff]  ;;  %v8459_v60 = vrot.slane %v8387_v0, 1 }
 0x1dd   :  { %v3260_v28 = vunpack.i.h.bf16 %v7051_v21  ;;  %v1596_v40 = vmax.f32 %v1595_v10, %v8457_v13  ;;  %v396_v14 = vmin.f32 %v395_v55, %v369_v36  ;;  %v597_v31 = vadd.f32 %v8451_v52, %v532_v54 }
 0x1de   :  { %v1344_v10 = vmin.f32 %v1343_v58, %v1295_v63  ;;  %v417_v8 = vmin.f32 %v416_v18, %v370_v1  ;;  %v438_v6 = vmin.f32 %v437_v29, %v371_v35  ;;  %v3249_v58 = vunpack.i.l.bf16 %v7022_v43  ;;  %v3370_v43 = vld [vmem:[%s7676_s4 + $0x28] sm:$0xff]  }
 0x1df   :  { %v2291_v12 = vsel %vm721_vm2, %v2290_v32, %v3260_v28  ;;  %v8458_v32 = vld [vmem:[#allocation60_spill] sm:$0xff]  ;;  %v8463_v36 = vsub.f32 %v6877_v30, %v6671_v2 }
 0x1e0   :  { %v7077_v45 = vpop.permute.xlu0 %3267  ;;  %v2292_v5 = vsel %vm723_vm3, %v2291_v12, %v8453_v57  ;;  %v1448_v41 = vpop.permute.xlu1 %1447  ;;  %v372_v28 = vsub.f32 %v8458_v32, %v7024_v33  ;;  %v686_v12 = vmax.f32 %v685_v3, %v596_v62  ;;  %v1297_v19 = vsub.f32 %v8458_v32, %v6992_v27  ;;  %v8460_v3 = vld [vmem:[#allocation71_spill] sm:$0xff] }
 0x1e1   :  { %v3270_v9 = vunpack.i.h.bf16 %v7077_v45  ;;  %v598_v57 = vadd.f32 %v8455_v42, %v532_v54  ;;  %v599_v33 = vadd.f32 %v8456_v23, %v532_v54  ;;  %v600_v61 = vadd.f32 %v8458_v32, %v532_v54 }
 0x1e2   :  { %v1365_v62 = vmin.f32 %v8460_v3, %v1296_v38  ;;  %v459_v27 = vmin.f32 %v458_v15, %v372_v28  ;;  %v1511_v56 = vadd.f32 %v6877_v30, %v1448_v41  ;;  %v1386_v55 = vmin.f32 %v7027_v7, %v1297_v19 }
 0x1e3   :  { %v2293_v47 = vsel %vm725_vm4, %v2292_v5, %v3270_v9  ;;  %v1510_v5 = vadd.f32 %v8461_v44, %v1448_v41  ;;  %v1512_v18 = vadd.f32 %v6894_v20, %v1448_v41  ;;  %v1513_v29 = vadd.f32 %v6901_v17, %v1448_v41 }
 0x1e4   :  { %v7105_v11 = vsel %vm727_vm5, %v2293_v47, %v8459_v60  ;;  %v7119_v42 = vpop.permute.xlu0 %3277  ;;  %v7121_v54 = vmax.f32 %v623_v25, %v597_v31  ;;  %v8462_v15 = vsub.f32 %v8461_v44, %v6671_v2  ;;  %v418_v1 = vmin.f32 %v417_v8, %v8463_v36  ;;  %v8467_v31 = vld [vmem:[#allocation53_spill] sm:$0xff]  ;;  %v8473_v25 = vld [vmem:[#allocation50_spill] sm:$0xff] }
 0x1e5   :  { %v7129_v23 = vmax.f32 %v644_v50, %v598_v57  ;;  %v7131_v7 = vmax.f32 %v665_v37, %v599_v33  ;;  %v7133_v35 = vmax.f32 %v686_v12, %v600_v61  ;;  %v8464_v41 = vsub.f32 %v6894_v20, %v6671_v2  ;;  %v8468_v57 = vld [vmem:[#allocation34_spill] sm:$0xff]  ;;  %v8469_v33 = vld [vmem:[#allocation56_spill] sm:$0xff] }
 0x1e6   :  { %v537_v9 = vpop.permute.xlu1 %536  ;;  %v397_v63 = vmin.f32 %v396_v14, %v8462_v15  ;;  %v1534_v38 = vmax.f32 %v7068_v48, %v1510_v5  ;;  %v1555_v47 = vmax.f32 %v7071_v24, %v1511_v56  ;;  %v8465_v32 = vsub.f32 %v6901_v17, %v6671_v2  ;;  %v8466_v14 = vld [vmem:[#allocation75_spill] sm:$0xff]  ;;  %v8471_v15 = vld [vmem:[#allocation37_spill] sm:$0xff] }
 0x1e7   :  { %v439_v13 = vmin.f32 %v438_v6, %v8464_v41  ;;  %v1576_v12 = vmax.f32 %v7083_v53, %v1512_v18  ;;  %v1597_v19 = vmax.f32 %v1596_v40, %v1513_v29  ;;  %v601_v61 = vadd.f32 %v8461_v44, %v537_v9  ;;  %v8470_v18 = vld [vmem:[#allocation44_spill] sm:$0xff] }
 0x1e8   :  { %v460_v28 = vmin.f32 %v459_v27, %v8465_v32  ;;  %v602_v2 = vadd.f32 %v6877_v30, %v537_v9  ;;  %v603_v3 = vadd.f32 %v6894_v20, %v537_v9  ;;  %v604_v27 = vadd.f32 %v6901_v17, %v537_v9  ;;  %v8472_v41 = vld [vmem:[#allocation4_spill] sm:$0xff] }
 0x1e9   :  { %v1535_v29 = vmax.f32 %v1534_v38, %v8470_v18  ;;  %v1556_v36 = vmax.f32 %v1555_v47, %v8471_v15  ;;  %v1577_v32 = vmax.f32 %v1576_v12, %v8472_v41 }
 0x1ea   :  { %v646_v9 = vmax.f32 %v7129_v23, %v602_v2 }
 0x1eb   :  { %v1240_v60 = vpop.permute.xlu1 %1239 }
 0x1ec   :  { %v1302_v8 = vsub.f32 %v8466_v14, %v1240_v60  ;;  %v1303_v6 = vsub.f32 %v8467_v31, %v1240_v60  ;;  %v1304_v48 = vsub.f32 %v8468_v57, %v1240_v60  ;;  %v1305_v24 = vsub.f32 %v8469_v33, %v1240_v60 }
 0x1ed   :  { %v1598_v60 = vmax.f32 %v1597_v19, %v8473_v25  ;;  %v688_v25 = vmax.f32 %v7133_v35, %v604_v27 }
 0x1ee   :  { %v1324_v5 = vmin.f32 %v1323_v49, %v1302_v8  ;;  %v1345_v53 = vmin.f32 %v1344_v10, %v1303_v6  ;;  %v1366_v40 = vmin.f32 %v1365_v62, %v1304_v48  ;;  %v1387_v56 = vmin.f32 %v1386_v55, %v1305_v24 }
 0x1ef   :  { %v625_v62 = vmax.f32 %v7121_v54, %v601_v61  ;;  %v667_v55 = vmax.f32 %v7131_v7, %v603_v3  ;;  %v8474_v54 = vsub.f32 %v6917_v34, %v6836_v22  ;;  %v8475_v7 = vld [vmem:[#allocation61_spill] sm:$0xff] }
 0x1f0   :  { %v1325_v50 = vrot.slane %v1324_v5, 4  ;;  %v1346_v44 = vrot.slane %v1345_v53, 4  ;;  %v1367_v52 = vrot.slane %v1366_v40, 4  ;;  %v1388_v30 = vrot.slane %v1387_v56, 4  ;;  %v314_v37 = vpop.permute.xlu1 %313 }
 0x1f1   :  { %v377_v20 = vsub.f32 %v8466_v14, %v314_v37  ;;  %v378_v17 = vsub.f32 %v8467_v31, %v314_v37  ;;  %v379_v49 = vsub.f32 %v8468_v57, %v314_v37  ;;  %v380_v10 = vsub.f32 %v8469_v33, %v314_v37 }
 0x1f2   :  { %v7167_v8 = vmin.f32 %v1324_v5, %v1325_v50  ;;  %v7169_v6 = vmin.f32 %v1345_v53, %v1346_v44  ;;  %v7171_v48 = vmin.f32 %v1366_v40, %v1367_v52  ;;  %v7173_v24 = vmin.f32 %v1387_v56, %v1388_v30  ;;  %v8479_v50 = vld [vmem:[#allocation31_spill] sm:$0xff] }
 0x1f3   :  { %v398_v38 = vmin.f32 %v397_v63, %v377_v20  ;;  %v419_v47 = vmin.f32 %v418_v1, %v378_v17  ;;  %v440_v12 = vmin.f32 %v439_v13, %v379_v49  ;;  %v461_v19 = vmin.f32 %v460_v28, %v380_v10  ;;  %v8477_v1 = vld [vmem:[#allocation74_spill] sm:$0xff] }
 0x1f4   :  { %v542_v37 = vpop.permute.xlu1 %541  ;;  %v8476_v35 = vsub.f32 %v8475_v7, %v6836_v22  ;;  %v8478_v13 = vsub.f32 %v8477_v1, %v6836_v22  ;;  %v8480_v61 = vsub.f32 %v8479_v50, %v6836_v22  ;;  %v1327_v15 = vrot.slane %v7167_v8, 2 }
 0x1f5   :  { %v399_v23 = vmin.f32 %v398_v38, %v8474_v54  ;;  %v605_v2 = vadd.f32 %v8466_v14, %v542_v37  ;;  %v606_v3 = vadd.f32 %v8467_v31, %v542_v37  ;;  %v607_v27 = vadd.f32 %v8468_v57, %v542_v37 }
 0x1f6   :  { %v420_v63 = vmin.f32 %v419_v47, %v8476_v35  ;;  %v441_v28 = vmin.f32 %v440_v12, %v8478_v13  ;;  %v462_v52 = vmin.f32 %v461_v19, %v8480_v61  ;;  %v608_v5 = vadd.f32 %v8469_v33, %v542_v37 }
 0x1f7   :  { %v400_v53 = vrot.slane %v399_v23, 4  ;;  %v1348_v41 = vrot.slane %v7169_v6, 2  ;;  %v1390_v22 = vrot.slane %v7173_v24, 2  ;;  %v626_v38 = vmax.f32 %v625_v62, %v605_v2 }
 0x1f8   :  { %v421_v40 = vrot.slane %v420_v63, 4  ;;  %v442_v56 = vrot.slane %v441_v28, 4  ;;  %v463_v18 = vrot.slane %v462_v52, 4  ;;  %v647_v47 = vmax.f32 %v646_v9, %v606_v3 }
 0x1f9   :  { %v401_v30 = vmin.f32 %v399_v23, %v400_v53  ;;  %v1456_v57 = vpop.permute.xlu1 %1455  ;;  %v668_v12 = vmax.f32 %v667_v55, %v607_v27  ;;  %v689_v19 = vmax.f32 %v688_v25, %v608_v5 }
 0x1fa   :  { %v422_v14 = vmin.f32 %v420_v63, %v421_v40  ;;  %v7195_v20 = vmin.f32 %v441_v28, %v442_v56  ;;  %v7197_v31 = vmin.f32 %v462_v52, %v463_v18  ;;  %v1518_v33 = vadd.f32 %v6917_v34, %v1456_v57 }
 0x1fb   :  { %v1519_v17 = vadd.f32 %v8475_v7, %v1456_v57  ;;  %v1520_v49 = vadd.f32 %v8477_v1, %v1456_v57  ;;  %v1521_v10 = vadd.f32 %v8479_v50, %v1456_v57  ;;  %v402_v63 = vrot.slane %v401_v30, 2 }
 0x1fc   :  { %v1536_v37 = vmax.f32 %v1535_v29, %v1518_v33  ;;  %v423_v13 = vrot.slane %v422_v14, 2  ;;  %v465_v61 = vrot.slane %v7197_v31, 2 }
 0x1fd   :  { %v1557_v54 = vmax.f32 %v1556_v36, %v1519_v17  ;;  %v1578_v23 = vmax.f32 %v1577_v32, %v1520_v49  ;;  %v1599_v35 = vmax.f32 %v1598_v60, %v1521_v10 }
 0x1fe   :  { %v1537_v52 = vrot.slane %v1536_v37, 4  ;;  %v547_v18 = vpop.permute.xlu1 %546 }
 0x1ff   :  { %v1558_v53 = vrot.slane %v1557_v54, 4  ;;  %v1579_v40 = vrot.slane %v1578_v23, 4  ;;  %v1600_v56 = vrot.slane %v1599_v35, 4  ;;  %v609_v62 = vadd.f32 %v6917_v34, %v547_v18 }
 0x200   :  { %v610_v9 = vadd.f32 %v8475_v7, %v547_v18  ;;  %v611_v29 = vadd.f32 %v8477_v1, %v547_v18  ;;  %v612_v36 = vadd.f32 %v8479_v50, %v547_v18  ;;  %v1538_v32 = vmax.f32 %v1536_v37, %v1537_v52 }
 0x201   :  { %v1559_v60 = vmax.f32 %v1557_v54, %v1558_v53  ;;  %v1580_v55 = vmax.f32 %v1578_v23, %v1579_v40  ;;  %v1601_v25 = vmax.f32 %v1599_v35, %v1600_v56  ;;  %v627_v2 = vmax.f32 %v626_v38, %v609_v62 }
 0x202   :  { %v648_v3 = vmax.f32 %v647_v47, %v610_v9  ;;  %v669_v27 = vmax.f32 %v668_v12, %v611_v29  ;;  %v690_v5 = vmax.f32 %v689_v19, %v612_v36  ;;  %v1539_v57 = vrot.slane %v1538_v32, 2  ;;  %v3223_v10 = vpop.permute.xlu1 %3222  ;;  %v8483_v36 = vld [vmem:[#allocation69_spill] sm:$0xff] }
 0x203   :  { %v1560_v33 = vrot.slane %v1559_v60, 2  ;;  %v1581_v17 = vrot.slane %v1580_v55, 2  ;;  %v1602_v49 = vrot.slane %v1601_v25, 2  ;;  %v628_v34 = vrot.slane %v627_v2, 4 }
 0x204   :  { %v649_v44 = vrot.slane %v648_v3, 4  ;;  %v670_v7 = vrot.slane %v669_v27, 4  ;;  %v691_v28 = vrot.slane %v690_v5, 4  ;;  %v424_v1 = vmin.f32 %v422_v14, %v423_v13 }
 0x205   :  { %v1349_v50 = vmin.f32 %v7169_v6, %v1348_v41  ;;  %v7210_v37 = vmin.f32 %v401_v30, %v402_v63  ;;  %v7213_v54 = vmin.f32 %v7167_v8, %v1327_v15  ;;  %v629_v38 = vmax.f32 %v627_v2, %v628_v34  ;;  %v8481_v15 = vld [vmem:[#allocation35_spill] sm:$0xff]  ;;  %v8482_v63 = vld [vmem:[#allocation24_spill] sm:$0xff] }
 0x206   :  { %v650_v47 = vmax.f32 %v648_v3, %v649_v44  ;;  %v671_v12 = vmax.f32 %v669_v27, %v670_v7  ;;  %v692_v19 = vmax.f32 %v690_v5, %v691_v28  ;;  %v7215_v23 = vmax.f32 %v1538_v32, %v1539_v57  ;;  %v7217_v40 = vpop.permute.xlu1 %3232 }
 0x207   :  { %v1561_v35 = vmax.f32 %v1559_v60, %v1560_v33  ;;  %v3225_v52 = vunpack.i.h.bf16 %v3223_v10  ;;  %v3224_v53 = vunpack.i.l.bf16 %v3223_v10  ;;  %v7219_v56 = vmax.f32 %v1580_v55, %v1581_v17  ;;  %v8484_v60 = vld [vmem:[#allocation3_spill] sm:$0xff] }
 0x208   :  { %v7221_v14 = vmax.f32 %v1601_v25, %v1602_v49  ;;  %v630_v6 = vrot.slane %v629_v38, 2  ;;  %v651_v41 = vrot.slane %v650_v47, 2  ;;  %v672_v30 = vrot.slane %v671_v12, 2 }
 0x209   :  { %v693_v8 = vrot.slane %v692_v19, 2  ;;  %v1175_v44 = vsel %vm717_vm0, %v8481_v15, %v3225_v52  ;;  %v2077_v13 = vsel %vm717_vm0, %v8482_v63, %v3224_v53  ;;  %v3235_v18 = vunpack.i.h.bf16 %v7217_v40  ;;  %v8488_v53 = vld [vmem:[#allocation38_spill] sm:$0xff] }
 0x20a   :  { %v652_v28 = vmax.f32 %v650_v47, %v651_v41  ;;  %v425_v62 = vrot.slane %v424_v1, 1  ;;  %v1350_v9 = vrot.slane %v1349_v50, 1  ;;  %v631_v29 = vmax.f32 %v629_v38, %v630_v6  ;;  %v3243_v2 = vpop.permute.xlu1 %3242 }
 0x20b   :  { %v1176_v32 = vsel %vm719_vm1, %v1175_v44, %v8483_v36  ;;  %v2078_v55 = vsel %vm719_vm1, %v2077_v13, %v8484_v60  ;;  %v3234_v25 = vunpack.i.l.bf16 %v7217_v40  ;;  %v3245_v5 = vunpack.i.h.bf16 %v3243_v2  ;;  %v3369_v36 = vld [vmem:[%s7676_s4 + $0x68] sm:$0xff]  }
 0x20c   :  { %v1177_v3 = vsel %vm721_vm2, %v1176_v32, %v3230_v4  ;;  %v2079_v27 = vsel %vm721_vm2, %v2078_v55, %v3229_v59  ;;  %v3244_v57 = vunpack.i.l.bf16 %v3243_v2  ;;  %v7239_v33 = vmax.f32 %v671_v12, %v672_v30  ;;  %v3372_v2 = vld [vmem:[%s7676_s4 + $0x88] sm:$0xff]   ;;  %3017 = vmatprep.subr.bf16.mxu0 %v3369_v36 }
 0x20d   :  { %v694_v17 = vmax.f32 %v692_v19, %v693_v8  ;;  %v653_v49 = vrot.slane %v652_v28, 1  ;;  %v1562_v10 = vrot.slane %v1561_v35, 1  ;;  %v8485_v34 = vrot.slane %v8444_v26, 1  ;;  %3018 = vmatpush3.bf16.msra.mxu0 %v3370_v43 }
 0x20e   :  { %v8486_v38 = vrot.slane %v8444_v26, 3  ;;  %v426_v4 = vmin.f32 %v424_v1, %v425_v62  ;;  %v1351_v52 = vmin.f32 %v1349_v50, %v1350_v9  ;;  %v7249_v59 = vsel %vm723_vm3, %v1177_v3, %v8487_v39  ;;  %v3253_v8 = vpop.permute.xlu1 %3252 }
 0x20f   :  { %v2137_v7 = vsel %vm717_vm0, %v8485_v34, %v3245_v5  ;;  %v7253_v12 = vsel %vm723_vm3, %v2079_v27, %v8488_v53  ;;  %v8489_v19 = vrot.slane %v8447_v16, 1  ;;  %v8490_v41 = vrot.slane %v8447_v16, 7 }
 0x210   :  { %v2189_v47 = vsel %vm717_vm0, %v8486_v38, %v3244_v57  ;;  %v3255_v50 = vunpack.i.h.bf16 %v3253_v8  ;;  %v3254_v15 = vunpack.i.l.bf16 %v3253_v8  ;;  %v654_v44 = vmax.f32 %v652_v28, %v653_v49 }
 0x211   :  { %v2190_v6 = vsel %vm719_vm1, %v2189_v47, %v8489_v19  ;;  %v2138_v30 = vsel %vm719_vm1, %v2137_v7, %v8490_v41  ;;  %v1563_v63 = vmax.f32 %v1561_v35, %v1562_v10  ;;  %v404_v13 = vrot.slane %v7210_v37, 1 }
 0x212   :  { %v7264_v1 = vsel %vm721_vm2, %v2190_v6, %v3249_v58  ;;  %v632_v62 = vrot.slane %v631_v29, 1  ;;  %v1329_v9 = vrot.slane %v7213_v54, 1  ;;  %v3371_v58 = vld [vmem:[%s7676_s4 + $0xc8] sm:$0xff]   ;;  %v8491_v28 = vrot.slane %v8444_v26, 5  ;;  %v3263_v3 = vpop.permute.xlu1 %3262 }
 0x213   :  { %v2139_v32 = vsel %vm721_vm2, %v2138_v30, %v3254_v15  ;;  %v7281_v60 = vsub.f32 %v426_v4, %v654_v44  ;;  %v1541_v55 = vrot.slane %v7215_v23, 1  ;;  %v8492_v27 = vrot.slane %v8452_v51, 5  ;;  %3031 = vmatprep.subr.bf16.mxu1 %v3371_v58 }
 0x214   :  { %v2241_v35 = vsel %vm717_vm0, %v8491_v28, %v3255_v50  ;;  %v8493_v57 = vrot.slane %v8447_v16, 3  ;;  %v7293_v10 = vsub.f32 %v1351_v52, %v1563_v63  ;;  %v405_v34 = vmin.f32 %v7210_v37, %v404_v13  ;;  %3032 = vmatpush3.bf16.msra.mxu1 %v3372_v2 }
 0x215   :  { %v2140_v5 = vsel %vm723_vm3, %v2139_v32, %v8492_v27  ;;  %v3265_v7 = vunpack.i.h.bf16 %v3263_v3  ;;  %v3264_v38 = vunpack.i.l.bf16 %v3263_v3  ;;  %v633_v47 = vmax.f32 %v631_v29, %v632_v62 }
 0x216   :  { %v2242_v49 = vsel %vm719_vm1, %v2241_v35, %v8493_v57  ;;  %v1330_v4 = vmin.f32 %v7213_v54, %v1329_v9  ;;  %v3286_v39 = vpack.i.bf16 %v7281_v60, %v7293_v10  ;;  %v1542_v53 = vmax.f32 %v7215_v23, %v1541_v55  ;;  %v3273_v23 = vpop.permute.xlu1 %3272 }
 0x217   :  { %v466_v52 = vmin.f32 %v7197_v31, %v465_v61  ;;  %v695_v19 = vrot.slane %v694_v17, 1  ;;  %v2141_v37 = vsel %vm725_vm4, %v2140_v5, %v3264_v38  ;;  %v2243_v6 = vsel %vm721_vm2, %v2242_v49, %v3265_v7  ;;  %v3373_v7 = vld [vmem:[%s7676_s4 + $0x70] sm:$0xff]  }
 0x218   :  { %v7305_v29 = vsub.f32 %v405_v34, %v633_v47  ;;  %v1391_v54 = vmin.f32 %v7173_v24, %v1390_v22  ;;  %3287 = vrot.lane.b32.xlu0 %v3286_v39, %s3538_s29  ;;  %v7311_v41 = vsub.f32 %v1330_v4, %v1542_v53  ;;  %v8494_v30 = vrot.slane %v8387_v0, 3  ;;  %v3374_v38 = vld [vmem:[%s7676_s4 + $0x30] sm:$0xff]   ;;  %3019 = vmatprep.subr.bf16.mxu0 %v3373_v7  ;;  %v8512_v7 = vld [vmem:[#allocation73_spill] sm:$0xff] }
 0x219   :  { %v8495_v61 = vrot.slane %v8452_v51, 1  ;;  %v467_v50 = vrot.slane %v466_v52, 1  ;;  %v3275_v15 = vunpack.i.h.bf16 %v3273_v23  ;;  %v3274_v44 = vunpack.i.l.bf16 %v3273_v23  ;;  %3020 = vmatpush3.bf16.msra.mxu0 %v3374_v38  ;;  %v8513_v38 = vld [vmem:[#allocation62_spill] sm:$0xff] }
 0x21a   :  { %v2142_v31 = vsel %vm727_vm5, %v2141_v37, %v8494_v30  ;;  %v696_v63 = vmax.f32 %v694_v17, %v695_v19  ;;  %v1392_v13 = vrot.slane %v1391_v54, 1  ;;  %v3281_v24 = vpack.i.bf16 %v7305_v29, %v7311_v41 }
 0x21b   :  { %v2244_v8 = vsel %vm723_vm3, %v2243_v6, %v8495_v61  ;;  %v468_v22 = vmin.f32 %v466_v52, %v467_v50  ;;  %v1604_v62 = vrot.slane %v7221_v14, 1  ;;  %v8496_v9 = vrot.slane %v7195_v20, 2  ;;  %v3376_v52 = vld [vmem:[%s7676_s4 + $0x90] sm:$0xff]   ;;  %v8505_v61 = vld [vmem:[#allocation30_spill] sm:$0xff] }
 0x21c   :  { %v2143_v43 = vsel %vm729_vm6, %v2142_v31, %v3274_v44  ;;  %v2245_v58 = vsel %vm725_vm4, %v2244_v8, %v3275_v15  ;;  %v1393_v28 = vmin.f32 %v1391_v54, %v1392_v13  ;;  %v674_v35 = vrot.slane %v7239_v33, 1  ;;  %3282 = vrot.lane.b32.xlu1 %v3281_v24, %s3538_s29  ;;  %v3379_v31 = vld [vmem:[%s7676_s4 + $0xd8] sm:$0xff]  }
 0x21d   :  { %v445_v36 = vmin.f32 %v7195_v20, %v8496_v9  ;;  %v8497_v17 = vrot.slane %v8387_v0, 7  ;;  %v8498_v55 = vrot.slane %v8387_v0, 5  ;;  %v7336_v3 = vsub.f32 %v468_v22, %v696_v63  ;;  %v3380_v44 = vld [vmem:[%s7676_s4 + $0x98] sm:$0xff]   ;;  %v8507_v63 = vld [vmem:[#allocation70_spill] sm:$0xff] }
 0x21e   :  { %v1605_v20 = vmax.f32 %v7221_v14, %v1604_v62  ;;  %v675_v5 = vmax.f32 %v7239_v33, %v674_v35  ;;  %v8499_v57 = vrot.slane %v7171_v48, 2  ;;  %v1583_v34 = vrot.slane %v7219_v56, 1  ;;  %v3375_v14 = vld [vmem:[%s7676_s4 + $0xd0] sm:$0xff]   ;;  %v3382_v35 = vld [vmem:[%s7676_s4 + $0xe0] sm:$0xff]  }
 0x21f   :  { %v2246_v32 = vsel %vm727_vm5, %v2245_v58, %v8497_v17  ;;  %v7334_v2 = vpack.i.bf16 %v8498_v55, %v2143_v43  ;;  %v446_v27 = vrot.slane %v445_v36, 1  ;;  %v8500_v33 = vunpack.i.l.bf16 %v7119_v42  ;;  %3033 = vmatprep.subr.bf16.mxu1 %v3375_v14  ;;  %v3394_v14 = vld [vmem:[%s7676_s4 + $0xf8] sm:$0xff]  }
 0x220   :  { %v1370_v49 = vmin.f32 %v7171_v48, %v8499_v57  ;;  %v1179_v48 = vsel %vm725_vm4, %v7249_v59, %v3235_v18  ;;  %v7363_v4 = vsub.f32 %v1393_v28, %v1605_v20  ;;  %v8501_v39 = vrot.slane %v8452_v51, 7  ;;  %3034 = vmatpush3.bf16.msra.mxu1 %v3376_v52  ;;  %v3381_v28 = vld [vmem:[%s7676_s4 + $0x140] sm:$0xff]   ;;  %v3386_v20 = vld [vmem:[%s7676_s4 + $0xe8] sm:$0xff]   ;;  %v8511_v57 = vld [vmem:[#allocation72_spill] sm:$0xff] }
 0x221   :  { %v7357_v47 = vsel %vm729_vm6, %v7105_v11, %v8500_v33  ;;  %v2081_v11 = vsel %vm725_vm4, %v7253_v12, %v3234_v25  ;;  %v447_v19 = vmin.f32 %v445_v36, %v446_v27  ;;  %v1584_v18 = vmax.f32 %v7219_v56, %v1583_v34  ;;  %3035 = vmatprep.subr.bf16.mxu1 %v3379_v31  ;;  %v3392_v34 = vld [vmem:[%s7676_s4 + $0xb0] sm:$0xff]   ;;  %v3396_v33 = vld [vmem:[%s7676_s4 + $0xb8] sm:$0xff]  }
 0x222   :  { %v2192_v53 = vsel %vm723_vm3, %v7264_v1, %v8501_v39  ;;  %v1371_v37 = vrot.slane %v1370_v49, 1  ;;  %v3296_v59 = vpack.i.bf16 %v7336_v3, %v7363_v4  ;;  %v8502_v1 = vunpack.i.l.bf16 %v7051_v21  ;;  %v3377_v21 = vld [vmem:[%s7676_s4 + $0x78] sm:$0xff]   ;;  %v8516_v39 = vld [vmem:[#allocation55_spill] sm:$0xff] }
 0x223   :  { %v8503_v54 = vunpack.i.h.bf16 %v7119_v42  ;;  %v7385_v25 = vsub.f32 %v447_v19, %v675_v5  ;;  %v8504_v56 = vmov %v8498_v55  ;;  %v3378_v42 = vld [vmem:[%s7676_s4 + $0x38] sm:$0xff]   ;;  %v1180_v8 = vsel %vm727_vm5, %v1179_v48, %v8505_v61  ;;  %3021 = vmatprep.subr.bf16.mxu0 %v3377_v21  ;;  %v3388_v5 = vld [vmem:[%s7676_s4 + $0xa8] sm:$0xff]  }
 0x224   :  { %v2193_v6 = vsel %vm725_vm4, %v2192_v53, %v8502_v1  ;;  %v1372_v12 = vmin.f32 %v1370_v49, %v1371_v37  ;;  %3297 = vrot.lane.b32.xlu0 %v3296_v59, %s3538_s29  ;;  %v8506_v50 = vunpack.i.l.bf16 %v7077_v45  ;;  %v2082_v13 = vsel %vm727_vm5, %v2081_v11, %v8507_v63  ;;  %3022 = vmatpush3.bf16.msra.mxu0 %v3378_v42  ;;  %v3390_v49 = vld [vmem:[%s7676_s4 + $0xf0] sm:$0xff]   ;;  %v8515_v48 = vld [vmem:[#allocation67_spill] sm:$0xff] }
 0x225   :  { %v2247_v40 = vsel %vm729_vm6, %v2246_v32, %v8503_v54  ;;  %v2194_v23 = vsel %vm727_vm5, %v2193_v6, %v8504_v56  ;;  %v8508_v22 = vmov %v8497_v17  ;;  %v3240_v9 = vunpack.i.h.bf16 %v7004_v46  ;;  %3036 = vmatpush3.bf16.msra.mxu1 %v3380_v44  ;;  %3051 = vmatprep.subr.bf16.mxu0 %v3381_v28 }
 0x226   :  { %v3351_v30 = vpack.i.bf16 %v2247_v40, %v7357_v47  ;;  %v2195_v15 = vsel %vm729_vm6, %v2194_v23, %v8506_v50  ;;  %v1608_v24 = vsub.f32 %v1372_v12, %v1584_v18  ;;  %v3239_v36 = vunpack.i.l.bf16 %v7004_v46  ;;  %v3384_v46 = vld [vmem:[%s7676_s4 + $0xa0] sm:$0xff]   ;;  %3037 = vmatprep.subr.bf16.mxu1 %v3382_v35  ;;  %v8514_v47 = vld [vmem:[#allocation68_spill] sm:$0xff] }
 0x227   :  { %v3346_v62 = vpack.i.bf16 %v8508_v22, %v2195_v15  ;;  %v8509_v45 = vrot.slane %v8444_v26, 1  ;;  %v8510_v43 = vrot.slane %v8444_v26, 7  ;;  %v1181_v32 = vsel %vm729_vm6, %v1180_v8, %v3240_v9 }
 0x228   :  { %v3291_v17 = vpack.i.bf16 %v7385_v25, %v1608_v24  ;;  %v2083_v55 = vsel %vm729_vm6, %v2082_v13, %v3239_v36 }
 0x229   :  { %v3306_v58 = vpack.i.bf16 %v8510_v43, %v8509_v45  ;;  %3038 = vmatpush3.bf16.msra.mxu1 %v3384_v46  ;;  %v3301_v27 = vpack.i.bf16 %v1181_v32, %v2083_v55  ;;  %v8517_v43 = vrot.slane %v8447_v16, 6  ;;  %v3385_v55 = vld [vmem:[%s7676_s4 + $0x148] sm:$0xff]  }
 0x22a   :  { %3292 = vrot.lane.b32.xlu1 %v3291_v17, %s3538_s29  ;;  %3039 = vmatprep.subr.bf16.mxu1 %v3386_v20  ;;  %v3383_v17 = vld [vmem:[%s7676_s4 + $0x100] sm:$0xff]   ;;  %v8518_v20 = vrot.slane %v8444_v26, 2 }
 0x22b   :  { %3307 = vrot.lane.b32.xlu0 %v3306_v58, %s3538_s29 }
 0x22d   :  { %3040 = vmatpush3.bf16.msra.mxu1 %v3388_v5 }
 0x22e   :  { %3302 = vrot.lane.b32.xlu1 %v3301_v27, %s3538_s29  ;;  %3041 = vmatprep.subr.bf16.mxu1 %v3390_v49 }
 0x22f   :  { %3317 = vrot.lane.b32.xlu0 %v8511_v57, %s3538_s29 }
 0x231   :  { %3042 = vmatpush3.bf16.msra.mxu1 %v3392_v34  ;;  %v8519_v34 = vrot.slane %v8452_v51, 4 }
 0x232   :  { %3312 = vrot.lane.b32.xlu1 %v8513_v38, %s3538_s29  ;;  %3043 = vmatprep.subr.bf16.mxu1 %v3394_v14  ;;  %v3387_v14 = vld [vmem:[%s7676_s4 + $0x108] sm:$0xff]  }
 0x233   :  { %3327 = vrot.lane.b32.xlu0 %v8512_v7, %s3538_s29 }
 0x235   :  { %3044 = vmatpush3.bf16.msra.mxu1 %v3396_v33 }
 0x236   :  { %3322 = vrot.lane.b32.xlu1 %v8515_v48, %s3538_s29  ;;  %v3389_v48 = vld [vmem:[%s7676_s4 + $0x150] sm:$0xff]  }
 0x237   :  { %3337 = vrot.lane.b32.xlu0 %v8514_v47, %s3538_s29 }
 0x23a   :  { %3332 = vrot.lane.b32.xlu1 %v8516_v39, %s3538_s29  ;;  %v8520_v39 = vrot.slane %v8444_v26, 6 }
 0x23b   :  { %3342 = vrot.lane.b32.xlu0 %v7334_v2, %s3538_s29 }
 0x23e   :  { %3347 = vrot.lane.b32.xlu1 %v3346_v62, %s3538_s29 }
 0x242   :  { %3352 = vrot.lane.b32.xlu1 %v3351_v30, %s3538_s29 }
 0x28a   :  { %v3288_v53 = vpop.permute.xlu0 %3287 }
 0x28b   :  { %v3290_v1 = vunpack.i.h.bf16 %v3288_v53  ;;  %v3289_v6 = vunpack.i.l.bf16 %v3288_v53 }
 0x28e   :  { %v3283_v52 = vpop.permute.xlu1 %3282 }
 0x28f   :  { %v3285_v11 = vunpack.i.h.bf16 %v3283_v52  ;;  %v3284_v19 = vunpack.i.l.bf16 %v3283_v52 }
 0x291   :  { %v718_v37 = vsel %vm717_vm0, %v7305_v29, %v3285_v11  ;;  %v1626_v18 = vsel %vm717_vm0, %v7311_v41, %v3284_v19 }
 0x292   :  { %v720_v2 = vsel %vm719_vm1, %v718_v37, %v7281_v60  ;;  %v1627_v59 = vsel %vm719_vm1, %v1626_v18, %v7293_v10 }
 0x293   :  { %v722_v40 = vsel %vm721_vm2, %v720_v2, %v3290_v1  ;;  %v1628_v12 = vsel %vm721_vm2, %v1627_v59, %v3289_v6  ;;  %v3391_v59 = vld [vmem:[%s7676_s4 + $0x110] sm:$0xff]   ;;  %v8521_v6 = vrot.slane %v8452_v51, 6 }
 0x294   :  { %v724_v29 = vsel %vm723_vm3, %v722_v40, %v7385_v25  ;;  %v1629_v41 = vsel %vm723_vm3, %v1628_v12, %v1608_v24  ;;  %v8522_v40 = vrot.slane %v8447_v16, 4 }
 0x296   :  { %v3298_v54 = vpop.permute.xlu0 %3297 }
 0x297   :  { %v3300_v42 = vunpack.i.h.bf16 %v3298_v54  ;;  %v3299_v10 = vunpack.i.l.bf16 %v3298_v54 }
 0x29c   :  { %v3293_v23 = vpop.permute.xlu1 %3292 }
 0x29d   :  { %v3308_v56 = vpop.permute.xlu0 %3307  ;;  %v3295_v21 = vunpack.i.h.bf16 %v3293_v23  ;;  %v3294_v60 = vunpack.i.l.bf16 %v3293_v23 }
 0x29e   :  { %v3310_v30 = vunpack.i.h.bf16 %v3308_v56  ;;  %v3309_v9 = vunpack.i.l.bf16 %v3308_v56  ;;  %v8523_v56 = vrot.slane %v8387_v0, 2 }
 0x29f   :  { %v726_v31 = vsel %vm725_vm4, %v724_v29, %v3295_v21  ;;  %v1630_v61 = vsel %vm725_vm4, %v1629_v41, %v3294_v60  ;;  %v3393_v29 = vld [vmem:[%s7676_s4 + $0x158] sm:$0xff]  }
 0x2a0   :  { %v728_v50 = vsel %vm727_vm5, %v726_v31, %v7336_v3  ;;  %v1631_v25 = vsel %vm727_vm5, %v1630_v61, %v7363_v4  ;;  %v2110_v15 = vsel %vm717_vm0, %v8444_v26, %v3310_v30  ;;  %v3303_v44 = vpop.permute.xlu1 %3302  ;;  %v2162_v27 = vsel %vm717_vm0, %v8518_v20, %v3309_v9  ;;  %v3395_v61 = vld [vmem:[%s7676_s4 + $0x118] sm:$0xff]  }
 0x2a1   :  { %v7483_v8 = vpop.permute.xlu0 %3317  ;;  %v3305_v13 = vunpack.i.h.bf16 %v3303_v44  ;;  %v3304_v24 = vunpack.i.l.bf16 %v3303_v44  ;;  %v730_v22 = vsel %vm729_vm6, %v728_v50, %v3300_v42  ;;  %v1632_v62 = vsel %vm729_vm6, %v1631_v25, %v3299_v10 }
 0x2a2   :  { %v3319_v63 = vunpack.i.l.bf16 %v7483_v8  ;;  %v2111_v58 = vsel %vm719_vm1, %v2110_v15, %v8517_v43  ;;  %v2163_v33 = vsel %vm719_vm1, %v2162_v27, %v8447_v16  ;;  %v3320_v50 = vunpack.i.h.bf16 %v7483_v8  ;;  %v3398_v43 = vld [vmem:[%s7676_s4 + $0x120] sm:$0xff]  }
 0x2a3   :  { %v2321_v36 = vsel %vm2320_vm7, %v730_v22, %v3305_v13  ;;  %v2322_v3 = vsel %vm2320_vm7, %v1632_v62, %v3304_v24  ;;  %v8524_v25 = vrot.slane %v8387_v0, 4  ;;  %v8525_v44 = vrot.slane %v8452_v51, 2  ;;  %v3397_v24 = vld [vmem:[%s7676_s4 + $0x160] sm:$0xff]  }
 0x2a4   :  { %v2327_v4 = vpack.c.bf16 %v2321_v36, %v2321_v36  ;;  %v3313_v28 = vpop.permute.xlu1 %3312  ;;  %v2328_v35 = vpack.c.bf16 %v2322_v3, %v2322_v3  ;;  %v2112_v46 = vsel %vm721_vm2, %v2111_v58, %v3319_v63  ;;  %v8526_v58 = vrot.slane %v8444_v26, 4 }
 0x2a5   :  { %v7496_v45 = vpop.permute.xlu0 %3327  ;;  %v3315_v5 = vunpack.i.h.bf16 %v3313_v28  ;;  %v3314_v57 = vunpack.i.l.bf16 %v3313_v28  ;;  %v2113_v7 = vsel %vm723_vm3, %v2112_v46, %v8519_v34  ;;  %v8527_v26 = vrot.slane %v8447_v16, 2 }
 0x2a6   :  { %v3329_v32 = vunpack.i.l.bf16 %v7496_v45  ;;  %2756 = vmatprep.mubr.bf16.mxu0 %v2328_v35  ;;  %v2214_v28 = vsel %vm717_vm0, %v8526_v58, %v3320_v50  ;;  %v3330_v35 = vunpack.i.h.bf16 %v7496_v45 }
 0x2a7   :  { %2757 = vmatmul.mubr.bf16.vlgmr.msra.gmra.mrb[4].mxu0 %v2327_v4  ;;  %v2266_v53 = vsel %vm717_vm0, %v8520_v39, %v3315_v5  ;;  %v2164_v52 = vsel %vm721_vm2, %v2163_v33, %v3314_v57  ;;  %v2215_v27 = vsel %vm719_vm1, %v2214_v28, %v8527_v26  ;;  %v3400_v5 = vld [vmem:[%s7676_s4 + $0x128] sm:$0xff]  }
 0x2a8   :  { %3052 = vmatpush3.bf16.msra.mxu0 %v3383_v17  ;;  %v3323_v38 = vpop.permute.xlu1 %3322  ;;  %v2114_v47 = vsel %vm725_vm4, %v2113_v7, %v3329_v32  ;;  %v2165_v54 = vsel %vm723_vm3, %v2164_v52, %v8521_v6  ;;  %v2267_v12 = vsel %vm719_vm1, %v2266_v53, %v8522_v40  ;;  %v3399_v32 = vld [vmem:[%s7676_s4 + $0x168] sm:$0xff]   ;;  %v2216_v57 = vsel %vm721_vm2, %v2215_v27, %v3330_v35  ;;  %v3401_v7 = vld [vmem:[%s7676_s4 + $0x170] sm:$0xff]   ;;  %v2849_v6 = vld [vmem:[%s7677_s6 + $0x20] sm:$0xff] }
 0x2a9   :  { %v7512_v49 = vpop.permute.xlu0 %3337  ;;  %3053 = vmatprep.subr.bf16.mxu0 %v3385_v55  ;;  %v3325_v11 = vunpack.i.h.bf16 %v3323_v38  ;;  %v3324_v19 = vunpack.i.l.bf16 %v3323_v38  ;;  %v2115_v23 = vsel %vm727_vm5, %v2114_v47, %v8523_v56  ;;  %v2217_v16 = vsel %vm723_vm3, %v2216_v57, %v8452_v51  ;;  %v3402_v38 = vld [vmem:[%s7676_s4 + $0x130] sm:$0xff]   ;;  %v3404_v51 = vld [vmem:[%s7676_s4 + $0x138] sm:$0xff]   ;;  %v3006_v27 = vld [vmem:[%s7679_s7] ss:$0 sm:$0xff] }
 0x2aa   :  { %v3339_v37 = vunpack.i.l.bf16 %v7512_v49  ;;  %v3340_v34 = vunpack.i.h.bf16 %v7512_v49  ;;  %v3403_v49 = vld [vmem:[%s7676_s4 + $0x178] sm:$0xff]  }
 0x2ab   :  { %v2166_v41 = vsel %vm725_vm4, %v2165_v54, %v3324_v19  ;;  %v2268_v30 = vsel %vm721_vm2, %v2267_v12, %v3325_v11  ;;  %v3539_v19 = vmov 0.0|0.0   ;;  %v2850_v54 = vld [vmem:[%s7677_s6 + $0x28] sm:$0xff]  ;;  %v2851_v12 = vld [vmem:[%s7677_s6 + $0x30] sm:$0xff]  ;;  %v2852_v56 = vld [vmem:[%s7677_s6 + $0x38] sm:$0xff] }
 0x2ac   :  { %3054 = vmatpush3.bf16.msra.mxu0 %v3387_v14  ;;  %v3333_v2 = vpop.permute.xlu1 %3332  ;;  %v2116_v42 = vsel %vm729_vm6, %v2115_v23, %v3339_v37  ;;  %v2167_v15 = vsel %vm727_vm5, %v2166_v41, %v8524_v25  ;;  %v2269_v63 = vsel %vm723_vm3, %v2268_v30, %v8525_v44  ;;  %v2218_v14 = vsel %vm725_vm4, %v2217_v16, %v3340_v34  ;;  %v2846_v37 = vld [vmem:[%s7677_s6 + $0x8] sm:$0xff]  ;;  %v2853_v23 = vld [vmem:[%s7677_s6 + $0x40] sm:$0xff]  ;;  %v2860_v25 = vld [vmem:[%s7677_s6 + $0x78] sm:$0xff] }
 0x2ad   :  { %v7531_v18 = vpop.permute.xlu0 %3342  ;;  %3055 = vmatprep.subr.bf16.mxu0 %v3389_v48  ;;  %v3335_v21 = vunpack.i.h.bf16 %v3333_v2  ;;  %v3334_v60 = vunpack.i.l.bf16 %v3333_v2  ;;  %v8528_v48 = vrot.slane %v8387_v0, 6  ;;  %3125 = vmatprep.subr.bf16.mxu1 %v3539_v19  ;;  %v3132_v40 = vpack.c.bf16 %v2850_v54, %v2849_v6  ;;  %v2854_v41 = vld [vmem:[%s7677_s6 + $0x48] sm:$0xff] }
 0x2ae   :  { %v3344_v1 = vunpack.i.l.bf16 %v7531_v18  ;;  %v3345_v33 = vunpack.i.h.bf16 %v7531_v18  ;;  %v2847_v18 = vld [vmem:[%s7677_s6 + $0x10] sm:$0xff]  ;;  %v3138_v30 = vpack.c.bf16 %v2854_v41, %v2853_v23 }
 0x2af   :  { %v2168_v22 = vsel %vm729_vm6, %v2167_v15, %v3334_v60  ;;  %v2270_v62 = vsel %vm725_vm4, %v2269_v63, %v3335_v21  ;;  %v2219_v39 = vsel %vm727_vm5, %v2218_v14, %v8528_v48  ;;  %v2855_v21 = vld [vmem:[%s7677_s6 + $0x50] sm:$0xff]  ;;  %v2856_v60 = vld [vmem:[%s7677_s6 + $0x58] sm:$0xff]  ;;  %v3541_v15 = vmov 0.0  }
 0x2b0   :  { %3056 = vmatpush3.bf16.msra.mxu0 %v3391_v59  ;;  %v3348_v10 = vpop.permute.xlu1 %3347  ;;  %v2323_v31 = vsel %vm2320_vm7, %v2116_v42, %v3344_v1  ;;  %v2271_v17 = vsel %vm727_vm5, %v2270_v62, %v8387_v0  ;;  %v2220_v53 = vsel %vm729_vm6, %v2219_v39, %v3345_v33  ;;  %v2845_v0 = vld [vmem:[%s7677_s6] sm:$0xff]  ;;  %v2848_v59 = vld [vmem:[%s7677_s6 + $0x18] sm:$0xff]  ;;  %v3141_v42 = vpack.c.bf16 %v2856_v60, %v2855_v21 }
 0x2b1   :  { %v3349_v13 = vunpack.i.l.bf16 %v3348_v10  ;;  %3057 = vmatprep.subr.bf16.mxu0 %v3393_v29  ;;  %v3350_v9 = vunpack.i.h.bf16 %v3348_v10  ;;  %v2329_v8 = vpack.c.bf16 %v2323_v31, %v2323_v31  ;;  %v3126_v2 = vpack.c.bf16 %v2846_v37, %v2845_v0  ;;  %v2857_v10 = vld [vmem:[%s7677_s6 + $0x60] sm:$0xff]  ;;  %v2858_v31 = vld [vmem:[%s7677_s6 + $0x68] sm:$0xff] }
 0x2b2   :  { %v3129_v1 = vpack.c.bf16 %v2848_v59, %v2847_v18  ;;  %v3135_v29 = vpack.c.bf16 %v2852_v56, %v2851_v12  ;;  %v3144_v50 = vpack.c.bf16 %v2858_v31, %v2857_v10 }
 0x2b3   :  { %v2324_v36 = vsel %vm2320_vm7, %v2168_v22, %v3349_v13  ;;  %v2272_v55 = vsel %vm729_vm6, %v2271_v17, %v3350_v9  ;;  %v2957_v9 = vld [vmem:[%s7678_s5] ss:$0 sm:$0xff] }
 0x2b4   :  { %3058 = vmatpush3.bf16.msra.mxu0 %v3395_v61  ;;  %v3353_v3 = vpop.permute.xlu1 %3352  ;;  %v2330_v4 = vpack.c.bf16 %v2324_v36, %v2324_v36  ;;  %v2859_v61 = vld [vmem:[%s7677_s6 + $0x70] sm:$0xff] }
 0x2b5   :  { %v3354_v46 = vunpack.i.l.bf16 %v3353_v3  ;;  %3059 = vmatprep.subr.bf16.mxu0 %v3397_v24  ;;  %v3355_v47 = vunpack.i.h.bf16 %v3353_v3  ;;  %v3147_v44 = vpack.c.bf16 %v2860_v25, %v2859_v61 }
 0x2b6   :  { %2796 = vmatprep.mubr.bf16.mxu1 %v2330_v4 }
 0x2b7   :  { %2797 = vmatmul.mubr.bf16.vlgmr.msra.gmra.mrb[4].mxu1 %v2329_v8  ;;  %v2326_v20 = vsel %vm2320_vm7, %v2272_v55, %v3354_v46  ;;  %v2325_v52 = vsel %vm2320_vm7, %v2220_v53, %v3355_v47 }
 0x2b8   :  { %3060 = vmatpush3.bf16.msra.mxu0 %v3398_v43  ;;  %v2332_v45 = vpack.c.bf16 %v2326_v20, %v2326_v20  ;;  %v2331_v11 = vpack.c.bf16 %v2325_v52, %v2325_v52  ;;  %3127 = vmatpush3.bf16.msra.mxu1 %v3126_v2 }
 0x2b9   :  { %3061 = vmatprep.subr.bf16.mxu0 %v3399_v32  ;;  %3128 = vmatprep.subr.bf16.mxu1 %v3539_v19 }
 0x2ba   :  { %2836 = vmatprep.mubr.bf16.mxu0 %v2332_v45  ;;  %3122 = vmatprep.mubr.msk.f32.mxu1 %vm3540_vm8, %v3541_v15 }
 0x2bc   :  { %3062 = vmatpush3.bf16.msra.mxu0 %v3400_v5  ;;  %3130 = vmatpush3.bf16.msra.mxu1 %v3129_v1 }
 0x2bd   :  { %3063 = vmatprep.subr.bf16.mxu0 %v3401_v7  ;;  %3131 = vmatprep.subr.bf16.mxu1 %v3539_v19 }
 0x2c0   :  { %3064 = vmatpush3.bf16.msra.mxu0 %v3402_v38  ;;  %3133 = vmatpush3.bf16.msra.mxu1 %v3132_v40 }
 0x2c1   :  { %3065 = vmatprep.subr.bf16.mxu0 %v3403_v49  ;;  %3134 = vmatprep.subr.bf16.mxu1 %v3539_v19 }
 0x2c4   :  { %3066 = vmatpush3.bf16.msra.mxu0 %v3404_v51  ;;  %3136 = vmatpush3.bf16.msra.mxu1 %v3135_v29 }
 0x2c5   :  { %3137 = vmatprep.subr.bf16.mxu1 %v3539_v19 }
 0x2c7   :  { %2837 = vmatmul.mubr.bf16.vlgmr.msra.gmra.mrb[8].mxu0 %v2331_v11 }
 0x2c8   :  { %3139 = vmatpush3.bf16.msra.mxu1 %v3138_v30 }
 0x2c9   :  { %3140 = vmatprep.subr.bf16.mxu1 %v3539_v19 }
 0x2cc   :  { %3142 = vmatpush3.bf16.msra.mxu1 %v3141_v42 }
 0x2cd   :  { %3143 = vmatprep.subr.bf16.mxu1 %v3539_v19 }
 0x2d0   :  { %3145 = vmatpush3.bf16.msra.mxu1 %v3144_v50 }
 0x2d1   :  { %3146 = vmatprep.subr.bf16.mxu1 %v3539_v19 }
 0x2d4   :  { %3148 = vmatpush3.bf16.msra.mxu1 %v3147_v44 }
 0x37a   :  { %v3023_v63 = vpop.f32.mrb[4].mxu0 }
 0x37b   :  { %v3024_v13 = vpop.f32.mrb[5].mxu0 }
 0x37c   :  { %v3025_v24 = vadd.f32 %v3024_v13, %v3023_v63  ;;  %v3026_v22 = vpop.f32.mrb[6].mxu0 }
 0x37d   :  { %v3027_v62 = vpop.f32.mrb[7].mxu0 }
 0x37e   :  { %v2759_v3 = vadd.f32 %v3025_v24, %v2957_v9 }
 0x38a   :  { %v3045_v8 = vpop.f32.mrb[4].mxu1 }
 0x38b   :  { %v3046_v36 = vpop.f32.mrb[5].mxu1 }
 0x38c   :  { %v3047_v4 = vadd.f32 %v3046_v36, %v3045_v8  ;;  %v3048_v43 = vpop.f32.mrb[6].mxu1 }
 0x38d   :  { %v3049_v58 = vpop.f32.mrb[7].mxu1 }
 0x38e   :  { %v2799_v28 = vadd.f32 %v3047_v4, %v2759_v3 }
 0x39a   :  { %v3067_v35 = vpop.f32.mrb[8].mxu0 }
 0x39b   :  { %v3068_v17 = vpop.f32.mrb[9].mxu0 }
 0x39c   :  { %v3069_v46 = vadd.f32 %v3068_v17, %v3067_v35  ;;  %v3070_v32 = vpop.f32.mrb[10].mxu0 }
 0x39d   :  { %v3071_v55 = vpop.f32.mrb[11].mxu0 }
 0x39e   :  { %v2839_v20 = vadd.f32 %v3069_v46, %v2799_v28 }
 0x3a0   :  { %v2844_v26 = vmax.f32 %v2839_v20, 0.0 }
 0x3a2   :  { %3123 = vmatmul.mubr.f32.vlgmr.msra.gmra.mrb[8].mxu1 %v2844_v26 }
 0x475   :  { %v2934_v45 = vpop.f32.mrb[8].mxu1 }
 0x476   :  { %v2935_v5 = vadd.f32 %v3006_v27, %v2934_v45  ;;  %v3124_v57 = vpop.f32.mrb[9].mxu1 }
 0x478   :  { %v2939_v34 = vsel %vm2938_vm9, %v2935_v5, -inf }
 0x479   :  { %2940 = vmax.xlane.f32.xlu0 %v2939_v34 }
 0x506   :  { %v2941_v7 = vpop.xlane.xlu0 %2940 }
 0x507   :  { %v2942_v16 = vsub.f32 %v2935_v5, %v2941_v7 }
 0x509   :  { %v2943_v38 = vmul.f32 1.442695, %v2942_v16 }
 0x50b   :  { %3405 = vpow2.f32 %v2943_v38 }
 0x515   :  { %v3406_v14 = vpop.eup %3405 }
 0x516   :  { %v2945_v33 = vsel %vm2938_vm9, %v3406_v14, 0.0 }
 0x517   :  { %2946 = vadd.xlane.f32.xlu1 %v2945_v33 }
 0x5a4   :  { %v2947_v49 = vpop.xlane.xlu1 %2946 }
 0x5a5   :  { %3407 = vlog2.f32 %v2947_v49 }
 0x5af   :  { %v3408_v47 = vpop.eup %3407 }
 0x5b0   :  { %v2949_v48 = vmul.f32 0.6931472, %v3408_v47 }
 0x5b2   :  { %v2950_v39 = vadd.f32 %v2949_v48, %v2941_v7 }
 0x5b4   :  { %v2951_v51 = vsub.f32 %v2935_v5, %v2950_v39 }
 0x5b6   :  { %2952 = vst.msk [vmem:[%s7680_s8] sm:$0xff] %vm2938_vm9, %v2951_v51 }

</bundles_post_ra>
